<compile_context>
chip_gen: v7x
topology: tpu7x:2x2x1
jax: 0.10.0
libtpu: 0.0.40
codegen_flags: <defaults>
</compile_context>

<pallas_src>
import math
from functools import partial

import jax
import jax.numpy as jnp
from jax.experimental import pallas as pl
from jax.experimental.pallas import tpu as pltpu


def _silu(v):
    # x*sigmoid(x) == 0.5*x*(1 + tanh(0.5*x)): tanh goes to the EUP slot instead
    # of the exp + divide VALU path of jax.nn.sigmoid.
    u = 0.5 * v
    return u * (1.0 + jnp.tanh(u))


def _sigmoid(v):
    return 0.5 * jnp.tanh(0.5 * v) + 0.5


def mbconv_kernel(H, W, Csq,
                  x_ref, w_exp_ref, w_red_ref, pk_ref, pool_ref, gexp_ref,
                  o_ref):
    Cin, S = x_ref.shape            # S = Nb * H * W (Nb images fused on the lane axis)
    Cexp = w_exp_ref.shape[0]
    Cout = o_ref.shape[0]
    HW = H * W

    # ---- unpack the packed f32 parameter slab (static slices, loaded once) ----
    pk = pk_ref[...]
    b_exp = pk[:, 0:1]                                   # (Cexp, 1)
    b_dw = pk[:, 1:2]                                    # (Cexp, 1)
    b_se2 = pk[:, 2:3]                                   # (Cexp, 1)
    b_red = pk[:Cout, 3:4]                               # (Cout, 1)
    b_se1 = pk[:Csq, 4:5]                                # (Csq, 1)
    w_dw = pk[:, 5:14]                                   # (Cexp, 9), BN scale folded
    w_se2t = pk[:, 14:14 + Csq]                          # (Cexp, Csq)
    w_se1t = pk[:Csq, 14 + Csq:14 + Csq + Cexp]          # (Csq, Cexp)

    x_f32 = x_ref[...].astype(jnp.float32)               # (Cin, S), also the residual

    # ---- expand_pw: 1x1 conv on the MXU (bf16 in / f32 acc, BN scale folded) ----
    y = jnp.dot(w_exp_ref[...], x_f32.astype(jnp.bfloat16),
                preferred_element_type=jnp.float32)      # (Cexp, S)
    y = _silu(y + b_exp)

    # ---- border masks rebuilt from lane % HW (valid on the fused Nb*HW slab) ----
    lane = jax.lax.broadcasted_iota(jnp.int32, (1, S), 1)
    local = (lane & (HW - 1)) if (HW & (HW - 1)) == 0 else lane % HW
    col = (local & (W - 1)) if (W & (W - 1)) == 0 else local % W
    h_ge1 = local >= W                 # row >= 1
    h_le = local < (H - 1) * W         # row <= H-2
    w_ge1 = col >= 1                   # col >= 1
    w_le = col <= W - 2                # col <= W-2

    # ---- depthwise 3x3 "same", stride 1: 2 column-masked shifted copies,
    #      then 3 row groups (8 XLU rolls total, row masks applied per group) ----
    v_m = jnp.where(w_ge1, pltpu.roll(y, 1, axis=1), 0.0)      # y[l-1], col-masked
    v_p = jnp.where(w_le, pltpu.roll(y, S - 1, axis=1), 0.0)   # y[l+1], col-masked
    cols = (v_m, y, v_p)

    acc = None
    for dh, rmask in ((-1, h_ge1), (0, None), (1, h_le)):
        shift = (-dh * W) % S
        inner = None
        for dw in (-1, 0, 1):
            v = cols[dw + 1]
            tap = v if shift == 0 else pltpu.roll(v, shift, axis=1)
            k = (dh + 1) * 3 + (dw + 1)
            term = tap * w_dw[:, k:k + 1]                      # per-channel weight
            inner = term if inner is None else inner + term
        if rmask is not None:
            inner = jnp.where(rmask, inner, 0.0)
        acc = inner if acc is None else acc + inner
    z = _silu(acc + b_dw)                                      # (Cexp, S)

    # ---- squeeze-excite: pool + gate broadcast on the MXU (block-diag constants),
    #      tiny SE matmuls on the per-image (.., Nb) axis ----
    pooled = jnp.dot(z, pool_ref[...],
                     preferred_element_type=jnp.float32)       # (Cexp, Nb) per-image means
    hid = _silu(jnp.dot(w_se1t, pooled,
                        preferred_element_type=jnp.float32) + b_se1)   # (Csq, Nb)
    g = jnp.dot(w_se2t, hid,
                preferred_element_type=jnp.float32) + b_se2    # (Cexp, Nb)
    gate = jnp.dot(_sigmoid(g), gexp_ref[...],
                   preferred_element_type=jnp.float32)         # (Cexp, S)
    z = z * gate

    # ---- reduce_pw: 1x1 conv (MXU bf16, BN folded) + skip connection ----
    out = jnp.dot(w_red_ref[...], z.astype(jnp.bfloat16),
                  preferred_element_type=jnp.float32)          # (Cout, S)
    out = out + b_red + x_f32
    o_ref[...] = out.astype(o_ref.dtype)


def _pick_nb(n, cap):
    """Images fused per grid step: largest divisor of n that is <= cap and keeps
    grid length >= 2 (so both v7x TensorCores get work)."""
    limit = max(1, min(cap, max(1, n // 2)))
    nb = limit
    while n % nb:
        nb -= 1
    return nb


def mbconv_pallas(x_nchw, p, nb_cap=16):
    N, Cin, H, W = x_nchw.shape
    HW = H * W
    Cexp = p["w_exp"].shape[1]
    Csq = p["w_se1"].shape[1]
    Cout = p["w_red"].shape[1]
    assert Cin == Cout, "skip connection requires input_channels == output_channels"

    Nb = _pick_nb(N, nb_cap)
    S = Nb * HW
    grid = (N // Nb,)

    # Channels-first slab over the whole batch: (C, N*HW); image b owns lanes
    # [b*HW, (b+1)*HW).  One small XLA transpose in the wrapper buys lane-dense
    # matmuls/stores and a single fused elementwise pass per grid step.
    x2 = jnp.transpose(x_nchw, (1, 0, 2, 3)).reshape(Cin, N * HW)

    # Fold BN scales into the conv weights (biases stay); matmul weights in bf16.
    w_exp_f = (p["w_exp"].T * p["s_exp"].reshape(Cexp, 1)).astype(jnp.bfloat16)  # (Cexp, Cin)
    w_red_f = (p["w_red"].T * p["s_red"].reshape(Cout, 1)).astype(jnp.bfloat16)  # (Cout, Cexp)
    w_dw_f = p["w_dw"].reshape(9, Cexp).T * p["s_dw"].reshape(Cexp, 1)           # (Cexp, 9)

    # Pack every small f32 parameter into one (Cexp, PC) slab -> one DMA stream.
    PC = 14 + Csq + Cexp
    pk = jnp.zeros((Cexp, PC), jnp.float32)
    pk = pk.at[:, 0].set(p["b_exp"].reshape(Cexp))
    pk = pk.at[:, 1].set(p["b_dw"].reshape(Cexp))
    pk = pk.at[:, 2].set(p["b_se2"].reshape(Cexp))
    pk = pk.at[:Cout, 3].set(p["b_red"].reshape(Cout))
    pk = pk.at[:Csq, 4].set(p["b_se1"].reshape(Csq))
    pk = pk.at[:, 5:14].set(w_dw_f)
    pk = pk.at[:, 14:14 + Csq].set(p["w_se2"].T)                      # (Cexp, Csq)
    pk = pk.at[:Csq, 14 + Csq:14 + Csq + Cexp].set(p["w_se1"].T)      # (Csq, Cexp)

    # Block-diagonal constants: pool (S, Nb) averages each image's HW lanes on the
    # MXU; gexp (Nb, S) broadcasts the per-image SE gate back across its lanes.
    img_of_lane = jnp.arange(S, dtype=jnp.int32) // HW
    img_ids = jnp.arange(Nb, dtype=jnp.int32)
    pool_mat = (img_of_lane[:, None] == img_ids[None, :]).astype(jnp.float32) / HW
    gexp_mat = (img_ids[:, None] == img_of_lane[None, :]).astype(jnp.float32)

    out2 = pl.pallas_call(
        partial(mbconv_kernel, H, W, Csq),
        out_shape=jax.ShapeDtypeStruct((Cout, N * HW), x_nchw.dtype),
        grid_spec=pltpu.PrefetchScalarGridSpec(
            num_scalar_prefetch=0,
            grid=grid,
            in_specs=[
                pl.BlockSpec((Cin, S), lambda n: (0, n)),        # activations
                pl.BlockSpec((Cexp, Cin), lambda n: (0, 0)),     # w_exp (bf16, scale folded)
                pl.BlockSpec((Cout, Cexp), lambda n: (0, 0)),    # w_red (bf16, scale folded)
                pl.BlockSpec((Cexp, PC), lambda n: (0, 0)),      # packed f32 params
                pl.BlockSpec((S, Nb), lambda n: (0, 0)),         # SE pooling matrix
                pl.BlockSpec((Nb, S), lambda n: (0, 0)),         # SE gate-expansion matrix
            ],
            out_specs=pl.BlockSpec((Cout, S), lambda n: (0, n)),
        ),
        compiler_params=pltpu.CompilerParams(
            dimension_semantics=("parallel",),
            vmem_limit_bytes=32 * 1024 * 1024),   # explicit: safe on v5e/v6e/v7x
    )(x2, w_exp_f, w_red_f, pk, pool_mat, gexp_mat)

    return jnp.transpose(out2.reshape(Cout, N, H, W), (1, 0, 2, 3))


def mbconv_ref(x_nchw, p):
    """Pure-JAX f32 reference of the same forward pass (for verification)."""
    x = jnp.transpose(x_nchw, (0, 2, 3, 1)).astype(jnp.float32)
    N, H, W, Cin = x.shape
    y = jnp.einsum("nhwc,cd->nhwd", x, p["w_exp"]) * p["s_exp"] + p["b_exp"]
    y = y * jax.nn.sigmoid(y)
    yp = jnp.pad(y, ((0, 0), (1, 1), (1, 1), (0, 0)))
    acc = jnp.zeros_like(y)
    for di in range(3):
        for dj in range(3):
            acc = acc + yp[:, di:di + H, dj:dj + W, :] * p["w_dw"][di, dj]
    z = acc * p["s_dw"] + p["b_dw"]
    z = z * jax.nn.sigmoid(z)
    pooled = jnp.mean(z, axis=(1, 2))                      # (N, Cexp)
    se = pooled @ p["w_se1"] + p["b_se1"]
    se = se * jax.nn.sigmoid(se)
    se = se @ p["w_se2"] + p["b_se2"]
    z = z * jax.nn.sigmoid(se)[:, None, None, :]
    out = jnp.einsum("nhwc,cd->nhwd", z, p["w_red"]) * p["s_red"] + p["b_red"]
    out = out + x
    return jnp.transpose(out, (0, 3, 1, 2))


def init_params(key, Cin, Cout, expansion_factor, r):
    Cexp = expansion_factor * Cin
    Csq = max(1, Cexp // r)
    ks = jax.random.split(key, 10)

    def bn_fold(k, C):
        k1, k2, k3, k4 = jax.random.split(k, 4)
        gamma = jax.random.uniform(k1, (C,), jnp.float32, 0.5, 1.5)
        beta = 0.1 * jax.random.normal(k2, (C,), jnp.float32)
        mean = 0.1 * jax.random.normal(k3, (C,), jnp.float32)
        var = jax.random.uniform(k4, (C,), jnp.float32, 0.5, 1.5)
        scale = gamma / jnp.sqrt(var + 1e-5)
        bias = beta - mean * scale
        return scale.reshape(1, C), bias.reshape(1, C)

    p = {}
    p["w_exp"] = jax.random.normal(ks[0], (Cin, Cexp), jnp.float32) / math.sqrt(Cin)
    p["s_exp"], p["b_exp"] = bn_fold(ks[1], Cexp)
    p["w_dw"] = jax.random.normal(ks[2], (3, 3, Cexp), jnp.float32) / 3.0
    p["s_dw"], p["b_dw"] = bn_fold(ks[3], Cexp)
    p["w_se1"] = jax.random.normal(ks[4], (Cexp, Csq), jnp.float32) / math.sqrt(Cexp)
    p["b_se1"] = 0.1 * jax.random.normal(ks[5], (1, Csq), jnp.float32)
    p["w_se2"] = jax.random.normal(ks[6], (Csq, Cexp), jnp.float32) / math.sqrt(Csq)
    p["b_se2"] = 0.1 * jax.random.normal(ks[7], (1, Cexp), jnp.float32)
    p["w_red"] = jax.random.normal(ks[8], (Cexp, Cout), jnp.float32) / math.sqrt(Cexp)
    p["s_red"], p["b_red"] = bn_fold(ks[9], Cout)
    return p


if __name__ == "__main__":
    key = jax.random.PRNGKey(0)
    kx, kp = jax.random.split(key)

    # MBConvN(input_channels=8, output_channels=8, expansion_factor=4,
    #         kernel_size=3, stride=1, r=8, p=0), eval mode.
    # Batch of 8 so the fused multi-image grid step (Nb=4, grid=2) is exercised.
    N, Cin, H, W = 8, 8, 16, 16
    expansion_factor, r = 4, 8
    Cout = Cin

    x = jax.random.normal(kx, (N, Cin, H, W), jnp.float32)
    params = init_params(kp, Cin, Cout, expansion_factor, r)

    out = jax.block_until_ready(mbconv_pallas(x, params))
    assert out.shape == (N, Cout, H, W)

    ref = jax.block_until_ready(mbconv_ref(x, params))
    max_err = float(jnp.max(jnp.abs(out - ref)))
    # bf16 MXU inputs (f32 accumulate) -> slightly looser tolerance than pure f32.
    if not bool(jnp.allclose(out, ref, atol=5e-2, rtol=5e-2)):
        raise AssertionError(f"Pallas output mismatch vs reference, max abs err={max_err}")

    print("KERNEL_OK")
</pallas_src>

<mosaic_0001>
module attributes {stable_mosaic.version = 11 : i64} {
  func.func @mbconv_kernel(%arg0: i32, %arg1: memref<8x1024xf32, #tpu.memory_space<vmem>>, %arg2: memref<32x8xbf16, #tpu.memory_space<vmem>>, %arg3: memref<8x32xbf16, #tpu.memory_space<vmem>>, %arg4: memref<32x50xf32, #tpu.memory_space<vmem>>, %arg5: memref<1024x4xf32, #tpu.memory_space<vmem>>, %arg6: memref<4x1024xf32, #tpu.memory_space<vmem>>, %arg7: memref<8x1024xf32, #tpu.memory_space<vmem>>) attributes {dimension_semantics = [#tpu.dimension_semantics<parallel>], iteration_bounds = array<i64: 2>, scalar_prefetch = 0 : i64, scratch_operands = 0 : i64, tpu.core_type = #tpu.core_type<tc>, window_params = [{transform_indices = @transform_0, window_bounds = array<i64: 8, 1024>}, {pipeline_mode = #tpu.pipeline_mode<synchronous>, transform_indices = @transform_1, window_bounds = array<i64: 32, 8>}, {pipeline_mode = #tpu.pipeline_mode<synchronous>, transform_indices = @transform_2, window_bounds = array<i64: 8, 32>}, {pipeline_mode = #tpu.pipeline_mode<synchronous>, transform_indices = @transform_3, window_bounds = array<i64: 32, 50>}, {pipeline_mode = #tpu.pipeline_mode<synchronous>, transform_indices = @transform_4, window_bounds = array<i64: 1024, 4>}, {pipeline_mode = #tpu.pipeline_mode<synchronous>, transform_indices = @transform_5, window_bounds = array<i64: 4, 1024>}, {transform_indices = @transform_6, window_bounds = array<i64: 8, 1024>}]} {
    %c0 = arith.constant 0 : index
    %c0_0 = arith.constant 0 : index
    %0 = vector.load %arg4[%c0, %c0_0] : memref<32x50xf32, #tpu.memory_space<vmem>>, vector<32x50xf32>
    %1 = vector.extract_strided_slice %0 {offsets = [0, 0], sizes = [32, 1], strides = [1, 1]} : vector<32x50xf32> to vector<32x1xf32>
    %2 = vector.extract_strided_slice %0 {offsets = [0, 1], sizes = [32, 1], strides = [1, 1]} : vector<32x50xf32> to vector<32x1xf32>
    %3 = vector.extract_strided_slice %0 {offsets = [0, 2], sizes = [32, 1], strides = [1, 1]} : vector<32x50xf32> to vector<32x1xf32>
    %4 = vector.extract_strided_slice %0 {offsets = [0, 3], sizes = [8, 1], strides = [1, 1]} : vector<32x50xf32> to vector<8x1xf32>
    %5 = vector.extract_strided_slice %0 {offsets = [0, 4], sizes = [4, 1], strides = [1, 1]} : vector<32x50xf32> to vector<4x1xf32>
    %6 = vector.extract_strided_slice %0 {offsets = [0, 5], sizes = [32, 9], strides = [1, 1]} : vector<32x50xf32> to vector<32x9xf32>
    %7 = vector.extract_strided_slice %0 {offsets = [0, 14], sizes = [32, 4], strides = [1, 1]} : vector<32x50xf32> to vector<32x4xf32>
    %8 = vector.extract_strided_slice %0 {offsets = [0, 18], sizes = [4, 32], strides = [1, 1]} : vector<32x50xf32> to vector<4x32xf32>
    %c0_1 = arith.constant 0 : index
    %c0_2 = arith.constant 0 : index
    %9 = vector.load %arg1[%c0_1, %c0_2] : memref<8x1024xf32, #tpu.memory_space<vmem>>, vector<8x1024xf32>
    %c0_3 = arith.constant 0 : index
    %c0_4 = arith.constant 0 : index
    %10 = vector.load %arg2[%c0_3, %c0_4] : memref<32x8xbf16, #tpu.memory_space<vmem>>, vector<32x8xbf16>
    %11 = arith.truncf %9 : vector<8x1024xf32> to vector<8x1024xbf16>
    %cst = arith.constant dense<0.000000e+00> : vector<32x1024xf32>
    %12 = tpu.matmul %10, %11, %cst {dimension_numbers = #tpu.dot_dimension_numbers<[1], [0], [0], [1], [0, 0, 1, 1], [], []>} : vector<32x8xbf16>, vector<8x1024xbf16>, vector<32x1024xf32> -> vector<32x1024xf32>
    %13 = vector.broadcast %1 : vector<32x1xf32> to vector<32x1024xf32>
    %14 = arith.addf %12, %13 : vector<32x1024xf32>
    %cst_5 = arith.constant 5.000000e-01 : f32
    %15 = vector.broadcast %cst_5 : f32 to vector<32x1024xf32>
    %16 = arith.mulf %15, %14 : vector<32x1024xf32>
    %17 = math.tanh %16 : vector<32x1024xf32>
    %cst_6 = arith.constant 1.000000e+00 : f32
    %18 = vector.broadcast %cst_6 : f32 to vector<32x1024xf32>
    %19 = arith.addf %18, %17 : vector<32x1024xf32>
    %20 = arith.mulf %16, %19 : vector<32x1024xf32>
    %21 = tpu.iota {dimensions = array<i32: 1>} : vector<1x1024xi32>
    %c255_i32 = arith.constant 255 : i32
    %22 = vector.broadcast %c255_i32 : i32 to vector<1x1024xi32>
    %23 = arith.andi %21, %22 : vector<1x1024xi32>
    %c15_i32 = arith.constant 15 : i32
    %24 = vector.broadcast %c15_i32 : i32 to vector<1x1024xi32>
    %25 = arith.andi %23, %24 : vector<1x1024xi32>
    %c16_i32 = arith.constant 16 : i32
    %26 = vector.broadcast %c16_i32 : i32 to vector<1x1024xi32>
    %27 = arith.cmpi sge, %23, %26 : vector<1x1024xi32>
    %c240_i32 = arith.constant 240 : i32
    %28 = vector.broadcast %c240_i32 : i32 to vector<1x1024xi32>
    %29 = arith.cmpi slt, %23, %28 : vector<1x1024xi32>
    %c1_i32 = arith.constant 1 : i32
    %30 = vector.broadcast %c1_i32 : i32 to vector<1x1024xi32>
    %31 = arith.cmpi sge, %25, %30 : vector<1x1024xi32>
    %c14_i32 = arith.constant 14 : i32
    %32 = vector.broadcast %c14_i32 : i32 to vector<1x1024xi32>
    %33 = arith.cmpi sle, %25, %32 : vector<1x1024xi32>
    %c1_i32_7 = arith.constant 1 : i32
    %34 = tpu.dynamic_rotate %20 by %c1_i32_7 dim 1 : vector<32x1024xf32>, i32 -> vector<32x1024xf32>
    %cst_8 = arith.constant 0.000000e+00 : f32
    %35 = vector.shape_cast %31 : vector<1x1024xi1> to vector<1x1024xi1>
    %36 = vector.broadcast %35 : vector<1x1024xi1> to vector<32x1024xi1>
    %37 = vector.broadcast %cst_8 : f32 to vector<32x1024xf32>
    %38 = arith.select %36, %34, %37 : vector<32x1024xi1>, vector<32x1024xf32>
    %c1023_i32 = arith.constant 1023 : i32
    %39 = tpu.dynamic_rotate %20 by %c1023_i32 dim 1 : vector<32x1024xf32>, i32 -> vector<32x1024xf32>
    %cst_9 = arith.constant 0.000000e+00 : f32
    %40 = vector.shape_cast %33 : vector<1x1024xi1> to vector<1x1024xi1>
    %41 = vector.broadcast %40 : vector<1x1024xi1> to vector<32x1024xi1>
    %42 = vector.broadcast %cst_9 : f32 to vector<32x1024xf32>
    %43 = arith.select %41, %39, %42 : vector<32x1024xi1>, vector<32x1024xf32>
    %c16_i32_10 = arith.constant 16 : i32
    %44 = tpu.dynamic_rotate %38 by %c16_i32_10 dim 1 : vector<32x1024xf32>, i32 -> vector<32x1024xf32>
    %45 = vector.extract_strided_slice %6 {offsets = [0, 0], sizes = [32, 1], strides = [1, 1]} : vector<32x9xf32> to vector<32x1xf32>
    %46 = vector.broadcast %45 : vector<32x1xf32> to vector<32x1024xf32>
    %47 = arith.mulf %44, %46 : vector<32x1024xf32>
    %c16_i32_11 = arith.constant 16 : i32
    %48 = tpu.dynamic_rotate %20 by %c16_i32_11 dim 1 : vector<32x1024xf32>, i32 -> vector<32x1024xf32>
    %49 = vector.extract_strided_slice %6 {offsets = [0, 1], sizes = [32, 1], strides = [1, 1]} : vector<32x9xf32> to vector<32x1xf32>
    %50 = vector.broadcast %49 : vector<32x1xf32> to vector<32x1024xf32>
    %51 = arith.mulf %48, %50 : vector<32x1024xf32>
    %52 = arith.addf %47, %51 : vector<32x1024xf32>
    %c16_i32_12 = arith.constant 16 : i32
    %53 = tpu.dynamic_rotate %43 by %c16_i32_12 dim 1 : vector<32x1024xf32>, i32 -> vector<32x1024xf32>
    %54 = vector.extract_strided_slice %6 {offsets = [0, 2], sizes = [32, 1], strides = [1, 1]} : vector<32x9xf32> to vector<32x1xf32>
    %55 = vector.broadcast %54 : vector<32x1xf32> to vector<32x1024xf32>
    %56 = arith.mulf %53, %55 : vector<32x1024xf32>
    %57 = arith.addf %52, %56 : vector<32x1024xf32>
    %cst_13 = arith.constant 0.000000e+00 : f32
    %58 = vector.shape_cast %27 : vector<1x1024xi1> to vector<1x1024xi1>
    %59 = vector.broadcast %58 : vector<1x1024xi1> to vector<32x1024xi1>
    %60 = vector.broadcast %cst_13 : f32 to vector<32x1024xf32>
    %61 = arith.select %59, %57, %60 : vector<32x1024xi1>, vector<32x1024xf32>
    %62 = vector.extract_strided_slice %6 {offsets = [0, 3], sizes = [32, 1], strides = [1, 1]} : vector<32x9xf32> to vector<32x1xf32>
    %63 = vector.broadcast %62 : vector<32x1xf32> to vector<32x1024xf32>
    %64 = arith.mulf %38, %63 : vector<32x1024xf32>
    %65 = vector.extract_strided_slice %6 {offsets = [0, 4], sizes = [32, 1], strides = [1, 1]} : vector<32x9xf32> to vector<32x1xf32>
    %66 = vector.broadcast %65 : vector<32x1xf32> to vector<32x1024xf32>
    %67 = arith.mulf %20, %66 : vector<32x1024xf32>
    %68 = arith.addf %64, %67 : vector<32x1024xf32>
    %69 = vector.extract_strided_slice %6 {offsets = [0, 5], sizes = [32, 1], strides = [1, 1]} : vector<32x9xf32> to vector<32x1xf32>
    %70 = vector.broadcast %69 : vector<32x1xf32> to vector<32x1024xf32>
    %71 = arith.mulf %43, %70 : vector<32x1024xf32>
    %72 = arith.addf %68, %71 : vector<32x1024xf32>
    %73 = arith.addf %61, %72 : vector<32x1024xf32>
    %c1008_i32 = arith.constant 1008 : i32
    %74 = tpu.dynamic_rotate %38 by %c1008_i32 dim 1 : vector<32x1024xf32>, i32 -> vector<32x1024xf32>
    %75 = vector.extract_strided_slice %6 {offsets = [0, 6], sizes = [32, 1], strides = [1, 1]} : vector<32x9xf32> to vector<32x1xf32>
    %76 = vector.broadcast %75 : vector<32x1xf32> to vector<32x1024xf32>
    %77 = arith.mulf %74, %76 : vector<32x1024xf32>
    %c1008_i32_14 = arith.constant 1008 : i32
    %78 = tpu.dynamic_rotate %20 by %c1008_i32_14 dim 1 : vector<32x1024xf32>, i32 -> vector<32x1024xf32>
    %79 = vector.extract_strided_slice %6 {offsets = [0, 7], sizes = [32, 1], strides = [1, 1]} : vector<32x9xf32> to vector<32x1xf32>
    %80 = vector.broadcast %79 : vector<32x1xf32> to vector<32x1024xf32>
    %81 = arith.mulf %78, %80 : vector<32x1024xf32>
    %82 = arith.addf %77, %81 : vector<32x1024xf32>
    %c1008_i32_15 = arith.constant 1008 : i32
    %83 = tpu.dynamic_rotate %43 by %c1008_i32_15 dim 1 : vector<32x1024xf32>, i32 -> vector<32x1024xf32>
    %84 = vector.extract_strided_slice %6 {offsets = [0, 8], sizes = [32, 1], strides = [1, 1]} : vector<32x9xf32> to vector<32x1xf32>
    %85 = vector.broadcast %84 : vector<32x1xf32> to vector<32x1024xf32>
    %86 = arith.mulf %83, %85 : vector<32x1024xf32>
    %87 = arith.addf %82, %86 : vector<32x1024xf32>
    %cst_16 = arith.constant 0.000000e+00 : f32
    %88 = vector.shape_cast %29 : vector<1x1024xi1> to vector<1x1024xi1>
    %89 = vector.broadcast %88 : vector<1x1024xi1> to vector<32x1024xi1>
    %90 = vector.broadcast %cst_16 : f32 to vector<32x1024xf32>
    %91 = arith.select %89, %87, %90 : vector<32x1024xi1>, vector<32x1024xf32>
    %92 = arith.addf %73, %91 : vector<32x1024xf32>
    %93 = vector.broadcast %2 : vector<32x1xf32> to vector<32x1024xf32>
    %94 = arith.addf %92, %93 : vector<32x1024xf32>
    %cst_17 = arith.constant 5.000000e-01 : f32
    %95 = vector.broadcast %cst_17 : f32 to vector<32x1024xf32>
    %96 = arith.mulf %95, %94 : vector<32x1024xf32>
    %97 = math.tanh %96 : vector<32x1024xf32>
    %cst_18 = arith.constant 1.000000e+00 : f32
    %98 = vector.broadcast %cst_18 : f32 to vector<32x1024xf32>
    %99 = arith.addf %98, %97 : vector<32x1024xf32>
    %100 = arith.mulf %96, %99 : vector<32x1024xf32>
    %c0_19 = arith.constant 0 : index
    %c0_20 = arith.constant 0 : index
    %101 = vector.load %arg5[%c0_19, %c0_20] : memref<1024x4xf32, #tpu.memory_space<vmem>>, vector<1024x4xf32>
    %cst_21 = arith.constant dense<0.000000e+00> : vector<32x4xf32>
    %102 = tpu.matmul %100, %101, %cst_21 {dimension_numbers = #tpu.dot_dimension_numbers<[1], [0], [0], [1], [0, 0, 1, 1], [], []>} : vector<32x1024xf32>, vector<1024x4xf32>, vector<32x4xf32> -> vector<32x4xf32>
    %cst_22 = arith.constant dense<0.000000e+00> : vector<4x4xf32>
    %103 = tpu.matmul %8, %102, %cst_22 {dimension_numbers = #tpu.dot_dimension_numbers<[1], [0], [0], [1], [0, 0, 1, 1], [], []>} : vector<4x32xf32>, vector<32x4xf32>, vector<4x4xf32> -> vector<4x4xf32>
    %104 = vector.broadcast %5 : vector<4x1xf32> to vector<4x4xf32>
    %105 = arith.addf %103, %104 : vector<4x4xf32>
    %cst_23 = arith.constant 5.000000e-01 : f32
    %106 = vector.broadcast %cst_23 : f32 to vector<4x4xf32>
    %107 = arith.mulf %106, %105 : vector<4x4xf32>
    %108 = math.tanh %107 : vector<4x4xf32>
    %cst_24 = arith.constant 1.000000e+00 : f32
    %109 = vector.broadcast %cst_24 : f32 to vector<4x4xf32>
    %110 = arith.addf %109, %108 : vector<4x4xf32>
    %111 = arith.mulf %107, %110 : vector<4x4xf32>
    %cst_25 = arith.constant dense<0.000000e+00> : vector<32x4xf32>
    %112 = tpu.matmul %7, %111, %cst_25 {dimension_numbers = #tpu.dot_dimension_numbers<[1], [0], [0], [1], [0, 0, 1, 1], [], []>} : vector<32x4xf32>, vector<4x4xf32>, vector<32x4xf32> -> vector<32x4xf32>
    %113 = vector.broadcast %3 : vector<32x1xf32> to vector<32x4xf32>
    %114 = arith.addf %112, %113 : vector<32x4xf32>
    %cst_26 = arith.constant 5.000000e-01 : f32
    %115 = vector.broadcast %cst_26 : f32 to vector<32x4xf32>
    %116 = arith.mulf %115, %114 : vector<32x4xf32>
    %117 = math.tanh %116 : vector<32x4xf32>
    %cst_27 = arith.constant 5.000000e-01 : f32
    %118 = vector.broadcast %cst_27 : f32 to vector<32x4xf32>
    %119 = arith.mulf %118, %117 : vector<32x4xf32>
    %cst_28 = arith.constant 5.000000e-01 : f32
    %120 = vector.broadcast %cst_28 : f32 to vector<32x4xf32>
    %121 = arith.addf %119, %120 : vector<32x4xf32>
    %c0_29 = arith.constant 0 : index
    %c0_30 = arith.constant 0 : index
    %122 = vector.load %arg6[%c0_29, %c0_30] : memref<4x1024xf32, #tpu.memory_space<vmem>>, vector<4x1024xf32>
    %cst_31 = arith.constant dense<0.000000e+00> : vector<32x1024xf32>
    %123 = tpu.matmul %121, %122, %cst_31 {dimension_numbers = #tpu.dot_dimension_numbers<[1], [0], [0], [1], [0, 0, 1, 1], [], []>} : vector<32x4xf32>, vector<4x1024xf32>, vector<32x1024xf32> -> vector<32x1024xf32>
    %124 = arith.mulf %100, %123 : vector<32x1024xf32>
    %c0_32 = arith.constant 0 : index
    %c0_33 = arith.constant 0 : index
    %125 = vector.load %arg3[%c0_32, %c0_33] : memref<8x32xbf16, #tpu.memory_space<vmem>>, vector<8x32xbf16>
    %126 = arith.truncf %124 : vector<32x1024xf32> to vector<32x1024xbf16>
    %cst_34 = arith.constant dense<0.000000e+00> : vector<8x1024xf32>
    %127 = tpu.matmul %125, %126, %cst_34 {dimension_numbers = #tpu.dot_dimension_numbers<[1], [0], [0], [1], [0, 0, 1, 1], [], []>} : vector<8x32xbf16>, vector<32x1024xbf16>, vector<8x1024xf32> -> vector<8x1024xf32>
    %128 = vector.broadcast %4 : vector<8x1xf32> to vector<8x1024xf32>
    %129 = arith.addf %127, %128 : vector<8x1024xf32>
    %130 = arith.addf %129, %9 : vector<8x1024xf32>
    %c0_35 = arith.constant 0 : index
    %c0_36 = arith.constant 0 : index
    %131 = vector.load %arg7[%c0_35, %c0_36] : memref<8x1024xf32, #tpu.memory_space<vmem>>, vector<8x1024xf32>
    tpu.vector_store %arg7[%c0_35, %c0_36], %130 {strides = array<i32>} : memref<8x1024xf32, #tpu.memory_space<vmem>>, vector<8x1024xf32>,
    return
  }
  func.func @transform_0(%arg0: i32) -> (i32, i32) {
    %c0_i32 = arith.constant 0 : i32
    %c0_i32_0 = arith.constant 0 : i32
    return %c0_i32, %arg0 : i32, i32
  }
  func.func @transform_1(%arg0: i32) -> (i32, i32) {
    %c0_i32 = arith.constant 0 : i32
    %c0_i32_0 = arith.constant 0 : i32
    %c0_i32_1 = arith.constant 0 : i32
    return %c0_i32, %c0_i32_0 : i32, i32
  }
  func.func @transform_2(%arg0: i32) -> (i32, i32) {
    %c0_i32 = arith.constant 0 : i32
    %c0_i32_0 = arith.constant 0 : i32
    %c0_i32_1 = arith.constant 0 : i32
    return %c0_i32, %c0_i32_0 : i32, i32
  }
  func.func @transform_3(%arg0: i32) -> (i32, i32) {
    %c0_i32 = arith.constant 0 : i32
    %c0_i32_0 = arith.constant 0 : i32
    %c0_i32_1 = arith.constant 0 : i32
    return %c0_i32, %c0_i32_0 : i32, i32
  }
  func.func @transform_4(%arg0: i32) -> (i32, i32) {
    %c0_i32 = arith.constant 0 : i32
    %c0_i32_0 = arith.constant 0 : i32
    %c0_i32_1 = arith.constant 0 : i32
    return %c0_i32, %c0_i32_0 : i32, i32
  }
  func.func @transform_5(%arg0: i32) -> (i32, i32) {
    %c0_i32 = arith.constant 0 : i32
    %c0_i32_0 = arith.constant 0 : i32
    %c0_i32_1 = arith.constant 0 : i32
    return %c0_i32, %c0_i32_0 : i32, i32
  }
  func.func @transform_6(%arg0: i32) -> (i32, i32) {
    %c0_i32 = arith.constant 0 : i32
    %c0_i32_0 = arith.constant 0 : i32
    return %c0_i32, %arg0 : i32, i32
  }
}

</mosaic_0001>

<bundles_post_ra>
// kernel: tpu_custom_call.1
= control target key start
LH: loop header
LB: loop body
LE: loop exit
PB: predicated region body
PF: predicated region fallthrough
CT: control target
= control target key end

     0   :  { %11 = vsyncpa [#allocation3], 0  ;;  %s8854_s0 = inlined_call_operand.vmem [shape: f32[8,2048], index: 0, kind: input, shape index: {}]   ;;  %s8855_s1 = inlined_call_operand.vmem [shape: bf16[32,8], index: 1, kind: input, shape index: {}]   ;;  %s8856_s2 = inlined_call_operand.vmem [shape: bf16[8,32], index: 2, kind: input, shape index: {}]   ;;  %s8857_s3 = inlined_call_operand.vmem [shape: f32[32,50], index: 3, kind: input, shape index: {}]   ;;  %s8858_s4 = inlined_call_operand.vmem [shape: f32[1024,4], index: 4, kind: input, shape index: {}]   ;;  %s8859_s5 = inlined_call_operand.vmem [shape: f32[4,1024], index: 5, kind: input, shape index: {}]   ;;  %s8860_s6 = inlined_call_operand.hbm [shape: f32[8,2048], index: 6, kind: output, shape index: {}]  }
   0x1   :  { %13 = vsyncpa [#allocation3 + $0x1], 0  ;;  %s4743_s21 = smov 0   ;;  %s4745_s22 = smov 0  }
   0x2   :  { %s4747_s23 = smov 0   ;;  %s4749_s24 = smov 0  }
   0x3 LB: > { %s4764_s25 = sadd.s32 4294967295, %s4682_s24   ;;  %s3959_s26 = sadd.s32 4294967294, %s4682_s24   ;;  %s4682_s24 = sphi %s4749_s24, %s9862_s24   ;;  %s4678_s23 = sphi %s4747_s23, %s9861_s23   ;;  %s4674_s22 = sphi %s4745_s22, %s9860_s22   ;;  %s4670_s21 = sphi %s4743_s21, %s9859_s21  }
   0x4   : > { %s4768_s27 = sadd.s32 1, %s4682_s24   ;;  %s157_s28 = sadd.s32 1, %s4678_s23 }
   0x5   : > { %s154_s29 = ssub.s32 %s4682_s24, %s4768_s27  ;;  %p167_p0 = scmp.ne.s32.totalorder %s4678_s23, %s4674_s22 }
   0x6   : > { %p155_p1 = scmp.eq.s32.totalorder %s154_s29, 0  ;;  %p168_p2 = scmp.eq.s32.totalorder %s4764_s25, 1 }
   0x7   : > { %p173_p3 = scmp.ne.s32.totalorder %s4674_s22, %s4670_s21  ;;  %p174_p4 = scmp.eq.s32.totalorder %s3959_s26, 1 }
   0x8   : > { %s4779_s30 = scalar_select %p155_p1, %s4678_s23, %s157_s28  }
   0x9   : > { %p4781_p5 = por %p168_p2, %p167_p0  ;;  %p4785_p6 = por %p174_p4, %p173_p3 }
   0xa   : > { %p3962_p7 = scmp.ge.s32.totalorder %s4682_s24, 1  ;;  %p216_p8 = scmp.lt.s32.totalorder %s4682_s24, 3 }
   0xc   : > { %p217_p9 = pnand %p3962_p7, %p216_p8 }
   0xe   : > { %220 = sbr.rel (%p217_p9) target bundleno = 2126 (0x84e), region = 44 }
  0x15   : > { %s3964_s9 = sshll.u32 %s4764_s25, 3  ;;  %v8861_v0 = vmov 0   ;;  %v4798_v1 = vld [vmem:[%s8857_s3 + $0x10] sm:$0xff]  ;;  %v4805_v2 = vld [vmem:[%s8857_s3] sm:$0xff]  ;;  %v4810_v3 = vld [vmem:[%s8857_s3 + $0x18] sm:$0xff]  ;;  %vm315_vm0 = vcmask 1043456  }
  0x16   : > { %p247_p10 = scmp.lt.s32.totalorder %s3964_s9, 15  ;;  %372 = vmatprep.mubr.bf16.mxu0 %v8861_v0  ;;  %425 = vmatprep.mubr.bf16.mxu1 %v8861_v0  ;;  %v4816_v4 = vld [vmem:[%s8857_s3 + $0x8] sm:$0xff]  ;;  %v4461_v20 = vld [vmem:[%s8855_s1] sm:$0xff]   ;;  %vm308_vm1 = vcmask 64512   ;;  %v4685_v24 = vmov 6   ;;  %v4686_v27 = vmov 11  }
  0x17   : > { %4422 = vset.pattern.permute.xlu1 %v8861_v0  ;;  %4421 = vset.pattern.permute.xlu0 %v8861_v0  ;;  %v4687_v28 = vmov 8   ;;  %v4462_v29 = vld [vmem:[%s8855_s1 + $0x8] sm:$0xff]   ;;  %v8866_v30 = vmov 10   ;;  %v4689_v31 = vmov 12   ;;  %v8863_v32 = vmov 13   ;;  %s4695_s11 = smov 16  }
  0x18   : > { %s9864_s9 = smov (!%p247_p10, %s3964_s9), 15  ;;  %290 = vperm.xlu1 %4422, %v4798_v1   ;;  %280 = vperm.xlu0 %4421, %v4805_v2   ;;  %v4691_v33 = vmov 5   ;;  %v8864_v34 = vmov 1   ;;  %v4693_v35 = vmov 9   ;;  %v4694_v36 = vmov 7   ;;  %s4696_s12 = smov 1  }
  0x19   : > { %s3965_s16 = sshll.u32 %s9864_s9, 3  ;;  %s4697_s13 = smov 112  }
  0x1a   : > { %s4821_s26 = scalar_lea.vmem %s8854_s0, %s3965_s16  ;;  %s4698_s14 = smov 127  }
  0x1b   : > { %v259_v5 = vld [vmem:[%s4821_s26 + $0x8] sm:$0xff]  ;;  %v261_v6 = vld [vmem:[%s4821_s26 + $0x18] sm:$0xff]  ;;  %v258_v7 = vld [vmem:[%s4821_s26] sm:$0xff]  ;;  %s243_s17 = sand.u32 1, %s4674_s22   ;;  %s4019_s20 = sshll.u32 %s4764_s25, 10 }
  0x1c   : > { %295 = vperm.xlu1 %4422, %v4810_v3   ;;  %v271_v8 = vpack.c.bf16 %v259_v5, %v259_v5  ;;  %v273_v9 = vpack.c.bf16 %v261_v6, %v261_v6  ;;  %v270_v10 = vpack.c.bf16 %v258_v7, %v258_v7  ;;  %v260_v11 = vld [vmem:[%s4821_s26 + $0x10] sm:$0xff]  ;;  %v263_v12 = vld [vmem:[%s4821_s26 + $0x28] sm:$0xff]  ;;  %v265_v13 = vld [vmem:[%s4821_s26 + $0x38] sm:$0xff]  ;;  %285 = vperm.xlu0 %4421, %v4816_v4   ;;  %s3963_s18 = sshll.u32 %s243_s17, 6  ;;  %s8806_s9 = scalar_lea.hbm %s8860_s6, %s4019_s20 }
  0x1d   : > { %v272_v14 = vpack.c.bf16 %v260_v11, %v260_v11  ;;  %v275_v15 = vpack.c.bf16 %v263_v12, %v263_v12  ;;  %v277_v16 = vpack.c.bf16 %v265_v13, %v265_v13  ;;  %v262_v17 = vld [vmem:[%s4821_s26 + $0x20] sm:$0xff]  ;;  %v264_v18 = vld [vmem:[%s4821_s26 + $0x30] sm:$0xff]  ;;  %s8791_s19 = scalar_lea.vmem [#allocation2], %s3963_s18  ;;  %s3886_s10 = scalar_lea.sflag [#allocation3], %s243_s17 }
  0x1e   : > { %3968 = vmatprep.subr.msk.bf16.mxu0 %vm315_vm0, %v271_v8  ;;  %3971 = vmatprep.subr.msk.bf16.mxu1 %vm315_vm0, %v273_v9  ;;  %v317_v19 = vsel %vm315_vm0, %v270_v10, 0  ;;  %v274_v21 = vpack.c.bf16 %v262_v17, %v262_v17  ;;  %v276_v22 = vpack.c.bf16 %v264_v18, %v264_v18  ;;  %s3900_s28 = sshll.u32 %s8791_s19, 4  ;;  %s8808_s28 = int_to_ptr.vmem [resolvable:$true] %s3900_s28 }
  0x1f   : > { %341 = vmatpush1.bf16.msra.mxu0 %v317_v19  ;;  %v323_v23 = vsel %vm315_vm0, %v272_v14, 0 }
  0x20   : > { %4423 = vset.pattern.permute.xlu1 %v4685_v24  ;;  %394 = vmatpush1.bf16.msra.mxu1 %v323_v23  ;;  %v329_v25 = vsel %vm315_vm0, %v274_v21, 0  ;;  %v335_v26 = vsel %vm315_vm0, %v276_v22, 0 }
  0x21   : > { %3974 = vmatprep.subr.msk.bf16.mxu0 %vm315_vm0, %v275_v15  ;;  %3977 = vmatprep.subr.msk.bf16.mxu1 %vm315_vm0, %v277_v16 }
  0x22   : > { %1269 = vperm.xlu1 %4423, %v4805_v2   ;;  %3969 = vmatmul.mubr.msk.bf16.vlgmr.msra.gmra.mrb[0].mxu0 %vm308_vm1, %v4461_v20 }
  0x23   : > { %4433 = vset.pattern.permute.xlu0 %v4686_v27  ;;  %3972 = vmatmul.mubr.msk.bf16.vlgmr.msra.gmra.mrb[0].mxu1 %vm308_vm1, %v4461_v20 }
  0x24   : > { %382 = vmatprep.mubr.bf16.mxu0 %v8861_v0  ;;  %435 = vmatprep.mubr.bf16.mxu1 %v8861_v0 }
  0x25   : > { %447 = vmatpush1.bf16.msra.mxu0 %v329_v25  ;;  %500 = vmatpush1.bf16.msra.mxu1 %v335_v26 }
  0x26   : > { %4424 = vset.pattern.permute.xlu1 %v4687_v28  ;;  %1914 = vperm.xlu0 %4433, %v4816_v4  }
  0x27   : > { %1573 = vperm.xlu1 %4424, %v4805_v2  }
  0x2a   : > { %3970 = vmatmul.mubr.msk.bf16.gmra.mrb[4].mxu0 %vm308_vm1, %v4462_v29  ;;  %1918 = vperm.xlu0 %4433, %v4798_v1  }
  0x2b   : > { %3973 = vmatmul.mubr.msk.bf16.gmra.mrb[4].mxu1 %vm308_vm1, %v4462_v29  ;;  %478 = vmatprep.mubr.bf16.mxu0 %v8861_v0 }
  0x2c   : > { %531 = vmatprep.mubr.bf16.mxu1 %v8861_v0  ;;  %4425 = vset.pattern.permute.xlu1 %v4686_v27 }
  0x2d   : > { %1910 = vperm.xlu1 %4425, %v4805_v2  }
  0x2e   : > { %4440 = vset.pattern.permute.xlu0 %v8866_v30 }
  0x2f   : > { %1705 = vperm.xlu0 %4440, %v4816_v4  }
  0x31   : > { %4426 = vset.pattern.permute.xlu1 %v4689_v31 }
  0x32   : > { %3975 = vmatmul.mubr.msk.bf16.vlgmr.msra.gmra.mrb[8].mxu0 %vm308_vm1, %v4461_v20  ;;  %2054 = vperm.xlu1 %4426, %v4805_v2  }
  0x33   : > { %3978 = vmatmul.mubr.msk.bf16.vlgmr.msra.gmra.mrb[8].mxu1 %vm308_vm1, %v4461_v20  ;;  %488 = vmatprep.mubr.bf16.mxu0 %v8861_v0 }
  0x34   : > { %541 = vmatprep.mubr.bf16.mxu1 %v8861_v0  ;;  %1709 = vperm.xlu0 %4440, %v4798_v1  }
  0x36   : > { %4427 = vset.pattern.permute.xlu1 %v8866_v30 }
  0x37   : > { %1701 = vperm.xlu1 %4427, %v4805_v2  }
  0x38   : > { %4443 = vset.pattern.permute.xlu0 %v8863_v32 }
  0x39   : > { %2238 = vperm.xlu0 %4443, %v4798_v1  }
  0x3a   : > { %3976 = vmatmul.mubr.msk.bf16.gmra.mrb[12].mxu0 %vm308_vm1, %v4462_v29 }
  0x3b   : > { %3979 = vmatmul.mubr.msk.bf16.gmra.mrb[12].mxu1 %vm308_vm1, %v4462_v29  ;;  %4428 = vset.pattern.permute.xlu1 %v8863_v32 }
  0x3c   : > { %2230 = vperm.xlu1 %4428, %v4805_v2  }
  0x3d   : > { %4444 = vset.pattern.permute.xlu0 %v4691_v33 }
  0x3e   : > { %1125 = vperm.xlu0 %4444, %v4805_v2  }
  0x40   : > { %4429 = vset.pattern.permute.xlu1 %v8864_v34 }
  0x41   : > { %2390 = vperm.xlu1 %4429, %v4805_v2  }
  0x42   : > { %1137 = vperm.xlu0 %4444, %v4810_v3  }
  0x45   : > { %4430 = vset.pattern.permute.xlu1 %v4691_v33 }
  0x46   : > { %1129 = vperm.xlu1 %4430, %v4816_v4   ;;  %4445 = vset.pattern.permute.xlu0 %v4685_v24 }
  0x47   : > { %1273 = vperm.xlu0 %4445, %v4816_v4  }
  0x4a   : > { %4431 = vset.pattern.permute.xlu1 %v4687_v28 }
  0x4b   : > { %1577 = vperm.xlu1 %4431, %v4816_v4   ;;  %1277 = vperm.xlu0 %4445, %v4798_v1  }
  0x4f   : > { %4432 = vset.pattern.permute.xlu1 %v4693_v35  ;;  %1281 = vperm.xlu0 %4445, %v4810_v3  }
  0x50   : > { %1625 = vperm.xlu1 %4432, %v4816_v4  }
  0x53   : > { %4446 = vset.pattern.permute.xlu0 %v4693_v35 }
  0x54   : > { %4434 = vset.pattern.permute.xlu1 %v4689_v31  ;;  %1621 = vperm.xlu0 %4446, %v4805_v2  }
  0x55   : > { %2058 = vperm.xlu1 %4434, %v4816_v4  }
  0x58   : > { %1633 = vperm.xlu0 %4446, %v4810_v3  }
  0x59   : > { %4435 = vset.pattern.permute.xlu1 %v4694_v36 }
  0x5a   : > { %1449 = vperm.xlu1 %4435, %v4816_v4  }
  0x5c   : > { %4448 = vset.pattern.permute.xlu0 %v4694_v36 }
  0x5d   : > { %1445 = vperm.xlu0 %4448, %v4805_v2  }
  0x5e   : > { %4436 = vset.pattern.permute.xlu1 %v8863_v32 }
  0x5f   : > { %2234 = vperm.xlu1 %4436, %v4816_v4  }
  0x63   : > { %4437 = vset.pattern.permute.xlu1 %v4691_v33 }
  0x64   : > { %1133 = vperm.xlu1 %4437, %v4798_v1  }
  0x68   : > { %4438 = vset.pattern.permute.xlu1 %v4687_v28 }
  0x69   : > { %1581 = vperm.xlu1 %4438, %v4798_v1  }
  0x6d   : > { %4439 = vset.pattern.permute.xlu1 %v4693_v35 }
  0x6e   : > { %1629 = vperm.xlu1 %4439, %v4798_v1  }
  0x72   : > { %4441 = vset.pattern.permute.xlu1 %v4689_v31 }
  0x73   : > { %2062 = vperm.xlu1 %4441, %v4798_v1  }
  0x77   : > { %4442 = vset.pattern.permute.xlu1 %v4694_v36 }
  0x78   : > { %1453 = vperm.xlu1 %4442, %v4798_v1  }
  0x7c   : > { %4447 = vset.pattern.permute.xlu1 %v4687_v28 }
  0x7d   : > { %1585 = vperm.xlu1 %4447, %v4810_v3  }
  0x81   : > { %4449 = vset.pattern.permute.xlu1 %v4686_v27 }
  0x82   : > { %1922 = vperm.xlu1 %4449, %v4810_v3  }
  0x86   : > { %4450 = vset.pattern.permute.xlu1 %v4689_v31 }
  0x97   : > { %v4907_v37 = vpop.permute.xlu1 %290  ;;  %v4909_v38 = vpop.permute.xlu0 %280 }
  0x9b   : > { %v4919_v54 = vpop.permute.xlu1 %295  ;;  %v4965_v20 = vpop.permute.xlu0 %285 }
  0xa1   : > { %v4937_v3 = vpop.permute.xlu1 %1269 }
  0xa2   : > { %9218 = vst [vmem:[#allocation5_spill] sm:$0xff] %v4937_v3  ;;  %v9305_v3 = vmov 13  }
  0xa6   : > { %v4961_v16 = vpop.permute.xlu1 %1573 }
  0xa7   : > { %9219 = vst [vmem:[#allocation6_spill] sm:$0xff] %v4961_v16 }
  0xac   : > { %v4989_v35 = vpop.permute.xlu1 %1910 }
  0xad   : > { %9222 = vst [vmem:[#allocation9_spill] sm:$0xff] %v4989_v35 }
  0xf5   : > { %v374_v39 = vpop.f32.mrb[0].mxu0 }
  0xf6   : > { %v375_v40 = vadd.f32 %v374_v39, %v4909_v38  ;;  %v427_v41 = vpop.f32.mrb[0].mxu1  ;;  %v376_v42 = vpop.f32.mrb[1].mxu0 }
  0xf7   : > { %v428_v43 = vadd.f32 %v427_v41, %v4909_v38  ;;  %v377_v44 = vadd.f32 %v376_v42, %v4909_v38  ;;  %v429_v45 = vpop.f32.mrb[1].mxu1  ;;  %v378_v46 = vpop.f32.mrb[2].mxu0 }
  0xf8   : > { %v552_v47 = vmul.f32 0.5, %v375_v40  ;;  %v431_v48 = vpop.f32.mrb[2].mxu1  ;;  %v4914_v49 = vpop.f32.mrb[3].mxu0  ;;  %v430_v53 = vadd.f32 %v429_v45, %v4909_v38  ;;  %v379_v21 = vadd.f32 %v378_v46, %v4965_v20 }
  0xf9   : > { %v554_v50 = vmul.f32 0.5, %v428_v43  ;;  %v4916_v51 = vpop.f32.mrb[3].mxu1  ;;  %v553_v52 = vmul.f32 0.5, %v377_v44  ;;  %v432_v23 = vadd.f32 %v431_v48, %v4965_v20  ;;  %v381_v42 = vadd.f32 %v4914_v49, %v4965_v20  ;;  %v5005_v43 = vpop.permute.xlu1 %2054 }
  0xfa   : > { %4467 = vtanh.f32 %v552_v47  ;;  %v555_v56 = vmul.f32 0.5, %v430_v53  ;;  %v560_v36 = vmul.f32 0.5, %v379_v21  ;;  %9223 = vst [vmem:[#allocation10_spill] sm:$0xff] %v5005_v43  ;;  %v434_v45 = vadd.f32 %v4916_v51, %v4965_v20 }
  0xfb   : > { %4469 = vtanh.f32 %v554_v50  ;;  %v562_v40 = vmul.f32 0.5, %v432_v23  ;;  %v561_v44 = vmul.f32 0.5, %v381_v42 }
  0xfc   : > { %4471 = vtanh.f32 %v553_v52 }
  0xfd   : > { %v4921_v55 = vpop.f32.mrb[4].mxu0  ;;  %4473 = vtanh.f32 %v555_v56  ;;  %v5013_v46 = vpop.permute.xlu1 %1701 }
  0xfe   : > { %v4923_v57 = vpop.f32.mrb[4].mxu1  ;;  %v4925_v58 = vpop.f32.mrb[5].mxu0  ;;  %4475 = vtanh.f32 %v560_v36  ;;  %9224 = vst [vmem:[#allocation11_spill] sm:$0xff] %v5013_v46 }
  0xff   : > { %v4927_v59 = vpop.f32.mrb[5].mxu1  ;;  %v4929_v60 = vpop.f32.mrb[6].mxu0  ;;  %4477 = vtanh.f32 %v562_v40 }
 0x100   : > { %v4931_v61 = vpop.f32.mrb[6].mxu1  ;;  %v4933_v62 = vpop.f32.mrb[7].mxu0  ;;  %4479 = vtanh.f32 %v561_v44 }
 0x101   : > { %v4935_v63 = vpop.f32.mrb[7].mxu1 }
 0x104   : > { %v4468_v1 = vpop.eup %4467 }
 0x105   : > { %v4470_v2 = vpop.eup %4469  ;;  %v616_v4 = vadd.f32 1.0, %v4468_v1  ;;  %v4939_v5 = vpop.f32.mrb[8].mxu0 }
 0x106   : > { %v4941_v6 = vpop.f32.mrb[8].mxu1  ;;  %v4943_v7 = vpop.f32.mrb[9].mxu0  ;;  %v618_v9 = vadd.f32 1.0, %v4470_v2 }
 0x107   : > { %v4945_v8 = vmul.f32 %v616_v4, %v552_v47  ;;  %v4947_v10 = vpop.f32.mrb[9].mxu1  ;;  %v4949_v11 = vpop.f32.mrb[10].mxu0  ;;  %v563_v47 = vmul.f32 0.5, %v434_v45  ;;  %v385_v4 = vadd.f32 %v4921_v55, %v4907_v37  ;;  %v438_v55 = vadd.f32 %v4923_v57, %v4907_v37 }
 0x108   : > { %v4472_v12 = vpop.eup %4471  ;;  %v4951_v13 = vpop.f32.mrb[10].mxu1  ;;  %v4963_v17 = vmul.f32 %v618_v9, %v554_v50  ;;  %v389_v45 = vadd.f32 %v4929_v60, %v4919_v54 }
 0x109   : > { %v4953_v14 = vpop.f32.mrb[11].mxu0  ;;  %v4955_v15 = vpop.f32.mrb[11].mxu1  ;;  %1172 = vrot.lane.b32.xlu1 %v4945_v8, %s4695_s11  ;;  %737 = vrot.lane.b32.xlu0 %v4945_v8, %s4696_s12  ;;  %v617_v18 = vadd.f32 1.0, %v4472_v12  ;;  %4481 = vtanh.f32 %v563_v47 }
 0x10a   : > { %9220 = vst [vmem:[#allocation7_spill] sm:$0xff] %v4963_v17  ;;  %v4474_v19 = vpop.eup %4473 }
 0x10b   : > { %v4979_v26 = vmul.f32 %v617_v18, %v553_v52  ;;  %v619_v27 = vadd.f32 1.0, %v4474_v19  ;;  %v4476_v48 = vpop.eup %4475  ;;  %v5023_v52 = vpop.permute.xlu1 %2230  ;;  %v568_v18 = vmul.f32 0.5, %v385_v4 }
 0x10c   : > { %v4478_v49 = vpop.eup %4477  ;;  %v624_v50 = vadd.f32 1.0, %v4476_v48  ;;  %9225 = vst [vmem:[#allocation12_spill] sm:$0xff] %v5023_v52 }
 0x10d   : > { %v4968_v22 = vpop.f32.mrb[12].mxu0  ;;  %1973 = vrot.lane.b32.xlu1 %v4963_v17, %s4697_s13  ;;  %753 = vrot.lane.b32.xlu0 %v4963_v17, %s4696_s12  ;;  %9221 = vst [vmem:[#allocation8_spill] sm:$0xff] %v4979_v26  ;;  %v4997_v41 = vmul.f32 %v619_v27, %v555_v56  ;;  %v626_v51 = vadd.f32 1.0, %v4478_v49  ;;  %v4480_v1 = vpop.eup %4479  ;;  %4483 = vtanh.f32 %v568_v18 }
 0x10e   : > { %v4975_v24 = vpop.f32.mrb[12].mxu1  ;;  %v4977_v25 = vpop.f32.mrb[13].mxu0  ;;  %v5029_v53 = vmul.f32 %v624_v50, %v560_v36  ;;  %v625_v9 = vadd.f32 1.0, %v4480_v1  ;;  %v442_v1 = vadd.f32 %v4931_v61, %v4919_v54  ;;  %v481_v61 = vadd.f32 %v4939_v5, %v4909_v38 }
 0x10f   : > { %v4981_v28 = vpop.f32.mrb[13].mxu1  ;;  %v4983_v29 = vpop.f32.mrb[14].mxu0  ;;  %v5031_v56 = vmul.f32 %v626_v51, %v562_v40  ;;  %v387_v40 = vadd.f32 %v4925_v58, %v4907_v37  ;;  %v440_v58 = vadd.f32 %v4927_v59, %v4907_v37 }
 0x110   : > { %v4985_v31 = vpop.f32.mrb[14].mxu1  ;;  %v4987_v33 = vpop.f32.mrb[15].mxu0  ;;  %v5045_v19 = vmul.f32 %v625_v9, %v561_v44  ;;  %v570_v44 = vmul.f32 0.5, %v438_v55  ;;  %v578_v9 = vmul.f32 0.5, %v442_v1 }
 0x111   : > { %v4991_v39 = vpop.f32.mrb[15].mxu1  ;;  %745 = vrot.lane.b32.xlu1 %v4979_v26, %s4696_s12  ;;  %882 = vrot.lane.b32.xlu0 %v4945_v8, %s4698_s14  ;;  %9226 = vst [vmem:[#allocation13_spill] sm:$0xff] %v5031_v56  ;;  %v5033_v2 = vpop.permute.xlu1 %2390  ;;  %v569_v57 = vmul.f32 0.5, %v387_v40  ;;  %v571_v60 = vmul.f32 0.5, %v440_v58 }
 0x112   : > { %9227 = vst [vmem:[#allocation14_spill] sm:$0xff] %v5033_v2  ;;  %v5049_v27 = vpop.permute.xlu0 %1914  ;;  %4485 = vtanh.f32 %v570_v44 }
 0x113   : > { %v4482_v12 = vpop.eup %4481  ;;  %9229 = vst [vmem:[#allocation16_spill] sm:$0xff] %v5049_v27  ;;  %4487 = vtanh.f32 %v569_v57 }
 0x114   : > { %v627_v21 = vadd.f32 1.0, %v4482_v12  ;;  %v534_v12 = vadd.f32 %v4941_v6, %v4909_v38 }
 0x115   : > { %761 = vrot.lane.b32.xlu1 %v4997_v41, %s4696_s12  ;;  %898 = vrot.lane.b32.xlu0 %v4963_v17, %s4698_s14  ;;  %v5047_v23 = vpop.permute.xlu1 %1129 }
 0x116   : > { %9228 = vst [vmem:[#allocation15_spill] sm:$0xff] %v5047_v23  ;;  %v5057_v36 = vmul.f32 %v627_v21, %v563_v47  ;;  %v5069_v48 = vpop.permute.xlu0 %1918  ;;  %v576_v47 = vmul.f32 0.5, %v389_v45  ;;  %v558_v45 = vmul.f32 0.5, %v534_v12  ;;  %v680_v23 = vlaneseq }
 0x117   : > { %9231 = vst [vmem:[#allocation18_spill] sm:$0xff] %v5069_v48  ;;  %v4484_v50 = vpop.eup %4483 }
 0x118   : > { %4489 = vtanh.f32 %v576_v47  ;;  %v632_v4 = vadd.f32 1.0, %v4484_v50 }
 0x119   : > { %890 = vrot.lane.b32.xlu1 %v4979_v26, %s4698_s14  ;;  %1188 = vrot.lane.b32.xlu0 %v4963_v17, %s4695_s11  ;;  %v5061_v42 = vpop.permute.xlu1 %1577  ;;  %4491 = vtanh.f32 %v571_v60 }
 0x11a   : > { %9230 = vst [vmem:[#allocation17_spill] sm:$0xff] %v5061_v42  ;;  %v5079_v51 = vpop.permute.xlu0 %1705  ;;  %v5097_v55 = vmul.f32 %v632_v4, %v568_v18  ;;  %4493 = vtanh.f32 %v578_v9  ;;  %v391_v18 = vadd.f32 %v4933_v62, %v4919_v54  ;;  %v556_v4 = vmul.f32 0.5, %v481_v61 }
 0x11b   : > { %9233 = vst [vmem:[#allocation20_spill] sm:$0xff] %v5079_v51  ;;  %4495 = vtanh.f32 %v558_v45 }
 0x11c   : > { %9236 = vst [vmem:[#allocation23_spill] sm:$0xff] %v5097_v55  ;;  %v4486_v40 = vpop.eup %4485  ;;  %v577_v30 = vmul.f32 0.5, %v391_v18  ;;  %4497 = vtanh.f32 %v556_v4 }
 0x11d   : > { %906 = vrot.lane.b32.xlu1 %v4997_v41, %s4698_s14  ;;  %1957 = vrot.lane.b32.xlu0 %v4945_v8, %s4697_s13  ;;  %v5077_v49 = vpop.permute.xlu1 %1625  ;;  %v4488_v58 = vpop.eup %4487  ;;  %v634_v50 = vadd.f32 1.0, %v4486_v40 }
 0x11e   : > { %9232 = vst [vmem:[#allocation19_spill] sm:$0xff] %v5077_v49  ;;  %v5095_v21 = vpop.permute.xlu0 %1709  ;;  %v633_v12 = vadd.f32 1.0, %v4488_v58  ;;  %4499 = vtanh.f32 %v577_v30 }
 0x11f   : > { %9235 = vst [vmem:[#allocation22_spill] sm:$0xff] %v5095_v21  ;;  %v5115_v5 = vmul.f32 %v634_v50, %v570_v44 }
 0x120   : > { %v5127_v44 = vmul.f32 %v633_v12, %v569_v57 }
 0x121   : > { %1196 = vrot.lane.b32.xlu1 %v4997_v41, %s4695_s11  ;;  %1180 = vrot.lane.b32.xlu0 %v4979_v26, %s4695_s11  ;;  %v5087_v59 = vpop.permute.xlu1 %2058  ;;  %9239 = vst [vmem:[#allocation26_spill] sm:$0xff] %v5115_v5 }
 0x122   : > { %9234 = vst [vmem:[#allocation21_spill] sm:$0xff] %v5087_v59  ;;  %v4490_v6 = vpop.eup %4489  ;;  %v5107_v0 = vpop.permute.xlu0 %2238  ;;  %9242 = vst [vmem:[#allocation29_spill] sm:$0xff] %v5127_v44 }
 0x123   : > { %9238 = vst [vmem:[#allocation25_spill] sm:$0xff] %v5107_v0  ;;  %v640_v40 = vadd.f32 1.0, %v4490_v6  ;;  %v4492_v32 = vpop.eup %4491  ;;  %v444_v0 = vadd.f32 %v4935_v63, %v4919_v54  ;;  %v483_v63 = vadd.f32 %v4943_v7, %v4909_v38 }
 0x124   : > { %v635_v61 = vadd.f32 1.0, %v4492_v32  ;;  %v4494_v50 = vpop.eup %4493 }
 0x125   : > { %1981 = vrot.lane.b32.xlu1 %v4997_v41, %s4697_s13  ;;  %1965 = vrot.lane.b32.xlu0 %v4979_v26, %s4697_s13  ;;  %v5105_v1 = vpop.permute.xlu1 %1449  ;;  %v5129_v58 = vmul.f32 %v640_v40, %v576_v47  ;;  %v579_v6 = vmul.f32 0.5, %v444_v0  ;;  %v642_v48 = vadd.f32 1.0, %v4494_v50  ;;  %v4496_v32 = vpop.eup %4495  ;;  %v557_v12 = vmul.f32 0.5, %v483_v63 }
 0x126   : > { %9237 = vst [vmem:[#allocation24_spill] sm:$0xff] %v5105_v1  ;;  %v5125_v62 = vpop.permute.xlu0 %1125  ;;  %v5137_v18 = vmul.f32 %v635_v61, %v571_v60  ;;  %v538_v0 = vadd.f32 %v4951_v13, %v4965_v20  ;;  %v622_v60 = vadd.f32 1.0, %v4496_v32  ;;  %v4498_v40 = vpop.eup %4497  ;;  %v485_v50 = vadd.f32 %v4949_v11, %v4965_v20 }
 0x127   : > { %9241 = vst [vmem:[#allocation28_spill] sm:$0xff] %v5125_v62  ;;  %9243 = vst [vmem:[#allocation30_spill] sm:$0xff] %v5129_v58  ;;  %4501 = vtanh.f32 %v579_v6  ;;  %v5149_v7 = vmul.f32 %v642_v48, %v578_v9  ;;  %v620_v13 = vadd.f32 1.0, %v4498_v40  ;;  %v536_v32 = vadd.f32 %v4947_v10, %v4909_v38 }
 0x128   : > { %9244 = vst [vmem:[#allocation31_spill] sm:$0xff] %v5137_v18  ;;  %4503 = vtanh.f32 %v557_v12  ;;  %v566_v63 = vmul.f32 0.5, %v538_v0  ;;  %v5161_v48 = vmul.f32 %v622_v60, %v558_v45  ;;  %v4500_v9 = vpop.eup %4499  ;;  %v487_v38 = vadd.f32 %v4953_v14, %v4965_v20 }
 0x129   : > { %1975 = vrot.lane.b32.xlu1 %v5031_v56, %s4697_s13  ;;  %739 = vrot.lane.b32.xlu0 %v5029_v53, %s4696_s12  ;;  %v5117_v34 = vpop.permute.xlu1 %2234  ;;  %9247 = vst [vmem:[#allocation34_spill] sm:$0xff] %v5149_v7  ;;  %v641_v21 = vadd.f32 1.0, %v4500_v9  ;;  %v5169_v11 = vmul.f32 %v620_v13, %v556_v4  ;;  %v559_v60 = vmul.f32 0.5, %v536_v32  ;;  %v497_v1 = vadd.f32 %v4987_v33, %v4919_v54 }
 0x12a   : > { %9240 = vst [vmem:[#allocation27_spill] sm:$0xff] %v5117_v34  ;;  %v5141_v47 = vpop.permute.xlu0 %1137  ;;  %9250 = vst [vmem:[#allocation37_spill] sm:$0xff] %v5161_v48  ;;  %4505 = vtanh.f32 %v566_v63  ;;  %v565_v9 = vmul.f32 0.5, %v487_v38 }
 0x12b   : > { %9246 = vst [vmem:[#allocation33_spill] sm:$0xff] %v5141_v47  ;;  %9251 = vst [vmem:[#allocation38_spill] sm:$0xff] %v5169_v11  ;;  %v5181_v10 = vmul.f32 %v641_v21, %v577_v30  ;;  %v540_v21 = vadd.f32 %v4955_v15, %v4965_v20 }
 0x12d   : > { %1190 = vrot.lane.b32.xlu1 %v5031_v56, %s4695_s11  ;;  %755 = vrot.lane.b32.xlu0 %v5031_v56, %s4696_s12  ;;  %v5139_v57 = vpop.permute.xlu1 %1133  ;;  %9254 = vst [vmem:[#allocation41_spill] sm:$0xff] %v5181_v10 }
 0x12e   : > { %9245 = vst [vmem:[#allocation32_spill] sm:$0xff] %v5139_v57  ;;  %v5159_v47 = vpop.permute.xlu0 %1273  ;;  %v564_v57 = vmul.f32 0.5, %v485_v50 }
 0x12f   : > { %9249 = vst [vmem:[#allocation36_spill] sm:$0xff] %v5159_v47 }
 0x130   : > { %4507 = vtanh.f32 %v564_v57 }
 0x131   : > { %747 = vrot.lane.b32.xlu1 %v5045_v19, %s4696_s12  ;;  %884 = vrot.lane.b32.xlu0 %v5029_v53, %s4698_s14  ;;  %v5151_v61 = vpop.permute.xlu1 %1581  ;;  %v4502_v40 = vpop.eup %4501  ;;  %4509 = vtanh.f32 %v559_v60 }
 0x132   : > { %9248 = vst [vmem:[#allocation35_spill] sm:$0xff] %v5151_v61  ;;  %v5173_v45 = vpop.permute.xlu0 %1277  ;;  %v643_v4 = vadd.f32 1.0, %v4502_v40  ;;  %v4504_v13 = vpop.eup %4503  ;;  %4511 = vtanh.f32 %v565_v9 }
 0x133   : > { %9253 = vst [vmem:[#allocation40_spill] sm:$0xff] %v5173_v45 }
 0x134   : > { %v5191_v32 = vmul.f32 %v643_v4, %v579_v6  ;;  %v4506_v14 = vpop.eup %4505  ;;  %v567_v4 = vmul.f32 0.5, %v540_v21 }
 0x135   : > { %763 = vrot.lane.b32.xlu1 %v5057_v36, %s4696_s12  ;;  %900 = vrot.lane.b32.xlu0 %v5031_v56, %s4698_s14  ;;  %v5171_v0 = vpop.permute.xlu1 %1629  ;;  %v630_v38 = vadd.f32 1.0, %v4506_v14 }
 0x136   : > { %9252 = vst [vmem:[#allocation39_spill] sm:$0xff] %v5171_v0  ;;  %v5189_v45 = vpop.permute.xlu0 %1281  ;;  %9257 = vst [vmem:[#allocation44_spill] sm:$0xff] %v5191_v32  ;;  %v621_v0 = vadd.f32 1.0, %v4504_v13  ;;  %v544_v13 = vadd.f32 %v4975_v24, %v4907_v37  ;;  %4513 = vtanh.f32 %v567_v4 }
 0x137   : > { %9256 = vst [vmem:[#allocation43_spill] sm:$0xff] %v5189_v45 }
 0x138   : > { %v5201_v40 = vmul.f32 %v621_v0, %v557_v12  ;;  %v491_v0 = vadd.f32 %v4968_v22, %v4907_v37  ;;  %v574_v14 = vmul.f32 0.5, %v544_v13 }
 0x139   : > { %892 = vrot.lane.b32.xlu1 %v5045_v19, %s4698_s14  ;;  %1174 = vrot.lane.b32.xlu0 %v5029_v53, %s4695_s11  ;;  %v5183_v50 = vpop.permute.xlu1 %2062 }
 0x13a   : > { %9255 = vst [vmem:[#allocation42_spill] sm:$0xff] %v5183_v50  ;;  %9259 = vst [vmem:[#allocation46_spill] sm:$0xff] %v5201_v40  ;;  %v4508_v45 = vpop.eup %4507  ;;  %v5203_v6 = vpop.permute.xlu0 %1621  ;;  %v5211_v50 = vmul.f32 %v630_v38, %v566_v63  ;;  %4515 = vtanh.f32 %v574_v14 }
 0x13b   : > { %9260 = vst [vmem:[#allocation47_spill] sm:$0xff] %v5203_v6  ;;  %v4510_v20 = vpop.eup %4509 }
 0x13c   : > { %9261 = vst [vmem:[#allocation48_spill] sm:$0xff] %v5211_v50  ;;  %v623_v24 = vadd.f32 1.0, %v4510_v20  ;;  %v4512_v63 = vpop.eup %4511 }
 0x13d   : > { %908 = vrot.lane.b32.xlu1 %v5057_v36, %s4698_s14  ;;  %1959 = vrot.lane.b32.xlu0 %v5029_v53, %s4697_s13  ;;  %v5197_v30 = vpop.permute.xlu1 %1453  ;;  %v629_v22 = vadd.f32 1.0, %v4512_v63 }
 0x13e   : > { %9258 = vst [vmem:[#allocation45_spill] sm:$0xff] %v5197_v30  ;;  %v628_v30 = vadd.f32 1.0, %v4508_v45  ;;  %v5215_v12 = vpop.permute.xlu0 %1633 }
 0x13f   : > { %9263 = vst [vmem:[#allocation50_spill] sm:$0xff] %v5215_v12  ;;  %v572_v12 = vmul.f32 0.5, %v491_v0 }
 0x140   : > { %v5223_v45 = vmul.f32 %v628_v30, %v564_v57  ;;  %v493_v57 = vadd.f32 %v4977_v25, %v4907_v37  ;;  %v5241_v30 = vmul.f32 %v629_v22, %v565_v9  ;;  %v4514_v0 = vpop.eup %4513 }
 0x141   : > { %1182 = vrot.lane.b32.xlu1 %v5045_v19, %s4695_s11  ;;  %1967 = vrot.lane.b32.xlu0 %v5045_v19, %s4697_s13  ;;  %v5213_v15 = vpop.permute.xlu1 %1585  ;;  %4517 = vtanh.f32 %v572_v12  ;;  %v631_v63 = vadd.f32 1.0, %v4514_v0 }
 0x142   : > { %9262 = vst [vmem:[#allocation49_spill] sm:$0xff] %v5213_v15  ;;  %9264 = vst [vmem:[#allocation51_spill] sm:$0xff] %v5223_v45  ;;  %v5231_v38 = vpop.permute.xlu0 %1445  ;;  %v5233_v15 = vmul.f32 %v623_v24, %v559_v60  ;;  %v573_v60 = vmul.f32 0.5, %v493_v57  ;;  %v546_v24 = vadd.f32 %v4981_v28, %v4907_v37  ;;  %v548_v57 = vadd.f32 %v4985_v31, %v4919_v54 }
 0x143   : > { %9266 = vst [vmem:[#allocation53_spill] sm:$0xff] %v5231_v38  ;;  %9268 = vst [vmem:[#allocation55_spill] sm:$0xff] %v5241_v30  ;;  %v5263_v61 = vmul.f32 %v631_v63, %v567_v4 }
 0x144   : > { %9267 = vst [vmem:[#allocation54_spill] sm:$0xff] %v5233_v15  ;;  %v4516_v9 = vpop.eup %4515  ;;  %4519 = vtanh.f32 %v573_v60  ;;  %v575_v22 = vmul.f32 0.5, %v546_v24  ;;  %v495_v24 = vadd.f32 %v4983_v29, %v4919_v54  ;;  %v582_v27 = vmul.f32 0.5, %v548_v57 }
 0x145   : > { %1198 = vrot.lane.b32.xlu1 %v5057_v36, %s4695_s11  ;;  %741 = vrot.lane.b32.xlu0 %v5097_v55, %s4696_s12  ;;  %v5229_v21 = vpop.permute.xlu1 %1922  ;;  %9271 = vst [vmem:[#allocation58_spill] sm:$0xff] %v5263_v61  ;;  %v638_v37 = vadd.f32 1.0, %v4516_v9 }
 0x146   : > { %9265 = vst [vmem:[#allocation52_spill] sm:$0xff] %v5229_v21  ;;  %4521 = vtanh.f32 %v575_v22 }
 0x147   : > { %v5275_v4 = vmul.f32 %v638_v37, %v574_v14  ;;  %4523 = vtanh.f32 %v582_v27  ;;  %v581_v37 = vmul.f32 0.5, %v497_v1 }
 0x149   : > { %1983 = vrot.lane.b32.xlu1 %v5057_v36, %s4697_s13  ;;  %886 = vrot.lane.b32.xlu0 %v5097_v55, %s4698_s14  ;;  %9272 = vst [vmem:[#allocation59_spill] sm:$0xff] %v5275_v4 }
 0x14b   : > { %v4518_v34 = vpop.eup %4517 }
 0x14c   : > { %v636_v31 = vadd.f32 1.0, %v4518_v34 }
 0x14d   : > { %757 = vrot.lane.b32.xlu1 %v5115_v5, %s4696_s12  ;;  %902 = vrot.lane.b32.xlu0 %v5115_v5, %s4698_s14 }
 0x14e   : > { %v5287_v29 = vmul.f32 %v636_v31, %v572_v12  ;;  %v4520_v57 = vpop.eup %4519 }
 0x150   : > { %9273 = vst [vmem:[#allocation60_spill] sm:$0xff] %v5287_v29  ;;  %v4522_v31 = vpop.eup %4521 }
 0x151   : > { %749 = vrot.lane.b32.xlu1 %v5127_v44, %s4696_s12  ;;  %743 = vrot.lane.b32.xlu0 %v5129_v58, %s4696_s12  ;;  %v639_v1 = vadd.f32 1.0, %v4522_v31 }
 0x155   : > { %765 = vrot.lane.b32.xlu1 %v5137_v18, %s4696_s12  ;;  %888 = vrot.lane.b32.xlu0 %v5129_v58, %s4698_s14 }
 0x159   : > { %894 = vrot.lane.b32.xlu1 %v5127_v44, %s4698_s14  ;;  %904 = vrot.lane.b32.xlu0 %v5149_v7, %s4698_s14 }
 0x15d   : > { %910 = vrot.lane.b32.xlu1 %v5137_v18, %s4698_s14  ;;  %785 = vrot.lane.b32.xlu0 %v5161_v48, %s4696_s12 }
 0x161   : > { %759 = vrot.lane.b32.xlu1 %v5149_v7, %s4696_s12  ;;  %769 = vrot.lane.b32.xlu0 %v5169_v11, %s4696_s12 }
 0x165   : > { %751 = vrot.lane.b32.xlu1 %v5181_v10, %s4696_s12  ;;  %914 = vrot.lane.b32.xlu0 %v5169_v11, %s4698_s14 }
 0x169   : > { %767 = vrot.lane.b32.xlu1 %v5191_v32, %s4696_s12  ;;  %1989 = vrot.lane.b32.xlu0 %v5169_v11, %s4697_s13 }
 0x16d   : > { %896 = vrot.lane.b32.xlu1 %v5181_v10, %s4698_s14  ;;  %777 = vrot.lane.b32.xlu0 %v5201_v40, %s4696_s12 }
 0x171   : > { %912 = vrot.lane.b32.xlu1 %v5191_v32, %s4698_s14  ;;  %787 = vrot.lane.b32.xlu0 %v5211_v50, %s4696_s12 }
 0x175   : > { %930 = vrot.lane.b32.xlu1 %v5161_v48, %s4698_s14  ;;  %771 = vrot.lane.b32.xlu0 %v5223_v45, %s4696_s12 }
 0x179   : > { %793 = vrot.lane.b32.xlu1 %v5233_v15, %s4696_s12  ;;  %916 = vrot.lane.b32.xlu0 %v5223_v45, %s4698_s14 }
 0x17b   : > { %v5243_v13 = vpop.permute.xlu1 %1172  ;;  %v5245_v20 = vpop.permute.xlu0 %737 }
 0x17c   : > { %9269 = vst [vmem:[#allocation56_spill] sm:$0xff] %v5243_v13  ;;  %v1639_v13 = vmul.f32 %v5203_v6, %v4997_v41 }
 0x17d   : > { %938 = vrot.lane.b32.xlu1 %v5233_v15, %s4698_s14  ;;  %924 = vrot.lane.b32.xlu0 %v5241_v30, %s4698_s14 }
 0x17f   : > { %v5253_v21 = vpop.permute.xlu1 %1973  ;;  %v5255_v25 = vpop.permute.xlu0 %753 }
 0x180   : > { %9270 = vst [vmem:[#allocation57_spill] sm:$0xff] %v5253_v21 }
 0x181   : > { %922 = vrot.lane.b32.xlu1 %v5201_v40, %s4698_s14  ;;  %779 = vrot.lane.b32.xlu0 %v5241_v30, %s4696_s12  ;;  %v580_v30 = vmul.f32 0.5, %v495_v24  ;;  %v550_v24 = vadd.f32 %v4991_v39, %v4919_v54  ;;  %v4524_v39 = vpop.eup %4523 }
 0x183   : > { %v5265_v28 = vpop.permute.xlu1 %745  ;;  %v5267_v0 = vpop.permute.xlu0 %882  ;;  %4525 = vtanh.f32 %v580_v30 }
 0x184   : > { %4527 = vtanh.f32 %v581_v37 }
 0x185   : > { %1228 = vrot.lane.b32.xlu1 %v5233_v15, %s4695_s11  ;;  %1230 = vrot.lane.b32.xlu0 %v5263_v61, %s4695_s11  ;;  %v583_v15 = vmul.f32 0.5, %v550_v24  ;;  %v646_v24 = vadd.f32 1.0, %v4524_v39 }
 0x187   : > { %v5277_v63 = vpop.permute.xlu1 %761  ;;  %v5279_v9 = vpop.permute.xlu0 %898  ;;  %4529 = vtanh.f32 %v583_v15 }
 0x189   : > { %932 = vrot.lane.b32.xlu1 %v5211_v50, %s4698_s14  ;;  %789 = vrot.lane.b32.xlu0 %v5275_v4, %s4696_s12  ;;  %v637_v50 = vadd.f32 1.0, %v4520_v57  ;;  %v5313_v57 = vand.u32 127, %v680_v23 }
 0x18b   : > { %v5289_v34 = vpop.permute.xlu1 %890  ;;  %v5291_v14 = vpop.permute.xlu0 %1188  ;;  %v5307_v59 = vmul.f32 %v637_v50, %v573_v60  ;;  %v5326_v48 = vadd.s32 128, %v5313_v57  ;;  %vm801_vm2 = vcmp.lt.s32.totalorder %v5313_v57, 1  ;;  %vm946_vm5 = vcmp.lt.s32.totalorder %v5313_v57, 127 }
 0x18c   : > { %9274 = vst [vmem:[#allocation61_spill] sm:$0xff] %v5291_v14  ;;  %v967_v35 = vsel %vm946_vm5, %v5289_v34, %v5279_v9  ;;  %vm1876_vm1 = vcmp.lt.s32.totalorder %v5313_v57, 112 }
 0x18d   : > { %795 = vrot.lane.b32.xlu1 %v5263_v61, %s4696_s12  ;;  %773 = vrot.lane.b32.xlu0 %v5287_v29, %s4696_s12  ;;  %9276 = vst [vmem:[#allocation63_spill] sm:$0xff] %v5307_v59  ;;  %v4526_v31 = vpop.eup %4525  ;;  %9282 = vst [vmem:[#allocation69_spill] sm:$0xff] %v5326_v48 }
 0x18e   : > { %v644_v23 = vadd.f32 1.0, %v4526_v31  ;;  %v4528_v39 = vpop.eup %4527 }
 0x18f   : > { %v5299_v33 = vpop.permute.xlu1 %906  ;;  %v5301_v12 = vpop.permute.xlu0 %1957  ;;  %v645_v14 = vadd.f32 1.0, %v4528_v39 }
 0x190   : > { %9275 = vst [vmem:[#allocation62_spill] sm:$0xff] %v5301_v12  ;;  %v8905_v12 = vand.u32 255, %v5326_v48 }
 0x191   : > { %940 = vrot.lane.b32.xlu1 %v5263_v61, %s4698_s14  ;;  %918 = vrot.lane.b32.xlu0 %v5287_v29, %s4698_s14  ;;  %v5319_v61 = vmul.f32 %v639_v1, %v575_v22 }
 0x192   : > { %v5351_v31 = vand.u32 15, %v8905_v12 }
 0x193   : > { %v5309_v47 = vpop.permute.xlu1 %1196  ;;  %v5311_v54 = vpop.permute.xlu0 %1180  ;;  %9279 = vst [vmem:[#allocation66_spill] sm:$0xff] %v5319_v61 }
 0x194   : > { %9277 = vst [vmem:[#allocation64_spill] sm:$0xff] %v5309_v47  ;;  %9278 = vst [vmem:[#allocation65_spill] sm:$0xff] %v5311_v54  ;;  %vm722_vm3 = vcmp.ge.s32.totalorder %v5351_v31, 1  ;;  %vm730_vm9 = vcmp.le.s32.totalorder %v5351_v31, 14 }
 0x195   : > { %934 = vrot.lane.b32.xlu1 %v5275_v4, %s4698_s14  ;;  %926 = vrot.lane.b32.xlu0 %v5307_v59, %s4698_s14  ;;  %v5332_v4 = vmul.f32 %v646_v24, %v582_v27  ;;  %v4530_v24 = vpop.eup %4529 }
 0x197   : > { %v5321_v50 = vpop.permute.xlu1 %1981  ;;  %v5323_v60 = vpop.permute.xlu0 %1965  ;;  %9283 = vst [vmem:[#allocation70_spill] sm:$0xff] %v5332_v4 }
 0x198   : > { %9280 = vst [vmem:[#allocation67_spill] sm:$0xff] %v5321_v50  ;;  %9281 = vst [vmem:[#allocation68_spill] sm:$0xff] %v5323_v60  ;;  %v5343_v50 = vmul.f32 %v644_v23, %v580_v30  ;;  %v647_v30 = vadd.f32 1.0, %v4530_v24  ;;  %v1647_v60 = vmul.f32 %v5077_v49, %v5057_v36  ;;  %v1636_v36 = vmul.f32 %v5203_v6, %v4945_v8 }
 0x199   : > { %797 = vrot.lane.b32.xlu1 %v5319_v61, %s4696_s12  ;;  %781 = vrot.lane.b32.xlu0 %v5307_v59, %s4696_s12 }
 0x19a   : > { %9285 = vst [vmem:[#allocation72_spill] sm:$0xff] %v5343_v50 }
 0x19b   : > { %v5334_v22 = vpop.permute.xlu1 %1975  ;;  %v5336_v1 = vpop.permute.xlu0 %739 }
 0x19c   : > { %9284 = vst [vmem:[#allocation71_spill] sm:$0xff] %v5334_v22  ;;  %v5357_v22 = vmul.f32 %v645_v14, %v581_v37  ;;  %v1645_v37 = vmul.f32 %v5077_v49, %v5045_v19 }
 0x19d   : > { %942 = vrot.lane.b32.xlu1 %v5319_v61, %s4698_s14  ;;  %791 = vrot.lane.b32.xlu0 %v5332_v4, %s4696_s12 }
 0x19e   : > { %9287 = vst [vmem:[#allocation74_spill] sm:$0xff] %v5357_v22 }
 0x19f   : > { %v5345_v59 = vpop.permute.xlu1 %1190  ;;  %v5347_v27 = vpop.permute.xlu0 %755 }
 0x1a0   : > { %9286 = vst [vmem:[#allocation73_spill] sm:$0xff] %v5345_v59  ;;  %v5381_v59 = vmul.f32 %v647_v30, %v583_v15 }
 0x1a1   : > { %920 = vrot.lane.b32.xlu1 %v5343_v50, %s4698_s14  ;;  %775 = vrot.lane.b32.xlu0 %v5343_v50, %s4696_s12 }
 0x1a2   : > { %9288 = vst [vmem:[#allocation75_spill] sm:$0xff] %v5381_v59 }
 0x1a3   : > { %v5360_v23 = vpop.permute.xlu1 %747  ;;  %v5362_v39 = vpop.permute.xlu0 %884 }
 0x1a4   : > { %v827_v12 = vsel %vm801_vm2, %v5336_v1, %v5360_v23 }
 0x1a5   : > { %936 = vrot.lane.b32.xlu1 %v5332_v4, %s4698_s14  ;;  %928 = vrot.lane.b32.xlu0 %v5357_v22, %s4698_s14  ;;  %v5375_v14 = vsel %vm722_vm3, %v827_v12, 0.0 }
 0x1a6   : > { %v1597_v24 = vmul.f32 %v5061_v42, %v5375_v14 }
 0x1a7   : > { %v5383_v47 = vpop.permute.xlu1 %763  ;;  %v5385_v50 = vpop.permute.xlu0 %900 }
 0x1a8   : > { %v5387_v4 = vadd.f32 %v1645_v37, %v1597_v24  ;;  %v5408_v37 = vld [vmem:[%s8857_s3 + $0x18] sm:$0xff] }
 0x1a9   : > { %799 = vrot.lane.b32.xlu1 %v5381_v59, %s4696_s12  ;;  %783 = vrot.lane.b32.xlu0 %v5357_v22, %s4696_s12  ;;  %9292 = vst [vmem:[#allocation79_spill] sm:$0xff] %v5408_v37  ;;  %s4699_s12 = smov 110  }
 0x1aa   : > { %9289 = vst [vmem:[#allocation76_spill] sm:$0xff] %v5387_v4 }
 0x1ab   : > { %v5393_v12 = vpop.permute.xlu1 %892  ;;  %v5395_v19 = vpop.permute.xlu0 %1174 }
 0x1ac   : > { %9290 = vst [vmem:[#allocation77_spill] sm:$0xff] %v5395_v19 }
 0x1ad   : > { %944 = vrot.lane.b32.xlu1 %v5381_v59, %s4698_s14  ;;  %1991 = vrot.lane.b32.xlu0 %v5223_v45, %s4697_s13  ;;  %v9295_v45 = vmov 10   ;;  %s4704_s14 = smov 114  }
 0x1af   : > { %v5401_v15 = vpop.permute.xlu1 %908  ;;  %v5403_v30 = vpop.permute.xlu0 %1959 }
 0x1b0   : > { %9291 = vst [vmem:[#allocation78_spill] sm:$0xff] %v5403_v30  ;;  %v5422_v30 = vadd.s32 256, %v5313_v57 }
 0x1b1   : > { %2066 = vperm.xlu1 %4450, %v5408_v37   ;;  %1184 = vrot.lane.b32.xlu0 %v5127_v44, %s4695_s11 }
 0x1b2   : > { %9296 = vst [vmem:[#allocation82_spill] sm:$0xff] %v5422_v30 }
 0x1b3   : > { %v5413_v24 = vpop.permute.xlu1 %1182  ;;  %v5415_v22 = vpop.permute.xlu0 %1967 }
 0x1b4   : > { %9293 = vst [vmem:[#allocation80_spill] sm:$0xff] %v5413_v24  ;;  %9294 = vst [vmem:[#allocation81_spill] sm:$0xff] %v5415_v22  ;;  %v8930_v22 = vand.u32 255, %v5422_v30  ;;  %v9302_v30 = vand.u32 255, %v5313_v57 }
 0x1b5   : > { %1176 = vrot.lane.b32.xlu1 %v5097_v55, %s4695_s11  ;;  %1457 = vperm.xlu0 %4448, %v5408_v37  }
 0x1b6   : > { %4451 = vset.pattern.permute.xlu1 %v9295_v45  ;;  %v9299_v45 = vmov 1   ;;  %v5474_v48 = vand.u32 15, %v9302_v30 }
 0x1b7   : > { %v5424_v19 = vpop.permute.xlu1 %1198  ;;  %v5426_v4 = vpop.permute.xlu0 %741 }
 0x1b8   : > { %9297 = vst [vmem:[#allocation83_spill] sm:$0xff] %v5424_v19  ;;  %v826_v19 = vsel %vm801_vm2, %v5245_v20, %v5265_v28  ;;  %vm729_vm6 = vcmp.le.s32.totalorder %v5474_v48, 14  ;;  %vm721_vm11 = vcmp.ge.s32.totalorder %v5474_v48, 1 }
 0x1b9   : > { %1232 = vrot.lane.b32.xlu1 %v5319_v61, %s4695_s11  ;;  %1969 = vrot.lane.b32.xlu0 %v5127_v44, %s4697_s13  ;;  %v5447_v61 = vand.u32 15, %v8930_v22  ;;  %v5460_v40 = vsel %vm722_vm3, %v826_v19, 0.0  ;;  %v822_v22 = vsel %vm801_vm2, %v5265_v28, %v5255_v25  ;;  %v4606_v44 = vld [vmem:[%s8857_s3 + $0x8] sm:$0xff] }
 0x1ba   : > { %4455 = vset.pattern.permute.xlu0 %v9299_v45  ;;  %9301 = vst [vmem:[#allocation86_spill] sm:$0xff] %v5460_v40 }
 0x1bb   : > { %v5433_v24 = vpop.permute.xlu1 %1983  ;;  %v5435_v56 = vpop.permute.xlu0 %886  ;;  %vm723_vm4 = vcmp.ge.s32.totalorder %v5447_v61, 1  ;;  %vm731_vm8 = vcmp.le.s32.totalorder %v5447_v61, 14 }
 0x1bc   : > { %9298 = vst [vmem:[#allocation84_spill] sm:$0xff] %v5433_v24  ;;  %v5451_v24 = vadd.s32 384, %v5313_v57  ;;  %v5484_v62 = vsel %vm723_vm4, %v822_v22, 0.0 }
 0x1bd   : > { %1713 = vperm.xlu1 %4451, %v5408_v37   ;;  %1192 = vrot.lane.b32.xlu0 %v5115_v5, %s4695_s11  ;;  %9303 = vst [vmem:[#allocation87_spill] sm:$0xff] %v5484_v62 }
 0x1be   : > { %9300 = vst [vmem:[#allocation85_spill] sm:$0xff] %v5451_v24  ;;  %v8939_v19 = vand.u32 255, %v5451_v24 }
 0x1bf   : > { %v5453_v2 = vpop.permute.xlu1 %757  ;;  %v5455_v17 = vpop.permute.xlu0 %902 }
 0x1c0   : > { %v5497_v30 = vand.u32 15, %v8939_v19 }
 0x1c1   : > { %4452 = vset.pattern.permute.xlu1 %v9299_v45  ;;  %1820 = vrot.lane.b32.xlu0 %v5460_v40, %s4697_s13 }
 0x1c2   : > { %2394 = vperm.xlu1 %4452, %v4606_v44   ;;  %v971_v44 = vsel %vm946_vm5, %v5267_v0, %v5289_v34  ;;  %vm724_vm7 = vcmp.ge.s32.totalorder %v5497_v30, 1  ;;  %vm732_vm10 = vcmp.le.s32.totalorder %v5497_v30, 14  ;;  %v5569_v34 = vsel %vm730_vm9, %v967_v35, 0.0 }
 0x1c3   : > { %v5478_v38 = vpop.permute.xlu1 %749  ;;  %v5480_v28 = vpop.permute.xlu0 %743  ;;  %v5506_v52 = vsel %vm729_vm6, %v971_v44, 0.0  ;;  %v963_v44 = vsel %vm946_vm5, %v5279_v9, %v5299_v33  ;;  %9308 = vst [vmem:[#allocation91_spill] sm:$0xff] %v5569_v34 }
 0x1c4   : > { %9306 = vst [vmem:[#allocation89_spill] sm:$0xff] %v5506_v52 }
 0x1c5   : > { %1043 = vrot.lane.b32.xlu0 %v5484_v62, %s4695_s11 }
 0x1c6   : > { %1977 = vrot.lane.b32.xlu1 %v5115_v5, %s4697_s13  ;;  %v818_v5 = vsel %vm801_vm2, %v5255_v25, %v5277_v63 }
 0x1c7   : > { %v5499_v26 = vpop.permute.xlu1 %765  ;;  %v5501_v22 = vpop.permute.xlu0 %888  ;;  %4453 = vset.pattern.permute.xlu1 %v9305_v3  ;;  %v853_v3 = vsel %vm724_vm7, %v818_v5, 0.0  ;;  %v5537_v5 = vsel %vm731_vm8, %v963_v44, 0.0 }
 0x1c8   : > { %9304 = vst [vmem:[#allocation88_spill] sm:$0xff] %v5501_v22  ;;  %9307 = vst [vmem:[#allocation90_spill] sm:$0xff] %v5537_v5 }
 0x1c9   : > { %1348 = vrot.lane.b32.xlu0 %v5506_v52, %s4695_s11 }
 0x1ca   : > { %2242 = vperm.xlu1 %4453, %v5408_v37  }
 0x1cb   : > { %v5516_v19 = vpop.permute.xlu1 %894  ;;  %v5518_v24 = vpop.permute.xlu0 %904 }
 0x1cd   : > { %1836 = vrot.lane.b32.xlu0 %v853_v3, %s4697_s13 }
 0x1ce   : > { %1035 = vrot.lane.b32.xlu1 %v5460_v40, %s4695_s11 }
 0x1cf   : > { %v5530_v25 = vpop.permute.xlu1 %910  ;;  %v5532_v37 = vpop.permute.xlu0 %785  ;;  %4454 = vset.pattern.permute.xlu1 %v9299_v45  ;;  %v1591_v45 = vmul.f32 %v4961_v16, %v853_v3 }
 0x1d1   : > { %2149 = vrot.lane.b32.xlu0 %v5537_v5, %s4697_s13  ;;  %v1671_v54 = vadd.f32 %v1639_v13, %v1591_v45  ;;  %v964_v13 = vsel %vm946_vm5, %v5385_v50, %v5401_v15 }
 0x1d2   : > { %1828 = vrot.lane.b32.xlu1 %v5484_v62, %s4697_s13 }
 0x1d3   : > { %v5543_v43 = vpop.permute.xlu1 %759  ;;  %v5545_v40 = vpop.permute.xlu0 %769 }
 0x1d5   : > { %2133 = vrot.lane.b32.xlu0 %v5506_v52, %s4697_s13  ;;  %v968_v52 = vsel %vm946_vm5, %v5393_v12, %v5385_v50 }
 0x1d6   : > { %1051 = vrot.lane.b32.xlu1 %v853_v3, %s4695_s11  ;;  %v5593_v11 = vsel %vm730_vm9, %v968_v52, 0.0  ;;  %v972_v52 = vsel %vm946_vm5, %v5362_v39, %v5393_v12  ;;  %v823_v12 = vsel %vm801_vm2, %v5360_v23, %v5347_v27 }
 0x1d7   : > { %v5557_v44 = vpop.permute.xlu1 %751  ;;  %v5559_v62 = vpop.permute.xlu0 %914  ;;  %v5655_v23 = vsel %vm723_vm4, %v823_v12, 0.0 }
 0x1d8   : > { %v959_v9 = vsel %vm946_vm5, %v5299_v33, %v5559_v62  ;;  %9318 = vst [vmem:[#allocation101_spill] sm:$0xff] %v5655_v23 }
 0x1d9   : > { %v5573_v3 = vsel %vm732_vm10, %v959_v9, 0.0  ;;  %1037 = vrot.lane.b32.xlu0 %v5375_v14, %s4695_s11 }
 0x1da   : > { %1356 = vrot.lane.b32.xlu1 %v5569_v34, %s4695_s11  ;;  %v1719_v35 = vmul.f32 %v5013_v46, %v5573_v3 }
 0x1db   : > { %v5585_v41 = vpop.permute.xlu1 %767  ;;  %v5587_v33 = vpop.permute.xlu0 %1989 }
 0x1dc   : > { %9309 = vst [vmem:[#allocation92_spill] sm:$0xff] %v5587_v33  ;;  %v5589_v9 = vadd.f32 %v1719_v35, %v1671_v54  ;;  %v5609_v54 = vsel %vm731_vm8, %v964_v13, 0.0  ;;  %v819_v13 = vsel %vm801_vm2, %v5347_v27, %v5383_v47 }
 0x1dd   : > { %2143 = vrot.lane.b32.xlu0 %v5593_v11, %s4697_s13  ;;  %v861_v46 = vsel %vm724_vm7, %v819_v13, 0.0 }
 0x1de   : > { %9310 = vst [vmem:[#allocation93_spill] sm:$0xff] %v5589_v9  ;;  %2141 = vrot.lane.b32.xlu1 %v5569_v34, %s4697_s13  ;;  %v5629_v9 = vsel %vm729_vm6, %v972_v52, 0.0  ;;  %v1599_v12 = vmul.f32 %v5061_v42, %v861_v46 }
 0x1df   : > { %v5603_v45 = vpop.permute.xlu1 %896  ;;  %v5605_v33 = vpop.permute.xlu0 %777 }
 0x1e0   : > { %9311 = vst [vmem:[#allocation94_spill] sm:$0xff] %v5603_v45  ;;  %9312 = vst [vmem:[#allocation95_spill] sm:$0xff] %v5605_v33  ;;  %v828_v33 = vsel %vm801_vm2, %v5426_v4, %v5478_v38  ;;  %v1679_v7 = vadd.f32 %v1647_v60, %v1599_v12 }
 0x1e1   : > { %1366 = vrot.lane.b32.xlu0 %v5609_v54, %s4695_s11  ;;  %v5651_v27 = vsel %vm722_vm3, %v828_v33, 0.0  ;;  %v5667_v33 = vadd.s32 896, %v5313_v57 }
 0x1e2   : > { %1364 = vrot.lane.b32.xlu1 %v5537_v5, %s4695_s11  ;;  %9317 = vst [vmem:[#allocation100_spill] sm:$0xff] %v5651_v27 }
 0x1e3   : > { %v5619_v50 = vpop.permute.xlu1 %912  ;;  %v5621_v35 = vpop.permute.xlu0 %787  ;;  %9319 = vst [vmem:[#allocation102_spill] sm:$0xff] %v5667_v33 }
 0x1e4   : > { %9313 = vst [vmem:[#allocation96_spill] sm:$0xff] %v5619_v50  ;;  %9314 = vst [vmem:[#allocation97_spill] sm:$0xff] %v5621_v35 }
 0x1e5   : > { %2135 = vrot.lane.b32.xlu0 %v5629_v9, %s4697_s13 }
 0x1e6   : > { %1822 = vrot.lane.b32.xlu1 %v5375_v14, %s4697_s13  ;;  %v824_v14 = vsel %vm801_vm2, %v5478_v38, %v5453_v2 }
 0x1e7   : > { %v5643_v5 = vpop.permute.xlu1 %930  ;;  %v5645_v52 = vpop.permute.xlu0 %771  ;;  %v5681_v50 = vsel %vm723_vm4, %v824_v14, 0.0 }
 0x1e8   : > { %9315 = vst [vmem:[#allocation98_spill] sm:$0xff] %v5643_v5  ;;  %9316 = vst [vmem:[#allocation99_spill] sm:$0xff] %v5645_v52 }
 0x1e9   : > { %1824 = vrot.lane.b32.xlu0 %v5651_v27, %s4697_s13  ;;  %9320 = vst [vmem:[#allocation103_spill] sm:$0xff] %v5681_v50 }
 0x1ea   : > { %1830 = vrot.lane.b32.xlu1 %v5655_v23, %s4697_s13 }
 0x1eb   : > { %v794_v13 = vpop.permute.xlu1 %793  ;;  %v5669_v5 = vpop.permute.xlu0 %916 }
 0x1ec   : > { %v830_v38 = vsel %vm801_vm2, %v794_v13, %v5245_v20  ;;  %v960_v34 = vsel %vm946_vm5, %v5401_v15, %v5669_v5  ;;  %v8970_v15 = vand.u32 255, %v5667_v33  ;;  %v802_v60 = vsel %vm801_vm2, %v5532_v37, %v794_v13 }
 0x1ed   : > { %v5687_v21 = vsel %vm721_vm11, %v830_v38, 0.0  ;;  %v5691_v22 = vsel %vm732_vm10, %v960_v34, 0.0  ;;  %1047 = vrot.lane.b32.xlu0 %v5681_v50, %s4695_s11 }
 0x1ee   : > { %1045 = vrot.lane.b32.xlu1 %v5655_v23, %s4695_s11  ;;  %v1588_v20 = vmul.f32 %v4961_v16, %v5687_v21  ;;  %v1727_v14 = vmul.f32 %v5079_v51, %v5691_v22  ;;  %v5717_v8 = vand.u32 15, %v8970_v15 }
 0x1ef   : > { %v5704_v38 = vpop.permute.xlu1 %938  ;;  %v5706_v34 = vpop.permute.xlu0 %924 }
 0x1f0   : > { %9321 = vst [vmem:[#allocation104_spill] sm:$0xff] %v5706_v34  ;;  %v5708_v32 = vadd.f32 %v1636_v36, %v1588_v20  ;;  %v5710_v45 = vadd.f32 %v1727_v14, %v1679_v7  ;;  %vm728_vm12 = vcmp.ge.s32.totalorder %v5717_v8, 1  ;;  %v5732_v7 = vadd.s32 512, %v5313_v57 }
 0x1f1   : > { %1372 = vrot.lane.b32.xlu0 %v5573_v3, %s4695_s11  ;;  %v5740_v36 = vsel %vm728_vm12, %v802_v60, 0.0  ;;  %v975_v13 = vsel %vm946_vm5, %v5704_v38, %v5267_v0  ;;  %vm736_vm13 = vcmp.le.s32.totalorder %v5717_v8, 14  ;;  %v9413_v8 = vld [vmem:[#allocation8_spill] sm:$0xff] }
 0x1f2   : > { %9322 = vst [vmem:[#allocation105_spill] sm:$0xff] %v5708_v32  ;;  %9323 = vst [vmem:[#allocation106_spill] sm:$0xff] %v5710_v45  ;;  %1053 = vrot.lane.b32.xlu1 %v861_v46, %s4695_s11  ;;  %v8976_v14 = vand.u32 255, %v5732_v7  ;;  %v5758_v60 = vsel %vm736_vm13, %v975_v13, 0.0 }
 0x1f3   : > { %v5719_v23 = vpop.permute.xlu1 %922  ;;  %v5721_v51 = vpop.permute.xlu0 %779  ;;  %9325 = vst [vmem:[#allocation108_spill] sm:$0xff] %v5732_v7  ;;  %9328 = vst [vmem:[#allocation111_spill] sm:$0xff] %v5740_v36 }
 0x1f4   : > { %9324 = vst [vmem:[#allocation107_spill] sm:$0xff] %v5721_v51  ;;  %9331 = vst [vmem:[#allocation114_spill] sm:$0xff] %v5758_v60  ;;  %v955_v0 = vsel %vm946_vm5, %v5559_v62, %v5719_v23 }
 0x1f5   : > { %1027 = vrot.lane.b32.xlu0 %v5687_v21, %s4695_s11 }
 0x1f6   : > { %1350 = vrot.lane.b32.xlu1 %v5629_v9, %s4695_s11 }
 0x1f7   : > { %v5734_v12 = vpop.permute.xlu1 %1228  ;;  %v5736_v20 = vpop.permute.xlu0 %1230 }
 0x1f8   : > { %9326 = vst [vmem:[#allocation109_spill] sm:$0xff] %v5734_v12  ;;  %9327 = vst [vmem:[#allocation110_spill] sm:$0xff] %v5736_v20 }
 0x1f9   : > { %1083 = vrot.lane.b32.xlu0 %v5740_v36, %s4695_s11  ;;  %v5769_v36 = vand.u32 15, %v8976_v14  ;;  %v815_v14 = vsel %vm801_vm2, %v5383_v47, %v5645_v52 }
 0x1fa   : > { %1358 = vrot.lane.b32.xlu1 %v5593_v11, %s4695_s11 }
 0x1fb   : > { %v5752_v15 = vpop.permute.xlu1 %932  ;;  %v5754_v33 = vpop.permute.xlu0 %789  ;;  %vm733_vm14 = vcmp.le.s32.totalorder %v5769_v36, 14  ;;  %vm725_vm15 = vcmp.ge.s32.totalorder %v5769_v36, 1 }
 0x1fc   : > { %9329 = vst [vmem:[#allocation112_spill] sm:$0xff] %v5752_v15  ;;  %9330 = vst [vmem:[#allocation113_spill] sm:$0xff] %v5754_v33  ;;  %v5782_v62 = vsel %vm733_vm14, %v955_v0, 0.0  ;;  %v1644_v0 = vmul.f32 %v5077_v49, %v5029_v53  ;;  %v5809_v47 = vsel %vm725_vm15, %v815_v14, 0.0  ;;  %v820_v14 = vsel %vm801_vm2, %v5453_v2, %v5499_v26 }
 0x1fd   : > { %1404 = vrot.lane.b32.xlu0 %v5758_v60, %s4695_s11  ;;  %9333 = vst [vmem:[#allocation116_spill] sm:$0xff] %v5782_v62  ;;  %9336 = vst [vmem:[#allocation119_spill] sm:$0xff] %v5809_v47  ;;  %v5847_v2 = vsel %vm724_vm7, %v820_v14, 0.0 }
 0x1fe   : > { %1838 = vrot.lane.b32.xlu1 %v861_v46, %s4697_s13  ;;  %9342 = vst [vmem:[#allocation125_spill] sm:$0xff] %v5847_v2 }
 0x1ff   : > { %v5771_v15 = vpop.permute.xlu1 %795  ;;  %v5773_v20 = vpop.permute.xlu0 %773 }
 0x200   : > { %9332 = vst [vmem:[#allocation115_spill] sm:$0xff] %v5773_v20  ;;  %v831_v13 = vsel %vm801_vm2, %v5771_v15, %v5336_v1 }
 0x201   : > { %v5786_v46 = vsel %vm721_vm11, %v831_v13, 0.0  ;;  %2165 = vrot.lane.b32.xlu0 %v5782_v62, %s4697_s13 }
 0x202   : > { %2151 = vrot.lane.b32.xlu1 %v5609_v54, %s4697_s13  ;;  %v1596_v1 = vmul.f32 %v5061_v42, %v5786_v46 }
 0x203   : > { %v5800_v7 = vpop.permute.xlu1 %940  ;;  %v5802_v13 = vpop.permute.xlu0 %918 }
 0x204   : > { %9334 = vst [vmem:[#allocation117_spill] sm:$0xff] %v5800_v7  ;;  %v5805_v60 = vadd.f32 %v1644_v0, %v1596_v1  ;;  %v976_v62 = vsel %vm946_vm5, %v5800_v7, %v5362_v39  ;;  %v956_v39 = vsel %vm946_vm5, %v5669_v5, %v5706_v34  ;;  %v814_v5 = vsel %vm801_vm2, %v5277_v63, %v5545_v40  ;;  %v2606_v34 = vld [vmem:[%s8858_s4 + $0x148] sm:$0xff] }
 0x205   : > { %1846 = vrot.lane.b32.xlu0 %v5809_v47, %s4697_s13  ;;  %v5825_v1 = vsel %vm736_vm13, %v976_v62, 0.0  ;;  %v5843_v62 = vsel %vm733_vm14, %v956_v39, 0.0  ;;  %v5866_v14 = vsel %vm725_vm15, %v814_v5, 0.0  ;;  %v2613_v5 = vld [vmem:[%s8858_s4 + $0x180] sm:$0xff] }
 0x206   : > { %9335 = vst [vmem:[#allocation118_spill] sm:$0xff] %v5805_v60  ;;  %1039 = vrot.lane.b32.xlu1 %v5651_v27, %s4695_s11  ;;  %9339 = vst [vmem:[#allocation122_spill] sm:$0xff] %v5825_v1  ;;  %v2598_v27 = vld [vmem:[%s8858_s4 + $0x108] sm:$0xff] }
 0x207   : > { %v5819_v53 = vpop.permute.xlu1 %934  ;;  %v5821_v45 = vpop.permute.xlu0 %926  ;;  %9341 = vst [vmem:[#allocation124_spill] sm:$0xff] %v5843_v62  ;;  %9344 = vst [vmem:[#allocation127_spill] sm:$0xff] %v5866_v14 }
 0x208   : > { %9337 = vst [vmem:[#allocation120_spill] sm:$0xff] %v5819_v53  ;;  %9338 = vst [vmem:[#allocation121_spill] sm:$0xff] %v5821_v45 }
 0x209   : > { %1406 = vrot.lane.b32.xlu0 %v5825_v1, %s4695_s11  ;;  %v973_v1 = vsel %vm946_vm5, %v5435_v56, %v5516_v19 }
 0x20a   : > { %1832 = vrot.lane.b32.xlu1 %v5681_v50, %s4697_s13  ;;  %v5907_v7 = vsel %vm729_vm6, %v973_v1, 0.0  ;;  %v2615_v1 = vld [vmem:[%s8858_s4 + $0x190] sm:$0xff] }
 0x20b   : > { %v798_v0 = vpop.permute.xlu1 %797  ;;  %v5839_v53 = vpop.permute.xlu0 %781  ;;  %9349 = vst [vmem:[#allocation132_spill] sm:$0xff] %v5907_v7 }
 0x20c   : > { %9340 = vst [vmem:[#allocation123_spill] sm:$0xff] %v5839_v53  ;;  %v832_v50 = vsel %vm801_vm2, %v798_v0, %v5426_v4  ;;  %v804_v63 = vsel %vm801_vm2, %v5754_v33, %v798_v0  ;;  %v2614_v0 = vld [vmem:[%s8858_s4 + $0x188] sm:$0xff]  ;;  %v2597_v33 = vld [vmem:[%s8858_s4 + $0x100] sm:$0xff] }
 0x20d   : > { %2167 = vrot.lane.b32.xlu0 %v5843_v62, %s4697_s13  ;;  %v5862_v39 = vsel %vm721_vm11, %v832_v50, 0.0  ;;  %v5881_v50 = vsel %vm728_vm12, %v804_v63, 0.0  ;;  %v4257_v63 = vpack.c.bf16 %v2614_v0, %v2613_v5  ;;  %v4259_v53 = vpack.c.bf16 %v2598_v27, %v2597_v33  ;;  %v2616_v5 = vld [vmem:[%s8858_s4 + $0x198] sm:$0xff]  ;;  %v2565_v0 = vld [vmem:[%s8858_s4] sm:$0xff] }
 0x20e   : > { %1055 = vrot.lane.b32.xlu1 %v5847_v2, %s4695_s11  ;;  %9343 = vst [vmem:[#allocation126_spill] sm:$0xff] %v5862_v39  ;;  %9347 = vst [vmem:[#allocation130_spill] sm:$0xff] %v5881_v50 }
 0x20f   : > { %v5875_v4 = vpop.permute.xlu0 %791  ;;  %v5877_v62 = vpop.permute.xlu1 %942  ;;  %4258 = vmatprep.subr.bf16.mxu1 %v4257_v63  ;;  %v4261_v63 = vpack.c.bf16 %v2616_v5, %v2615_v1  ;;  %v803_v1 = vsel %vm801_vm2, %v5621_v35, %v5771_v15  ;;  %v2617_v15 = vld [vmem:[%s8858_s4 + $0x1a0] sm:$0xff] }
 0x210   : > { %9345 = vst [vmem:[#allocation128_spill] sm:$0xff] %v5875_v4  ;;  %9346 = vst [vmem:[#allocation129_spill] sm:$0xff] %v5877_v62  ;;  %4260 = vmatpush3.bf16.msra.mxu1 %v4259_v53  ;;  %v2581_v53 = vld [vmem:[%s8858_s4 + $0x80] sm:$0xff] }
 0x211   : > { %1031 = vrot.lane.b32.xlu0 %v5862_v39, %s4695_s11  ;;  %4262 = vmatprep.subr.bf16.mxu1 %v4261_v63  ;;  %v2567_v63 = vld [vmem:[%s8858_s4 + $0x10] sm:$0xff] }
 0x212   : > { %1844 = vrot.lane.b32.xlu1 %v5866_v14, %s4697_s13 }
 0x213   : > { %v5903_v47 = vpop.permute.xlu0 %775 }
 0x214   : > { %9348 = vst [vmem:[#allocation131_spill] sm:$0xff] %v5903_v47 }
 0x215   : > { %1087 = vrot.lane.b32.xlu0 %v5881_v50, %s4695_s11  ;;  %v977_v50 = vsel %vm946_vm5, %v5877_v62, %v5435_v56  ;;  %v2585_v62 = vld [vmem:[%s8858_s4 + $0xa0] sm:$0xff] }
 0x216   : > { %2157 = vrot.lane.b32.xlu1 %v5573_v3, %s4697_s13  ;;  %v5913_v3 = vpop.permute.xlu1 %920  ;;  %v5921_v27 = vsel %vm736_vm13, %v977_v50, 0.0 }
 0x217   : > { %9350 = vst [vmem:[#allocation133_spill] sm:$0xff] %v5921_v27  ;;  %v5927_v33 = vpop.permute.xlu0 %928 }
 0x218   : > { %9351 = vst [vmem:[#allocation134_spill] sm:$0xff] %v5927_v33 }
 0x219   : > { %1352 = vrot.lane.b32.xlu0 %v5907_v7, %s4695_s11 }
 0x21a   : > { %1812 = vrot.lane.b32.xlu1 %v5687_v21, %s4697_s13  ;;  %v5929_v56 = vpop.permute.xlu1 %936  ;;  %v2582_v21 = vld [vmem:[%s8858_s4 + $0x88] sm:$0xff] }
 0x21b   : > { %9352 = vst [vmem:[#allocation135_spill] sm:$0xff] %v5929_v56  ;;  %v4225_v50 = vpack.c.bf16 %v2582_v21, %v2581_v53  ;;  %v2566_v56 = vld [vmem:[%s8858_s4 + $0x8] sm:$0xff] }
 0x21c   : > { %v4227_v53 = vpack.c.bf16 %v2566_v56, %v2565_v0  ;;  %v2584_v56 = vld [vmem:[%s8858_s4 + $0x98] sm:$0xff]  ;;  %v2618_v0 = vld [vmem:[%s8858_s4 + $0x1a8] sm:$0xff] }
 0x21d   : > { %1408 = vrot.lane.b32.xlu0 %v5921_v27, %s4695_s11  ;;  %v2599_v27 = vld [vmem:[%s8858_s4 + $0x110] sm:$0xff]  ;;  %4226 = vmatprep.subr.bf16.mxu0 %v4225_v50 }
 0x21e   : > { %1374 = vrot.lane.b32.xlu1 %v5691_v22, %s4695_s11  ;;  %v5965_v5 = vpop.permute.xlu1 %799  ;;  %4228 = vmatpush3.bf16.msra.mxu0 %v4227_v53  ;;  %v5991_v53 = vsel %vm728_vm12, %v803_v1, 0.0  ;;  %v965_v1 = vsel %vm946_vm5, %v5455_v17, %v5530_v25 }
 0x21f   : > { %9354 = vst [vmem:[#allocation137_spill] sm:$0xff] %v5991_v53  ;;  %v6040_v60 = vsel %vm731_vm8, %v965_v1, 0.0  ;;  %v829_v1 = vsel %vm801_vm2, %v5480_v28, %v5557_v44 }
 0x220   : > { %9357 = vst [vmem:[#allocation140_spill] sm:$0xff] %v6040_v60 }
 0x221   : > { %1840 = vrot.lane.b32.xlu0 %v5847_v2, %s4697_s13  ;;  %v5959_v2 = vpop.permute.xlu0 %783 }
 0x222   : > { %2159 = vrot.lane.b32.xlu1 %v5691_v22, %s4697_s13  ;;  %v2600_v22 = vld [vmem:[%s8858_s4 + $0x118] sm:$0xff]  ;;  %9353 = vst [vmem:[#allocation136_spill] sm:$0xff] %v5959_v2 }
 0x223   : > { %v4263_v21 = vpack.c.bf16 %v2600_v22, %v2599_v27  ;;  %v2583_v27 = vld [vmem:[%s8858_s4 + $0x90] sm:$0xff]  ;;  %v2568_v22 = vld [vmem:[%s8858_s4 + $0x18] sm:$0xff] }
 0x224   : > { %v4229_v50 = vpack.c.bf16 %v2584_v56, %v2583_v27  ;;  %v4231_v2 = vpack.c.bf16 %v2568_v22, %v2567_v63  ;;  %v2601_v27 = vld [vmem:[%s8858_s4 + $0x120] sm:$0xff]  ;;  %v2602_v56 = vld [vmem:[%s8858_s4 + $0x128] sm:$0xff]  ;;  %v2619_v63 = vld [vmem:[%s8858_s4 + $0x1b0] sm:$0xff] }
 0x225   : > { %1961 = vrot.lane.b32.xlu0 %v5097_v55, %s4697_s13  ;;  %4264 = vmatpush3.bf16.msra.mxu1 %v4263_v21  ;;  %v4265_v21 = vpack.c.bf16 %v2618_v0, %v2617_v15  ;;  %v4267_v15 = vpack.c.bf16 %v2602_v56, %v2601_v27  ;;  %v2586_v0 = vld [vmem:[%s8858_s4 + $0xa8] sm:$0xff]  ;;  %v6016_v22 = vpop.permute.xlu0 %1991  ;;  %v2569_v27 = vld [vmem:[%s8858_s4 + $0x20] sm:$0xff] }
 0x226   : > { %1029 = vrot.lane.b32.xlu1 %v5786_v46, %s4695_s11  ;;  %9355 = vst [vmem:[#allocation138_spill] sm:$0xff] %v6016_v22  ;;  %4230 = vmatprep.subr.bf16.mxu0 %v4229_v50  ;;  %v4233_v55 = vpack.c.bf16 %v2586_v0, %v2585_v62  ;;  %v2570_v56 = vld [vmem:[%s8858_s4 + $0x28] sm:$0xff]  ;;  %v2603_v62 = vld [vmem:[%s8858_s4 + $0x130] sm:$0xff]  ;;  %v2624_v22 = vld [vmem:[%s8858_s4 + $0x1d8] sm:$0xff] }
 0x227   : > { %4266 = vmatprep.subr.bf16.mxu1 %v4265_v21  ;;  %4232 = vmatpush3.bf16.msra.mxu0 %v4231_v2  ;;  %v4235_v50 = vpack.c.bf16 %v2570_v56, %v2569_v27  ;;  %v2604_v21 = vld [vmem:[%s8858_s4 + $0x138] sm:$0xff]  ;;  %v2587_v0 = vld [vmem:[%s8858_s4 + $0xb0] sm:$0xff] }
 0x228   : > { %4234 = vmatprep.subr.bf16.mxu0 %v4233_v55  ;;  %v4271_v2 = vpack.c.bf16 %v2604_v21, %v2603_v62  ;;  %v2571_v56 = vld [vmem:[%s8858_s4 + $0x30] sm:$0xff]  ;;  %v2572_v62 = vld [vmem:[%s8858_s4 + $0x38] sm:$0xff]  ;;  %v2605_v21 = vld [vmem:[%s8858_s4 + $0x140] sm:$0xff] }
 0x229   : > { %1993 = vrot.lane.b32.xlu0 %v5287_v29, %s4697_s13  ;;  %v2620_v29 = vld [vmem:[%s8858_s4 + $0x1b8] sm:$0xff]  ;;  %4268 = vmatpush3.bf16.msra.mxu1 %v4267_v15  ;;  %v2621_v15 = vld [vmem:[%s8858_s4 + $0x1c0] sm:$0xff]  ;;  %v6085_v32 = vpop.permute.xlu0 %1184 }
 0x22a   : > { %1085 = vrot.lane.b32.xlu1 %v5991_v53, %s4695_s11  ;;  %v6027_v53 = vpop.permute.xlu1 %944  ;;  %v4269_v35 = vpack.c.bf16 %v2620_v29, %v2619_v63  ;;  %v2588_v29 = vld [vmem:[%s8858_s4 + $0xb8] sm:$0xff]  ;;  %v2622_v63 = vld [vmem:[%s8858_s4 + $0x1c8] sm:$0xff]  ;;  %9359 = vst [vmem:[#allocation142_spill] sm:$0xff] %v6085_v32 }
 0x22b   : > { %9356 = vst [vmem:[#allocation139_spill] sm:$0xff] %v6027_v53  ;;  %v4237_v55 = vpack.c.bf16 %v2588_v29, %v2587_v0  ;;  %v4273_v27 = vpack.c.bf16 %v2622_v63, %v2621_v15  ;;  %4236 = vmatpush3.bf16.msra.mxu0 %v4235_v50  ;;  %v4239_v29 = vpack.c.bf16 %v2572_v62, %v2571_v56  ;;  %v2623_v63 = vld [vmem:[%s8858_s4 + $0x1d0] sm:$0xff]  ;;  %v6089_v50 = vsel %vm722_vm3, %v829_v1, 0.0  ;;  %v2573_v56 = vld [vmem:[%s8858_s4 + $0x40] sm:$0xff]  ;;  %v2574_v62 = vld [vmem:[%s8858_s4 + $0x48] sm:$0xff] }
 0x22c   : > { %4270 = vmatprep.subr.bf16.mxu1 %v4269_v35  ;;  %v4275_v15 = vpack.c.bf16 %v2606_v34, %v2605_v21  ;;  %v2590_v35 = vld [vmem:[%s8858_s4 + $0xc8] sm:$0xff]  ;;  %9360 = vst [vmem:[#allocation143_spill] sm:$0xff] %v6089_v50  ;;  %v2607_v21 = vld [vmem:[%s8858_s4 + $0x150] sm:$0xff]  ;;  %v969_v1 = vsel %vm946_vm5, %v5516_v19, %v5455_v17  ;;  %v2625_v17 = vld [vmem:[%s8858_s4 + $0x1e0] sm:$0xff]  ;;  %vm1091_vm3 = vcmp.lt.s32.totalorder %v5313_v57, 16 }
 0x22d   : > { %2153 = vrot.lane.b32.xlu0 %v6040_v60, %s4697_s13  ;;  %4272 = vmatpush3.bf16.msra.mxu1 %v4271_v2  ;;  %v4277_v2 = vpack.c.bf16 %v2624_v22, %v2623_v63  ;;  %v2608_v22 = vld [vmem:[%s8858_s4 + $0x158] sm:$0xff]  ;;  %v2626_v19 = vld [vmem:[%s8858_s4 + $0x1e8] sm:$0xff]  ;;  %v6132_v12 = vsel %vm730_vm9, %v969_v1, 0.0 }
 0x22e   : > { %1814 = vrot.lane.b32.xlu1 %v5786_v46, %s4697_s13  ;;  %v2589_v46 = vld [vmem:[%s8858_s4 + $0xc0] sm:$0xff]  ;;  %4238 = vmatprep.subr.bf16.mxu0 %v4237_v55  ;;  %v2591_v55 = vld [vmem:[%s8858_s4 + $0xd0] sm:$0xff]  ;;  %v4279_v63 = vpack.c.bf16 %v2608_v22, %v2607_v21  ;;  %9363 = vst [vmem:[#allocation146_spill] sm:$0xff] %v6132_v12  ;;  %v4281_v51 = vpack.c.bf16 %v2626_v19, %v2625_v17 }
 0x22f   : > { %4274 = vmatprep.subr.bf16.mxu1 %v4273_v27  ;;  %v4241_v34 = vpack.c.bf16 %v2590_v35, %v2589_v46  ;;  %v2592_v27 = vld [vmem:[%s8858_s4 + $0xd8] sm:$0xff]  ;;  %4240 = vmatpush3.bf16.msra.mxu0 %v4239_v29  ;;  %v4243_v35 = vpack.c.bf16 %v2574_v62, %v2573_v56  ;;  %v2610_v56 = vld [vmem:[%s8858_s4 + $0x168] sm:$0xff]  ;;  %v2627_v22 = vld [vmem:[%s8858_s4 + $0x1f0] sm:$0xff] }
 0x230   : > { %v6074_v0 = vpop.permute.xlu1 %2066  ;;  %v4245_v52 = vpack.c.bf16 %v2592_v27, %v2591_v55  ;;  %v2576_v29 = vld [vmem:[%s8858_s4 + $0x58] sm:$0xff]  ;;  %v2577_v27 = vld [vmem:[%s8858_s4 + $0x60] sm:$0xff] }
 0x231   : > { %9358 = vst [vmem:[#allocation141_spill] sm:$0xff] %v6074_v0  ;;  %1041 = vrot.lane.b32.xlu0 %v6089_v50, %s4695_s11  ;;  %4276 = vmatpush3.bf16.msra.mxu1 %v4275_v15  ;;  %v2575_v0 = vld [vmem:[%s8858_s4 + $0x50] sm:$0xff]  ;;  %v2609_v15 = vld [vmem:[%s8858_s4 + $0x160] sm:$0xff]  ;;  %v2628_v55 = vld [vmem:[%s8858_s4 + $0x1f8] sm:$0xff] }
 0x232   : > { %1200 = vrot.lane.b32.xlu1 %v5137_v18, %s4695_s11  ;;  %4242 = vmatprep.subr.bf16.mxu0 %v4241_v34  ;;  %v2593_v34 = vld [vmem:[%s8858_s4 + $0xe0] sm:$0xff]  ;;  %v4247_v21 = vpack.c.bf16 %v2576_v29, %v2575_v0  ;;  %v4283_v1 = vpack.c.bf16 %v2610_v56, %v2609_v15  ;;  %v2578_v0 = vld [vmem:[%s8858_s4 + $0x68] sm:$0xff]  ;;  %v816_v29 = vsel %vm801_vm2, %v5499_v26, %v5773_v20  ;;  %v2596_v15 = vld [vmem:[%s8858_s4 + $0xf8] sm:$0xff] }
 0x233   : > { %4278 = vmatprep.subr.bf16.mxu1 %v4277_v2  ;;  %v2594_v2 = vld [vmem:[%s8858_s4 + $0xe8] sm:$0xff]  ;;  %4244 = vmatpush3.bf16.msra.mxu0 %v4243_v35  ;;  %v2611_v35 = vld [vmem:[%s8858_s4 + $0x170] sm:$0xff]  ;;  %v4285_v26 = vpack.c.bf16 %v2628_v55, %v2627_v22 }
 0x234   : > { %v6123_v46 = vpop.permute.xlu1 %1176  ;;  %v6128_v32 = vpop.permute.xlu0 %1457  ;;  %4246 = vmatprep.subr.bf16.mxu0 %v4245_v52  ;;  %v4249_v19 = vpack.c.bf16 %v2594_v2, %v2593_v34  ;;  %v2595_v52 = vld [vmem:[%s8858_s4 + $0xf0] sm:$0xff] }
 0x235   : > { %9361 = vst [vmem:[#allocation144_spill] sm:$0xff] %v6123_v46  ;;  %9362 = vst [vmem:[#allocation145_spill] sm:$0xff] %v6128_v32  ;;  %1178 = vrot.lane.b32.xlu0 %v5129_v58, %s4695_s11  ;;  %4280 = vmatpush3.bf16.msra.mxu1 %v4279_v63  ;;  %v2612_v63 = vld [vmem:[%s8858_s4 + $0x178] sm:$0xff]  ;;  %v6203_v32 = vsel %vm725_vm15, %v816_v29, 0.0  ;;  %v2579_v22 = vld [vmem:[%s8858_s4 + $0x70] sm:$0xff] }
 0x236   : > { %1360 = vrot.lane.b32.xlu1 %v6132_v12, %s4695_s11  ;;  %4282 = vmatprep.subr.bf16.mxu1 %v4281_v51  ;;  %v961_v51 = vsel %vm946_vm5, %v5530_v25, %v5802_v13  ;;  %v4251_v25 = vpack.c.bf16 %v2578_v0, %v2577_v27  ;;  %v4287_v34 = vpack.c.bf16 %v2612_v63, %v2611_v35 }
 0x237   : > { %4248 = vmatpush3.bf16.msra.mxu0 %v4247_v21  ;;  %9369 = vst [vmem:[#allocation152_spill] sm:$0xff] %v6203_v32  ;;  %v2580_v21 = vld [vmem:[%s8858_s4 + $0x78] sm:$0xff]  ;;  %v833_v35 = vsel %vm801_vm2, %v5965_v5, %v5480_v28  ;;  %v805_v28 = vsel %vm801_vm2, %v5875_v4, %v5965_v5  ;;  %v821_v5 = vsel %vm801_vm2, %v5543_v43, %v5585_v41 }
 0x238   : > { %v6153_v62 = vpop.permute.xlu1 %1232  ;;  %v6164_v17 = vpop.permute.xlu0 %1969  ;;  %4250 = vmatprep.subr.bf16.mxu0 %v4249_v19  ;;  %v6241_v29 = vsel %vm721_vm11, %v833_v35, 0.0  ;;  %v9381_v35 = vld [vmem:[#allocation94_spill] sm:$0xff] }
 0x239   : > { %9364 = vst [vmem:[#allocation147_spill] sm:$0xff] %v6153_v62  ;;  %9365 = vst [vmem:[#allocation148_spill] sm:$0xff] %v6164_v17  ;;  %1234 = vrot.lane.b32.xlu0 %v5381_v59, %s4695_s11  ;;  %4284 = vmatpush3.bf16.msra.mxu1 %v4283_v1  ;;  %v6199_v59 = vsel %vm732_vm10, %v961_v51, 0.0  ;;  %v4255_v1 = vpack.c.bf16 %v2580_v21, %v2579_v22  ;;  %v957_v51 = vsel %vm946_vm5, %v5802_v13, %v5821_v45  ;;  %v9404_v45 = vld [vmem:[#allocation56_spill] sm:$0xff] }
 0x23a   : > { %1816 = vrot.lane.b32.xlu1 %v5862_v39, %s4697_s13  ;;  %9368 = vst [vmem:[#allocation151_spill] sm:$0xff] %v6199_v59  ;;  %v4253_v39 = vpack.c.bf16 %v2596_v15, %v2595_v52  ;;  %4286 = vmatprep.subr.bf16.mxu1 %v4285_v26  ;;  %9374 = vst [vmem:[#allocation157_spill] sm:$0xff] %v6241_v29  ;;  %v6261_v26 = vsel %vm733_vm14, %v957_v51, 0.0  ;;  %v6265_v13 = vsel %vm728_vm12, %v805_v28, 0.0  ;;  %v6281_v22 = vsel %vm724_vm7, %v821_v5, 0.0  ;;  %v9382_v28 = vld [vmem:[#allocation44_spill] sm:$0xff] }
 0x23b   : > { %4252 = vmatpush3.bf16.msra.mxu0 %v4251_v25  ;;  %9375 = vst [vmem:[#allocation158_spill] sm:$0xff] %v6261_v26  ;;  %9376 = vst [vmem:[#allocation159_spill] sm:$0xff] %v6265_v13  ;;  %v970_v51 = vsel %vm946_vm5, %v9381_v35, %v5518_v24 }
 0x23c   : > { %v6193_v56 = vpop.permute.xlu1 %1713  ;;  %v6195_v2 = vpop.permute.xlu0 %1192  ;;  %4254 = vmatprep.subr.bf16.mxu0 %v4253_v39  ;;  %9378 = vst [vmem:[#allocation161_spill] sm:$0xff] %v6281_v22  ;;  %v6305_v4 = vsel %vm730_vm9, %v970_v51, 0.0 }
 0x23d   : > { %9366 = vst [vmem:[#allocation149_spill] sm:$0xff] %v6193_v56  ;;  %9367 = vst [vmem:[#allocation150_spill] sm:$0xff] %v6195_v2  ;;  %1376 = vrot.lane.b32.xlu0 %v6199_v59, %s4695_s11  ;;  %4288 = vmatpush3.bf16.msra.mxu1 %v4287_v34  ;;  %v9401_v2 = vld [vmem:[#allocation96_spill] sm:$0xff] }
 0x23e   : > { %1848 = vrot.lane.b32.xlu1 %v6203_v32, %s4697_s13  ;;  %9383 = vst [vmem:[#allocation94_spill] sm:$0xff] %v6305_v4  ;;  %v9395_v32 = vld [vmem:[#allocation88_spill] sm:$0xff] }
 0x23f   : > { %4256 = vmatpush3.bf16.msra.mxu0 %v4255_v1 }
 0x240   : > { %v6215_v55 = vpop.permute.xlu0 %1820 }
 0x241   : > { %9370 = vst [vmem:[#allocation153_spill] sm:$0xff] %v6215_v55  ;;  %v6217_v27 = vpop.permute.xlu1 %2394  ;;  %1826 = vrot.lane.b32.xlu0 %v6089_v50, %s4697_s13 }
 0x242   : > { %9371 = vst [vmem:[#allocation154_spill] sm:$0xff] %v6217_v27  ;;  %1985 = vrot.lane.b32.xlu1 %v5137_v18, %s4697_s13  ;;  %v978_v18 = vsel %vm946_vm5, %v6027_v53, %v9395_v32  ;;  %v9407_v53 = vld [vmem:[#allocation86_spill] sm:$0xff]  ;;  %v9414_v27 = vld [vmem:[#allocation91_spill] sm:$0xff] }
 0x243   : > { %v6424_v20 = vsel %vm736_vm13, %v978_v18, 0.0  ;;  %v9412_v18 = vld [vmem:[#allocation5_spill] sm:$0xff] }
 0x244   : > { %v6223_v19 = vpop.permute.xlu0 %1043  ;;  %9410 = vst [vmem:[#allocation96_spill] sm:$0xff] %v6424_v20 }
 0x245   : > { %v6225_v0 = vpop.permute.xlu1 %1977  ;;  %1971 = vrot.lane.b32.xlu0 %v5181_v10, %s4697_s13 }
 0x246   : > { %9372 = vst [vmem:[#allocation155_spill] sm:$0xff] %v6225_v0  ;;  %2145 = vrot.lane.b32.xlu1 %v6132_v12, %s4697_s13  ;;  %v9405_v12 = vld [vmem:[#allocation9_spill] sm:$0xff]  ;;  %v9406_v0 = vld [vmem:[#allocation10_spill] sm:$0xff] }
 0x248   : > { %v6235_v39 = vpop.permute.xlu0 %1348 }
 0x249   : > { %v6237_v63 = vpop.permute.xlu1 %2242  ;;  %2137 = vrot.lane.b32.xlu0 %v5907_v7, %s4697_s13  ;;  %v9402_v7 = vld [vmem:[#allocation38_spill] sm:$0xff] }
 0x24a   : > { %9373 = vst [vmem:[#allocation156_spill] sm:$0xff] %v6237_v63  ;;  %1033 = vrot.lane.b32.xlu1 %v6241_v29, %s4695_s11  ;;  %v4607_v63 = vld [vmem:[%s8857_s3 + $0x10] sm:$0xff] }
 0x24c   : > { %v6255_v52 = vpop.permute.xlu0 %1836 }
 0x24d   : > { %v6257_v15 = vpop.permute.xlu1 %1035  ;;  %2169 = vrot.lane.b32.xlu0 %v6261_v26, %s4697_s13 }
 0x24e   : > { %1089 = vrot.lane.b32.xlu1 %v6265_v13, %s4695_s11 }
 0x250   : > { %v6275_v25 = vpop.permute.xlu0 %2149 }
 0x251   : > { %9377 = vst [vmem:[#allocation160_spill] sm:$0xff] %v6275_v25  ;;  %v6277_v34 = vpop.permute.xlu1 %1828  ;;  %1057 = vrot.lane.b32.xlu0 %v6281_v22, %s4695_s11 }
 0x252   : > { %1186 = vrot.lane.b32.xlu1 %v5181_v10, %s4695_s11  ;;  %v825_v10 = vsel %vm801_vm2, %v5557_v44, %v5543_v43  ;;  %v817_v43 = vsel %vm801_vm2, %v5585_v41, %v5903_v47  ;;  %v966_v47 = vsel %vm946_vm5, %v5518_v24, %v9401_v2 }
 0x253   : > { %v6322_v31 = vsel %vm723_vm4, %v825_v10, 0.0  ;;  %v6338_v51 = vsel %vm725_vm15, %v817_v43, 0.0  ;;  %v9389_v10 = vld [vmem:[#allocation34_spill] sm:$0xff]  ;;  %vm4701_vm15 = vmmov 0  }
 0x254   : > { %v6287_v21 = vpop.permute.xlu0 %2133  ;;  %9386 = vst [vmem:[#allocation166_spill] sm:$0xff] %v6322_v31  ;;  %9388 = vst [vmem:[#allocation168_spill] sm:$0xff] %v6338_v51 }
 0x255   : > { %9379 = vst [vmem:[#allocation162_spill] sm:$0xff] %v6287_v21  ;;  %v6289_v1 = vpop.permute.xlu1 %1051  ;;  %1202 = vrot.lane.b32.xlu0 %v9382_v28, %s4695_s11  ;;  %v9418_v21 = vld [vmem:[#allocation53_spill] sm:$0xff] }
 0x256   : > { %9380 = vst [vmem:[#allocation163_spill] sm:$0xff] %v6289_v1  ;;  %1368 = vrot.lane.b32.xlu1 %v6040_v60, %s4695_s11 }
 0x258   : > { %v6299_v5 = vpop.permute.xlu0 %1037 }
 0x259   : > { %v6301_v13 = vpop.permute.xlu1 %1356  ;;  %1362 = vrot.lane.b32.xlu0 %v6305_v4, %s4695_s11 }
 0x25a   : > { %2398 = vperm.xlu1 %4454, %v4607_v63  }
 0x25c   : > { %v6316_v56 = vpop.permute.xlu0 %2143 }
 0x25d   : > { %9384 = vst [vmem:[#allocation164_spill] sm:$0xff] %v6316_v56  ;;  %v6318_v50 = vpop.permute.xlu1 %2141  ;;  %1818 = vrot.lane.b32.xlu0 %v6241_v29, %s4697_s13 }
 0x25e   : > { %9385 = vst [vmem:[#allocation165_spill] sm:$0xff] %v6318_v50  ;;  %1834 = vrot.lane.b32.xlu1 %v6322_v31, %s4697_s13  ;;  %v2217_v48 = vsel %vm1876_vm1, %v6318_v50, %v6275_v25  ;;  %v9420_v25 = vld [vmem:[#allocation79_spill] sm:$0xff] }
 0x260   : > { %v6332_v44 = vpop.permute.xlu0 %1366 }
 0x261   : > { %9387 = vst [vmem:[#allocation167_spill] sm:$0xff] %v6332_v44  ;;  %v6334_v63 = vpop.permute.xlu1 %1364  ;;  %1850 = vrot.lane.b32.xlu0 %v6338_v51, %s4697_s13 }
 0x262   : > { %1979 = vrot.lane.b32.xlu1 %v9389_v10, %s4697_s13 }
 0x264   : > { %v6344_v41 = vpop.permute.xlu0 %2135 }
 0x265   : > { %9390 = vst [vmem:[#allocation169_spill] sm:$0xff] %v6344_v41  ;;  %v6346_v29 = vpop.permute.xlu1 %1822  ;;  %1987 = vrot.lane.b32.xlu0 %v9382_v28, %s4697_s13  ;;  %v974_v28 = vsel %vm946_vm5, %v9395_v32, %v9381_v35 }
 0x266   : > { %9391 = vst [vmem:[#allocation170_spill] sm:$0xff] %v6346_v29  ;;  %2161 = vrot.lane.b32.xlu1 %v6199_v59, %s4697_s13  ;;  %v6384_v35 = vsel %vm729_vm6, %v974_v28, 0.0  ;;  %v9403_v28 = vld [vmem:[#allocation65_spill] sm:$0xff] }
 0x267   : > { %9398 = vst [vmem:[#allocation175_spill] sm:$0xff] %v6384_v35  ;;  %v1260_v24 = vsel %vm1091_vm3, %v9404_v45, %v9403_v28 }
 0x268   : > { %v6352_v26 = vpop.permute.xlu0 %1824  ;;  %v1285_v61 = vmul.f32 %v9412_v18, %v1260_v24 }
 0x269   : > { %9392 = vst [vmem:[#allocation171_spill] sm:$0xff] %v6352_v26  ;;  %v6354_v43 = vpop.permute.xlu1 %1830  ;;  %2147 = vrot.lane.b32.xlu0 %v6305_v4, %s4697_s13  ;;  %v6420_v26 = vsel %vm731_vm8, %v966_v47, 0.0  ;;  %v1637_v47 = vmul.f32 %v5203_v6, %v9413_v8 }
 0x26a   : > { %9393 = vst [vmem:[#allocation172_spill] sm:$0xff] %v6354_v43  ;;  %1049 = vrot.lane.b32.xlu1 %v6322_v31, %s4695_s11  ;;  %v1897_v31 = vsel %vm1876_vm1, %v6215_v55, %v6277_v34  ;;  %v6446_v55 = vadd.s32 640, %v5313_v57 }
 0x26b   : > { %v1926_v17 = vmul.f32 %v9405_v12, %v1897_v31  ;;  %v1436_v31 = vsel %vm1091_vm3, %v6235_v39, %v6301_v13 }
 0x26c   : > { %v6360_v51 = vpop.permute.xlu0 %1047  ;;  %9417 = vst [vmem:[#allocation65_spill] sm:$0xff] %v6446_v55  ;;  %v1461_v50 = vmul.f32 %v9418_v21, %v1436_v31  ;;  %v9074_v31 = vand.u32 255, %v6446_v55 }
 0x26d   : > { %9394 = vst [vmem:[#allocation173_spill] sm:$0xff] %v6360_v51  ;;  %v6362_v60 = vpop.permute.xlu1 %1045  ;;  %1059 = vrot.lane.b32.xlu0 %v5866_v14, %s4695_s11  ;;  %v9399_v14 = vld [vmem:[#allocation57_spill] sm:$0xff]  ;;  %v9400_v51 = vld [vmem:[#allocation68_spill] sm:$0xff] }
 0x26e   : > { %1194 = vrot.lane.b32.xlu1 %v9389_v10, %s4695_s11  ;;  %v2041_v10 = vsel %vm1876_vm1, %v9400_v51, %v9399_v14  ;;  %9409 = vst [vmem:[#allocation68_spill] sm:$0xff] %v6420_v26 }
 0x26f   : > { %v2070_v32 = vmul.f32 %v9406_v0, %v2041_v10  ;;  %v9411_v10 = vld [vmem:[#allocation12_spill] sm:$0xff] }
 0x270   : > { %v6378_v4 = vpop.permute.xlu0 %1372  ;;  %v2246_v41 = vmul.f32 %v9411_v10, %v2217_v48  ;;  %v9416_v48 = vld [vmem:[#allocation28_spill] sm:$0xff] }
 0x271   : > { %9396 = vst [vmem:[#allocation88_spill] sm:$0xff] %v6378_v4  ;;  %v6380_v59 = vpop.permute.xlu1 %1053  ;;  %1204 = vrot.lane.b32.xlu0 %v9402_v7, %s4695_s11  ;;  %v1589_v7 = vmul.f32 %v4961_v16, %v9407_v53  ;;  %v2102_v43 = vadd.f32 %v2070_v32, %v1926_v17  ;;  %v9422_v32 = vld [vmem:[#allocation69_spill] sm:$0xff] }
 0x272   : > { %9397 = vst [vmem:[#allocation174_spill] sm:$0xff] %v6380_v59  ;;  %1354 = vrot.lane.b32.xlu1 %v6384_v35, %s4695_s11 }
 0x273   : > { %v1669_v59 = vadd.f32 %v1637_v47, %v1589_v7  ;;  %v2278_v24 = vadd.f32 %v2246_v41, %v2102_v43  ;;  %v9424_v7 = vmov 0  ;;  %v9428_v43 = vld [vmem:[#allocation87_spill] sm:$0xff] }
 0x274   : > { %v6414_v62 = vpop.permute.xlu0 %1027  ;;  %v1590_v8 = vmul.f32 %v4961_v16, %v9428_v43  ;;  %v9430_v47 = vld [vmem:[#allocation7_spill] sm:$0xff]  ;;  %v9433_v16 = vld [vmem:[#allocation14_spill] sm:$0xff] }
 0x275   : > { %v6416_v46 = vpop.permute.xlu1 %1350  ;;  %v1116_v53 = vsel %vm1091_vm3, %v6414_v62, %v6257_v15  ;;  %1370 = vrot.lane.b32.xlu0 %v6420_v26, %s4695_s11 }
 0x276   : > { %9408 = vst [vmem:[#allocation57_spill] sm:$0xff] %v6416_v46  ;;  %1410 = vrot.lane.b32.xlu1 %v6424_v20, %s4695_s11  ;;  %v9415_v46 = vld [vmem:[#allocation11_spill] sm:$0xff]  ;;  %v1141_v29 = vmul.f32 %v9416_v48, %v1116_v53  ;;  %v9423_v53 = vand.u32 255, %v9422_v32  ;;  %v1638_v32 = vmul.f32 %v5203_v6, %v9430_v47  ;;  %v9435_v47 = vld [vmem:[#allocation72_spill] sm:$0xff] }
 0x277   : > { %v1717_v56 = vmul.f32 %v9415_v46, %v9414_v27  ;;  %v6457_v27 = vadd.s32 768, %v5313_v57  ;;  %v9439_v6 = vld [vmem:[#allocation67_spill] sm:$0xff] }
 0x278   : > { %v1317_v10 = vadd.f32 %v1285_v61, %v1141_v29  ;;  %v6449_v44 = vpop.permute.xlu0 %1083  ;;  %vm6461_vm4 = vcmp.lt.s32.totalorder %v9423_v53, 240  ;;  %v9431_v53 = vld [vmem:[#allocation90_spill] sm:$0xff] }
 0x279   : > { %9419 = vst [vmem:[#allocation56_spill] sm:$0xff] %v6449_v44  ;;  %v6451_v20 = vpop.permute.xlu1 %1358  ;;  %2402 = vperm.xlu0 %4455, %v9420_v25   ;;  %9421 = vst [vmem:[#allocation86_spill] sm:$0xff] %v6457_v27  ;;  %v1749_v17 = vadd.f32 %v1717_v56, %v1669_v59  ;;  %v9425_v7 = vsel %vm6461_vm4, 4294967295, %v9424_v7  ;;  %v2326_v59 = vsel %vm6461_vm4, %v2278_v24, 0.0  ;;  %v9429_v56 = vld [vmem:[#allocation46_spill] sm:$0xff] }
 0x27a   : > { %1842 = vrot.lane.b32.xlu1 %v6281_v22, %s4697_s13  ;;  %9426 = vst [vmem:[#allocation8_spill] sm:$0xff] %v9425_v7  ;;  %v1493_v29 = vadd.f32 %v1461_v50, %v1317_v10  ;;  %v9080_v50 = vand.u32 255, %v6457_v27  ;;  %v9434_v7 = vld [vmem:[#allocation13_spill] sm:$0xff]  ;;  %v9440_v27 = vld [vmem:[#allocation62_spill] sm:$0xff] }
 0x27c   : > { %v6466_v61 = vpop.permute.xlu0 %1404  ;;  %v1781_v25 = vadd.f32 %v1749_v17, %v1493_v29  ;;  %v6483_v17 = vand.u32 15, %v9074_v31  ;;  %v1718_v29 = vmul.f32 %v9415_v46, %v9431_v53  ;;  %v6504_v53 = vand.u32 15, %v9080_v50  ;;  %v9438_v31 = vld [vmem:[#allocation101_spill] sm:$0xff] }
 0x27d   : > { %9427 = vst [vmem:[#allocation91_spill] sm:$0xff] %v6466_v61  ;;  %v6468_v41 = vpop.permute.xlu1 %1838  ;;  %1997 = vrot.lane.b32.xlu0 %v9429_v56, %s4697_s13  ;;  %v2037_v50 = vsel %vm1876_vm1, %v9399_v14, %v9439_v6 }
 0x27e   : > { %1963 = vrot.lane.b32.xlu1 %v5129_v58, %s4697_s13  ;;  %v2358_v10 = vadd.f32 %v2326_v59, %v1781_v25  ;;  %v1670_v58 = vadd.f32 %v1638_v32, %v1590_v8  ;;  %v1646_v25 = vmul.f32 %v5077_v49, %v9434_v7  ;;  %v958_v59 = vsel %vm946_vm5, %v5913_v3, %v5927_v33  ;;  %v9437_v8 = vld [vmem:[#allocation61_spill] sm:$0xff] }
 0x27f   : > { %v1256_v32 = vsel %vm1091_vm3, %v9403_v28, %v9437_v8  ;;  %v1598_v49 = vmul.f32 %v5061_v42, %v9438_v31  ;;  %vm726_vm6 = vcmp.ge.s32.totalorder %v6483_v17, 1  ;;  %v9442_v28 = vld [vmem:[#allocation89_spill] sm:$0xff]  ;;  %v6541_v14 = vsel %vm733_vm14, %v958_v59, 0.0 }
 0x280   : > { %v6487_v24 = vpop.permute.xlu0 %2165  ;;  %v2406_v22 = vadd.f32 %v9433_v16, %v2358_v10  ;;  %v9436_v10 = vld [vmem:[#allocation64_spill] sm:$0xff]  ;;  %v6531_v31 = vmul.f32 %v9415_v46, %v9442_v28  ;;  %9445 = vst [vmem:[#allocation7_spill] sm:$0xff] %v6541_v14  ;;  %vm727_vm7 = vcmp.ge.s32.totalorder %v6504_v53, 1  ;;  %v6558_v36 = vmul.f32 %v9406_v0, %v2037_v50 }
 0x281   : > { %9432 = vst [vmem:[#allocation79_spill] sm:$0xff] %v6487_v24  ;;  %v6489_v43 = vpop.permute.xlu1 %2151  ;;  %2139 = vrot.lane.b32.xlu0 %v6384_v35, %s4697_s13  ;;  %v1252_v7 = vsel %vm1091_vm3, %v9437_v8, %v9436_v10  ;;  %v2045_v10 = vsel %vm1876_vm1, %v9440_v27, %v9400_v51  ;;  %v1286_v51 = vmul.f32 %v9412_v18, %v1256_v32  ;;  %v9446_v27 = vld [vmem:[#allocation95_spill] sm:$0xff]  ;;  %v9449_v32 = vld [vmem:[#allocation80_spill] sm:$0xff]  ;;  %vm735_vm8 = vcmp.le.s32.totalorder %v6504_v53, 14 }
 0x282   : > { %1995 = vrot.lane.b32.xlu1 %v9435_v47, %s4697_s13  ;;  %v6516_v55 = vmul.f32 0.5, %v2406_v22  ;;  %v9441_v47 = vld [vmem:[#allocation20_spill] sm:$0xff]  ;;  %v6533_v22 = vadd.f32 %v1718_v29, %v1670_v58  ;;  %v810_v58 = vsel %vm801_vm2, %v5545_v40, %v9446_v27  ;;  %v6561_v29 = vmul.f32 %v9406_v0, %v2045_v10  ;;  %v9448_v40 = vld [vmem:[#allocation73_spill] sm:$0xff] }
 0x283   : > { %v1725_v35 = vmul.f32 %v9441_v47, %v5593_v11  ;;  %v6545_v11 = vmul.f32 %v9412_v18, %v1252_v7  ;;  %v6565_v59 = vmul.f32 %v9441_v47, %v5629_v9  ;;  %v1678_v7 = vadd.f32 %v1646_v25, %v1598_v49  ;;  %v9450_v46 = vld [vmem:[#allocation76_spill] sm:$0xff]  ;;  %v9452_v49 = vld [vmem:[#allocation77_spill] sm:$0xff]  ;;  %v9454_v25 = vld [vmem:[#allocation71_spill] sm:$0xff] }
 0x284   : > { %v6535_v8 = vpop.permute.xlu0 %1846  ;;  %4531 = vtanh.f32 %v6516_v55  ;;  %v1257_v28 = vsel %vm1091_vm3, %v9449_v32, %v9448_v40  ;;  %v1726_v50 = vmul.f32 %v9441_v47, %v5609_v54  ;;  %v1112_v10 = vsel %vm1091_vm3, %v6257_v15, %v6223_v19  ;;  %v9457_v54 = vld [vmem:[#allocation83_spill] sm:$0xff] }
 0x285   : > { %9443 = vst [vmem:[#allocation69_spill] sm:$0xff] %v6535_v8  ;;  %v6537_v42 = vpop.permute.xlu1 %1039  ;;  %2171 = vrot.lane.b32.xlu0 %v6541_v14, %s4697_s13  ;;  %9447 = vst [vmem:[#allocation90_spill] sm:$0xff] %v6565_v59  ;;  %v6585_v9 = vsel %vm1091_vm3, %v9452_v49, %v9449_v32  ;;  %v9455_v14 = vld [vmem:[#allocation81_spill] sm:$0xff]  ;;  %v6603_v33 = vsel %vm726_vm6, %v810_v58, 0.0  ;;  %v9461_v32 = vld [vmem:[#allocation84_spill] sm:$0xff]  ;;  %vm734_vm9 = vcmp.le.s32.totalorder %v6483_v17, 14 }
 0x286   : > { %9444 = vst [vmem:[#allocation87_spill] sm:$0xff] %v6537_v42  ;;  %2155 = vrot.lane.b32.xlu1 %v6420_v26, %s4697_s13  ;;  %v6572_v26 = vadd.f32 %v1725_v35, %v9450_v46  ;;  %9453 = vst [vmem:[#allocation61_spill] sm:$0xff] %v6585_v9  ;;  %v6591_v46 = vsel %vm1876_vm1, %v9455_v14, %v9454_v25  ;;  %v1253_v35 = vsel %vm1091_vm3, %v9448_v40, %v9457_v54  ;;  %v9462_v59 = vld [vmem:[#allocation98_spill] sm:$0xff]  ;;  %v9463_v54 = vld [vmem:[#allocation37_spill] sm:$0xff] }
 0x287   : > { %9456 = vst [vmem:[#allocation101_spill] sm:$0xff] %v6591_v46  ;;  %9460 = vst [vmem:[#allocation95_spill] sm:$0xff] %v6603_v33  ;;  %v2038_v42 = vsel %vm1876_vm1, %v9454_v25, %v9461_v32  ;;  %v1432_v40 = vsel %vm1091_vm3, %v6301_v13, %v6334_v63  ;;  %v9464_v58 = vld [vmem:[#allocation78_spill] sm:$0xff]  ;;  %v806_v13 = vsel %vm801_vm2, %v9446_v27, %v5532_v37  ;;  %v9466_v49 = vld [vmem:[#allocation36_spill] sm:$0xff] }
 0x288   : > { %9451 = vst [vmem:[#allocation13_spill] sm:$0xff] %v6572_v26  ;;  %v6597_v15 = vpop.permute.xlu0 %1406  ;;  %v951_v26 = vsel %vm946_vm5, %v5719_v23, %v9462_v59  ;;  %v6626_v25 = vsel %vm1876_vm1, %v9464_v58, %v9455_v14  ;;  %v9465_v23 = vld [vmem:[#allocation92_spill] sm:$0xff]  ;;  %v6638_v9 = vmul.f32 %v9466_v49, %v1257_v28  ;;  %v6641_v46 = vmul.f32 %v9466_v49, %v1253_v35  ;;  %v9467_v58 = vld [vmem:[#allocation21_spill] sm:$0xff]  ;;  %v9472_v35 = vld [vmem:[#allocation107_spill] sm:$0xff] }
 0x289   : > { %9458 = vst [vmem:[#allocation67_spill] sm:$0xff] %v6597_v15  ;;  %v6599_v47 = vpop.permute.xlu1 %1832  ;;  %1220 = vrot.lane.b32.xlu0 %v9463_v54, %s4695_s11  ;;  %v1142_v15 = vmul.f32 %v9416_v48, %v1112_v10  ;;  %v6643_v14 = vadd.f32 %v1726_v50, %v1678_v7  ;;  %v962_v37 = vsel %vm946_vm5, %v9401_v2, %v5913_v3  ;;  %v6663_v7 = vsel %vm734_vm9, %v951_v26, 0.0 }
 0x28a   : > { %9459 = vst [vmem:[#allocation89_spill] sm:$0xff] %v6599_v47  ;;  %1067 = vrot.lane.b32.xlu1 %v6603_v33, %s4695_s11  ;;  %v2033_v47 = vsel %vm1876_vm1, %v9439_v6, %v9465_v23  ;;  %v1108_v6 = vsel %vm1091_vm3, %v6223_v19, %v6289_v1  ;;  %v6650_v23 = vmul.f32 %v9467_v58, %v2038_v42  ;;  %9470 = vst [vmem:[#allocation76_spill] sm:$0xff] %v6663_v7  ;;  %v9505_v1 = vld [vmem:[#allocation24_spill] sm:$0xff] }
 0x28b   : > { %v1462_v27 = vmul.f32 %v9418_v21, %v1432_v40  ;;  %v2072_v19 = vmul.f32 %v9406_v0, %v2033_v47  ;;  %v1893_v42 = vsel %vm1876_vm1, %v6277_v34, %v6255_v52  ;;  %v1428_v3 = vsel %vm1091_vm3, %v6334_v63, %v6378_v4  ;;  %v9473_v40 = vld [vmem:[#allocation99_spill] sm:$0xff]  ;;  %v9474_v0 = vld [vmem:[#allocation109_spill] sm:$0xff] }
 0x28c   : > { %v6657_v28 = vpop.permute.xlu0 %2167  ;;  %v6680_v2 = vsel %vm727_vm7, %v806_v13, 0.0  ;;  %v947_v34 = vsel %vm946_vm5, %v9462_v59, %v5704_v38  ;;  %v1318_v47 = vadd.f32 %v1286_v51, %v1142_v15  ;;  %v1143_v50 = vmul.f32 %v9416_v48, %v1108_v6 }
 0x28d   : > { %9468 = vst [vmem:[#allocation73_spill] sm:$0xff] %v6657_v28  ;;  %v6659_v10 = vpop.permute.xlu1 %1055  ;;  %1388 = vrot.lane.b32.xlu0 %v6663_v7, %s4695_s11  ;;  %9471 = vst [vmem:[#allocation71_spill] sm:$0xff] %v6680_v2  ;;  %v1120_v63 = vsel %vm1091_vm3, %v6449_v44, %v6414_v62  ;;  %v811_v13 = vsel %vm801_vm2, %v9473_v40, %v9472_v35  ;;  %v1264_v4 = vsel %vm1091_vm3, %v9474_v0, %v9404_v45  ;;  %v9477_v45 = vld [vmem:[#allocation82_spill] sm:$0xff] }
 0x28e   : > { %9469 = vst [vmem:[#allocation80_spill] sm:$0xff] %v6659_v10  ;;  %1212 = vrot.lane.b32.xlu1 %v9429_v56, %s4695_s11  ;;  %v4532_v26 = vpop.eup %4531  ;;  %v6701_v38 = vsel %vm732_vm10, %v962_v37, 0.0  ;;  %v1927_v59 = vmul.f32 %v9405_v12, %v1893_v42  ;;  %v1494_v15 = vadd.f32 %v1462_v27, %v1318_v47  ;;  %v1463_v62 = vmul.f32 %v9418_v21, %v1428_v3  ;;  %v9481_v42 = vld [vmem:[#allocation54_spill] sm:$0xff] }
 0x28f   : > { %9475 = vst [vmem:[#allocation81_spill] sm:$0xff] %v6701_v38  ;;  %v2502_v51 = vadd.f32 1.0, %v4532_v26  ;;  %v1440_v6 = vsel %vm1091_vm3, %v6466_v61, %v6235_v39  ;;  %v9478_v0 = vand.u32 255, %v9477_v45  ;;  %v1140_v37 = vmul.f32 %v9416_v48, %v1120_v63  ;;  %v9667_v61 = vld [vmem:[#allocation41_spill] sm:$0xff] }
 0x290   : > { %v6709_v40 = vpop.permute.xlu0 %1031  ;;  %v1319_v26 = vadd.f32 %v6545_v11, %v1143_v50  ;;  %v6737_v63 = vsel %vm735_vm8, %v947_v34, 0.0  ;;  %v9485_v45 = vand.u32 255, %v5313_v57  ;;  %v2103_v11 = vadd.f32 %v6558_v36, %v1927_v59  ;;  %v9495_v59 = vld [vmem:[#allocation160_spill] sm:$0xff] }
 0x291   : > { %v6711_v44 = vpop.permute.xlu1 %1844  ;;  %vm6715_vm11 = vcmp.ge.s32.totalorder %v9478_v0, 16  ;;  %2013 = vrot.lane.b32.xlu0 %v9481_v42, %s4697_s13  ;;  %v6729_v39 = vmul.f32 %v2502_v51, %v6516_v55  ;;  %v9483_v0 = vld [vmem:[#allocation105_spill] sm:$0xff]  ;;  %9484 = vst [vmem:[#allocation107_spill] sm:$0xff] %v6737_v63  ;;  %v1460_v55 = vmul.f32 %v9418_v21, %v1440_v6  ;;  %v9492_v6 = vmov 0 }
 0x292   : > { %9476 = vst [vmem:[#allocation84_spill] sm:$0xff] %v6711_v44  ;;  %v1889_v27 = vsel %vm1876_vm1, %v6255_v52, %v6711_v44  ;;  %1378 = vrot.lane.b32.xlu1 %v6701_v38, %s4695_s11  ;;  %v1748_v3 = vadd.f32 %v6531_v31, %v9483_v0  ;;  %v1284_v52 = vmul.f32 %v9412_v18, %v1264_v4  ;;  %vm6742_vm10 = vcmp.ge.s32.totalorder %v9485_v45, 16  ;;  %v9490_v51 = vld [vmem:[#allocation85_spill] sm:$0xff]  ;;  %v9501_v44 = vld [vmem:[#allocation15_spill] sm:$0xff] }
 0x293   : > { %9482 = vst [vmem:[#allocation98_spill] sm:$0xff] %v6729_v39  ;;  %v1928_v47 = vmul.f32 %v9405_v12, %v1889_v27  ;;  %2757 = vmatprep.mubr.f32.mxu0 %v6729_v39  ;;  %v6750_v31 = vsel %vm726_vm6, %v811_v13, 0.0  ;;  %v1113_v4 = vsel %vm1091_vm3, %v6299_v5, %v6362_v60  ;;  %v1495_v34 = vadd.f32 %v1463_v62, %v1319_v26  ;;  %v9496_v26 = vld [vmem:[#allocation167_spill] sm:$0xff]  ;;  %v9498_v39 = vld [vmem:[#allocation138_spill] sm:$0xff] }
 0x294   : > { %9488 = vst [vmem:[#allocation99_spill] sm:$0xff] %v6750_v31  ;;  %v6757_v50 = vpop.permute.xlu0 %1087  ;;  %v9491_v27 = vand.u32 255, %v9490_v51  ;;  %v1542_v13 = vsel %vm6715_vm11, %v1494_v15, 0.0  ;;  %v1316_v45 = vadd.f32 %v1284_v52, %v1140_v37  ;;  %v1433_v15 = vsel %vm1091_vm3, %v6451_v20, %v9496_v26  ;;  %v9497_v52 = vld [vmem:[#allocation12_spill] sm:$0xff] }
 0x295   : > { %9489 = vst [vmem:[#allocation82_spill] sm:$0xff] %v6757_v50  ;;  %v2158_v0 = vpop.permute.xlu1 %2157  ;;  %2181 = vrot.lane.b32.xlu0 %v6737_v63, %s4697_s13  ;;  %v2104_v37 = vadd.f32 %v2072_v19, %v1928_v47  ;;  %v1782_v48 = vadd.f32 %v6533_v22, %v1542_v13  ;;  %v9502_v19 = vld [vmem:[#allocation174_spill] sm:$0xff] }
 0x296   : > { %vm6761_vm12 = vcmp.lt.s32.totalorder %v9491_v27, 240  ;;  %v2209_v36 = vsel %vm1876_vm1, %v2158_v0, %v6487_v24  ;;  %v2213_v62 = vsel %vm1876_vm1, %v9495_v59, %v2158_v0  ;;  %1852 = vrot.lane.b32.xlu1 %v6603_v33, %s4697_s13  ;;  %v2034_v0 = vsel %vm1876_vm1, %v9461_v32, %v9498_v39  ;;  %v9499_v59 = vld [vmem:[#allocation165_spill] sm:$0xff]  ;;  %v9500_v24 = vld [vmem:[#allocation162_spill] sm:$0xff] }
 0x297   : > { %v9493_v6 = vsel %vm6761_vm12, 4294967295, %v9492_v6  ;;  %v2247_v51 = vmul.f32 %v9497_v52, %v2213_v62  ;;  %v2248_v27 = vmul.f32 %v9497_v52, %v2209_v36  ;;  %v2221_v21 = vsel %vm1876_vm1, %v9500_v24, %v9499_v59  ;;  %v9504_v39 = vld [vmem:[#allocation93_spill] sm:$0xff] }
 0x298   : > { %9494 = vst [vmem:[#allocation105_spill] sm:$0xff] %v9493_v6  ;;  %v1150_v33 = vmul.f32 %v9501_v44, %v1113_v4  ;;  %v1492_v56 = vadd.f32 %v1460_v55, %v1316_v45  ;;  %v1109_v47 = vsel %vm1091_vm3, %v6362_v60, %v9502_v19  ;;  %v6797_v42 = vpop.permute.xlu0 %1352  ;;  %v1783_v18 = vadd.f32 %v9504_v39, %v1495_v34  ;;  %v9506_v24 = vld [vmem:[#allocation153_spill] sm:$0xff]  ;;  %v9507_v45 = vld [vmem:[#allocation172_spill] sm:$0xff]  ;;  %v9573_v19 = vld [vmem:[#allocation147_spill] sm:$0xff] }
 0x299   : > { %v2279_v36 = vadd.f32 %v2247_v51, %v2103_v11  ;;  %v2280_v62 = vadd.f32 %v2248_v27, %v2104_v37  ;;  %v6799_v32 = vpop.permute.xlu1 %1812  ;;  %v1470_v59 = vmul.f32 %v9505_v1, %v1433_v15  ;;  %1069 = vrot.lane.b32.xlu0 %v6750_v31, %s4695_s11  ;;  %v2245_v60 = vmul.f32 %v9497_v52, %v2221_v21  ;;  %v9510_v51 = vld [vmem:[#allocation55_spill] sm:$0xff] }
 0x29a   : > { %9503 = vst [vmem:[#allocation85_spill] sm:$0xff] %v6799_v32  ;;  %v1901_v22 = vsel %vm1876_vm1, %v6799_v32, %v9506_v24  ;;  %1860 = vrot.lane.b32.xlu1 %v6680_v2, %s4697_s13  ;;  %v1326_v4 = vadd.f32 %v6638_v9, %v1150_v33  ;;  %v1151_v34 = vmul.f32 %v9501_v44, %v1109_v47  ;;  %v1540_v24 = vsel %vm6742_vm10, %v1492_v56, 0.0 }
 0x29b   : > { %v2328_v55 = vsel %vm6761_vm12, %v2280_v62, 0.0  ;;  %v2359_v11 = vadd.f32 %v2279_v36, %v1782_v48  ;;  %v1925_v39 = vmul.f32 %v9405_v12, %v1901_v22  ;;  %v1894_v15 = vsel %vm1876_vm1, %v9507_v45, %v6468_v41  ;;  %v9511_v62 = vld [vmem:[#allocation170_spill] sm:$0xff] }
 0x29c   : > { %v2360_v13 = vadd.f32 %v2328_v55, %v1783_v18  ;;  %v1890_v21 = vsel %vm1876_vm1, %v6468_v41, %v6535_v8  ;;  %v6829_v9 = vpop.permute.xlu0 %1408  ;;  %v1502_v56 = vadd.f32 %v1470_v59, %v1326_v4  ;;  %v1780_v27 = vadd.f32 %v1748_v3, %v1540_v24 }
 0x29d   : > { %v2407_v48 = vadd.f32 %v9433_v16, %v2359_v11  ;;  %v2101_v33 = vadd.f32 %v6561_v29, %v1925_v39  ;;  %9508 = vst [vmem:[#allocation160_spill] sm:$0xff] %v6829_v9  ;;  %v6831_v37 = vpop.permute.xlu1 %1374  ;;  %1214 = vrot.lane.b32.xlu0 %v9510_v51, %s4695_s11  ;;  %v1898_v59 = vsel %vm1876_vm1, %v9511_v62, %v9507_v45 }
 0x29e   : > { %9509 = vst [vmem:[#allocation167_spill] sm:$0xff] %v6831_v37  ;;  %v1429_v18 = vsel %vm1091_vm3, %v9496_v26, %v6831_v37  ;;  %2005 = vrot.lane.b32.xlu1 %v9463_v54, %s4697_s13  ;;  %v2408_v41 = vadd.f32 %v9433_v16, %v2360_v13  ;;  %v9512_v26 = vld [vmem:[#allocation16_spill] sm:$0xff]  ;;  %v2080_v39 = vmul.f32 %v9467_v58, %v2034_v0  ;;  %v1550_v13 = vsel %vm6715_vm11, %v1502_v56, 0.0 }
 0x29f   : > { %v6842_v29 = vmul.f32 0.5, %v2407_v48  ;;  %v2277_v47 = vadd.f32 %v2245_v60, %v2101_v33  ;;  %v1471_v36 = vmul.f32 %v9505_v1, %v1429_v18  ;;  %v1935_v22 = vmul.f32 %v9512_v26, %v1894_v15  ;;  %v9513_v0 = vld [vmem:[#allocation164_spill] sm:$0xff]  ;;  %v9514_v18 = vld [vmem:[#allocation27_spill] sm:$0xff] }
 0x2a0   : > { %v1936_v55 = vmul.f32 %v9512_v26, %v1890_v21  ;;  %v6851_v11 = vmul.f32 0.5, %v2408_v41  ;;  %v1327_v3 = vadd.f32 %v6641_v46, %v1151_v34  ;;  %v6856_v4 = vpop.permute.xlu0 %1840  ;;  %v1934_v46 = vmul.f32 %v9512_v26, %v1898_v59  ;;  %v9516_v59 = vld [vmem:[#allocation57_spill] sm:$0xff] }
 0x2a1   : > { %4533 = vtanh.f32 %v6842_v29  ;;  %v2357_v60 = vadd.f32 %v2277_v47, %v1780_v27  ;;  %v2160_v24 = vpop.permute.xlu1 %2159  ;;  %1854 = vrot.lane.b32.xlu0 %v6750_v31, %s4697_s13  ;;  %v2218_v34 = vsel %vm1876_vm1, %v9513_v0, %v6489_v43  ;;  %v2111_v33 = vadd.f32 %v6650_v23, %v1935_v22  ;;  %v9515_v47 = vld [vmem:[#allocation101_spill] sm:$0xff] }
 0x2a2   : > { %v2210_v45 = vsel %vm1876_vm1, %v2160_v24, %v6657_v28  ;;  %v2214_v15 = vsel %vm1876_vm1, %v6489_v43, %v2160_v24  ;;  %2163 = vrot.lane.b32.xlu1 %v6701_v38, %s4697_s13  ;;  %4535 = vtanh.f32 %v6851_v11  ;;  %v1503_v48 = vadd.f32 %v1471_v36, %v1327_v3 }
 0x2a3   : > { %v2405_v21 = vadd.f32 %v9433_v16, %v2357_v60  ;;  %v2112_v56 = vadd.f32 %v2080_v39, %v1936_v55  ;;  %v2255_v41 = vmul.f32 %v9514_v18, %v2214_v15  ;;  %v2256_v27 = vmul.f32 %v9514_v18, %v2210_v45  ;;  %v9518_v60 = vld [vmem:[#allocation61_spill] sm:$0xff]  ;;  %v9575_v16 = vld [vmem:[#allocation148_spill] sm:$0xff] }
 0x2a4   : > { %v2078_v24 = vmul.f32 %v9467_v58, %v9515_v47  ;;  %v1437_v28 = vsel %vm1091_vm3, %v9516_v59, %v6451_v20  ;;  %v1790_v43 = vadd.f32 %v6643_v14, %v1550_v13  ;;  %v6889_v36 = vpop.permute.xlu0 %1961  ;;  %v2254_v22 = vmul.f32 %v9514_v18, %v2218_v34  ;;  %v9519_v14 = vld [vmem:[#allocation106_spill] sm:$0xff]  ;;  %v9520_v15 = vld [vmem:[#allocation77_spill] sm:$0xff] }
 0x2a5   : > { %v6887_v31 = vmul.f32 0.5, %v2405_v21  ;;  %9517 = vst [vmem:[#allocation165_spill] sm:$0xff] %v6889_v36  ;;  %v1030_v23 = vpop.permute.xlu1 %1029  ;;  %v2287_v55 = vadd.f32 %v2255_v41, %v2111_v33  ;;  %v2288_v39 = vadd.f32 %v2256_v27, %v2112_v56  ;;  %1999 = vrot.lane.b32.xlu0 %v9510_v51, %s4697_s13  ;;  %v1293_v20 = vmul.f32 %v9466_v49, %v9518_v60  ;;  %v9521_v34 = vld [vmem:[#allocation110_spill] sm:$0xff]  ;;  %v9522_v27 = vld [vmem:[#allocation67_spill] sm:$0xff]  ;;  %v9531_v51 = vld [vmem:[#allocation13_spill] sm:$0xff] }
 0x2a6   : > { %v1117_v3 = vsel %vm1091_vm3, %v1030_v23, %v6299_v5  ;;  %v1791_v13 = vadd.f32 %v9519_v14, %v1503_v48  ;;  %1075 = vrot.lane.b32.xlu1 %v6680_v2, %s4695_s11  ;;  %v1265_v5 = vsel %vm1091_vm3, %v9521_v34, %v9520_v15  ;;  %v2110_v21 = vadd.f32 %v2078_v24, %v1934_v46  ;;  %v9581_v2 = vld [vmem:[#allocation126_spill] sm:$0xff] }
 0x2a7   : > { %4537 = vtanh.f32 %v6887_v31  ;;  %v1149_v45 = vmul.f32 %v9501_v44, %v1117_v3  ;;  %v2336_v33 = vsel %vm6761_vm12, %v2288_v39, 0.0  ;;  %v2367_v56 = vadd.f32 %v2287_v55, %v1790_v43  ;;  %v9526_v55 = vld [vmem:[#allocation154_spill] sm:$0xff] }
 0x2a8   : > { %v1469_v41 = vmul.f32 %v9505_v1, %v1437_v28  ;;  %v1441_v48 = vsel %vm1091_vm3, %v9522_v27, %v9516_v59  ;;  %v6915_v3 = vpop.permute.xlu0 %1993  ;;  %v2368_v14 = vadd.f32 %v2336_v33, %v1791_v13  ;;  %v2077_v46 = vmul.f32 %v9467_v58, %v6626_v25  ;;  %v9525_v28 = vld [vmem:[#allocation114_spill] sm:$0xff]  ;;  %v9527_v13 = vld [vmem:[#allocation116_spill] sm:$0xff]  ;;  %v9532_v58 = vld [vmem:[#allocation169_spill] sm:$0xff] }
 0x2a9   : > { %v1325_v47 = vadd.f32 %v1293_v20, %v1149_v45  ;;  %9523 = vst [vmem:[#allocation93_spill] sm:$0xff] %v6915_v3  ;;  %v6917_v60 = vpop.permute.xlu1 %1085  ;;  %v2286_v24 = vadd.f32 %v2254_v22, %v2110_v21  ;;  %2189 = vrot.lane.b32.xlu0 %v9525_v28, %s4697_s13  ;;  %v2415_v39 = vadd.f32 %v9526_v55, %v2367_v56  ;;  %v9528_v21 = vld [vmem:[#allocation112_spill] sm:$0xff]  ;;  %v9576_v28 = vld [vmem:[#allocation87_spill] sm:$0xff] }
 0x2aa   : > { %9524 = vst [vmem:[#allocation153_spill] sm:$0xff] %v6917_v60  ;;  %v1121_v43 = vsel %vm1091_vm3, %v6917_v60, %v1030_v23  ;;  %v1292_v20 = vmul.f32 %v9466_v49, %v1265_v5  ;;  %1380 = vrot.lane.b32.xlu1 %v9527_v13, %s4695_s11  ;;  %v2416_v25 = vadd.f32 %v9526_v55, %v2368_v14  ;;  %v9529_v33 = vld [vmem:[#allocation104_spill] sm:$0xff] }
 0x2ab   : > { %v4534_v59 = vpop.eup %4533  ;;  %v1501_v45 = vadd.f32 %v1469_v41, %v1325_v47  ;;  %v1148_v15 = vmul.f32 %v9501_v44, %v1121_v43  ;;  %v952_v23 = vsel %vm946_vm5, %v9529_v33, %v9528_v21  ;;  %v1468_v27 = vmul.f32 %v9505_v1, %v1441_v48  ;;  %v9567_v1 = vld [vmem:[#allocation89_spill] sm:$0xff]  ;;  %v9572_v49 = vld [vmem:[#allocation144_spill] sm:$0xff] }
 0x2ac   : > { %v4536_v22 = vpop.eup %4535  ;;  %v2503_v56 = vadd.f32 1.0, %v4534_v59  ;;  %v6937_v60 = vmul.f32 0.5, %v2415_v39  ;;  %v6939_v41 = vpop.permute.xlu0 %2153  ;;  %v2448_v34 = vmul.f32 0.5, %v2416_v25  ;;  %v2222_v37 = vsel %vm1876_vm1, %v9532_v58, %v9513_v0  ;;  %v9534_v59 = vld [vmem:[#allocation48_spill] sm:$0xff] }
 0x2ad   : > { %v1324_v5 = vadd.f32 %v1292_v20, %v1148_v15  ;;  %v6941_v47 = vpop.permute.xlu1 %1814  ;;  %v2504_v43 = vadd.f32 1.0, %v4536_v22  ;;  %v1789_v14 = vadd.f32 %v9531_v51, %v1501_v45  ;;  %v2334_v48 = vsel %vm6461_vm4, %v2286_v24, 0.0  ;;  %1222 = vrot.lane.b32.xlu0 %v9534_v59, %s4695_s11  ;;  %v9535_v45 = vld [vmem:[#allocation111_spill] sm:$0xff]  ;;  %v9537_v24 = vld [vmem:[#allocation118_spill] sm:$0xff]  ;;  %v9582_v13 = vld [vmem:[#allocation40_spill] sm:$0xff] }
 0x2ae   : > { %9530 = vst [vmem:[#allocation172_spill] sm:$0xff] %v6941_v47  ;;  %v1902_v39 = vsel %vm1876_vm1, %v6941_v47, %v9511_v62  ;;  %4539 = vtanh.f32 %v6937_v60  ;;  %1868 = vrot.lane.b32.xlu1 %v9535_v45, %s4697_s13  ;;  %v9538_v15 = vld [vmem:[#allocation90_spill] sm:$0xff]  ;;  %v6966_v62 = vmul.f32 %v2503_v56, %v6842_v29  ;;  %v2253_v47 = vmul.f32 %v9514_v18, %v2222_v37  ;;  %v9566_v18 = vld [vmem:[#allocation39_spill] sm:$0xff] }
 0x2af   : > { %v1500_v20 = vadd.f32 %v1468_v27, %v1324_v5  ;;  %v1933_v51 = vmul.f32 %v9512_v26, %v1902_v39  ;;  %v6961_v0 = vmul.f32 %v2504_v43, %v6851_v11  ;;  %4541 = vtanh.f32 %v2448_v34 }
 0x2b0   : > { %v1756_v25 = vadd.f32 %v9538_v15, %v9537_v24  ;;  %9539 = vst [vmem:[#allocation164_spill] sm:$0xff] %v6966_v62  ;;  %v2366_v22 = vadd.f32 %v2334_v48, %v1789_v14  ;;  %v6971_v39 = vpop.permute.xlu0 %1041  ;;  %v6977_v11 = vsel %vm734_vm9, %v952_v23, 0.0  ;;  %v9545_v24 = vld [vmem:[#allocation58_spill] sm:$0xff]  ;;  %v2629_v15 = vld [vmem:[%s8858_s4 + $0x200] sm:$0xff]  ;;  %v1118_v32 = vsel %vm1091_vm3, %v6709_v40, %v9576_v28 }
 0x2b1   : > { %9536 = vst [vmem:[#allocation170_spill] sm:$0xff] %v6961_v0  ;;  %v4538_v58 = vpop.eup %4537  ;;  %v1548_v27 = vsel %vm6742_vm10, %v1500_v20, 0.0  ;;  %v2109_v5 = vadd.f32 %v2077_v46, %v1933_v51  ;;  %9540 = vst [vmem:[#allocation101_spill] sm:$0xff] %v6971_v39  ;;  %v6973_v26 = vpop.permute.xlu1 %1200  ;;  %2842 = vmatprep.mubr.f32.mxu1 %v6961_v0  ;;  %1390 = vrot.lane.b32.xlu0 %v6977_v11, %s4695_s11  ;;  %v9544_v51 = vld [vmem:[#allocation117_spill] sm:$0xff]  ;;  %v1442_v12 = vsel %vm1091_vm3, %v6829_v9, %v6797_v42 }
 0x2b2   : > { %9541 = vst [vmem:[#allocation57_spill] sm:$0xff] %v6973_v26  ;;  %2843 = vmatmul.mubr.f32.vlgmr.msra.gmra.mrb[16].mxu1 %v6966_v62  ;;  %v2501_v37 = vadd.f32 1.0, %v4538_v58  ;;  %v2414_v29 = vadd.f32 %v9526_v55, %v2366_v22  ;;  %v1788_v56 = vadd.f32 %v1756_v25, %v1548_v27  ;;  %2173 = vrot.lane.b32.xlu1 %v6663_v7, %s4697_s13  ;;  %v2630_v27 = vld [vmem:[%s8858_s4 + $0x208] sm:$0xff]  ;;  %v2649_v39 = vld [vmem:[%s8858_s4 + $0x2a0] sm:$0xff] }
 0x2b3   : > { %v2285_v46 = vadd.f32 %v2253_v47, %v2109_v5  ;;  %v948_v58 = vsel %vm946_vm5, %v9528_v21, %v9544_v51  ;;  %v2646_v47 = vld [vmem:[%s8858_s4 + $0x288] sm:$0xff]  ;;  %v9546_v21 = vld [vmem:[#allocation119_spill] sm:$0xff] }
 0x2b4   : > { %v6987_v43 = vmul.f32 %v2501_v37, %v6887_v31  ;;  %v2446_v23 = vmul.f32 0.5, %v2414_v29  ;;  %v6989_v14 = vpop.permute.xlu0 %1178  ;;  %v2645_v31 = vld [vmem:[%s8858_s4 + $0x280] sm:$0xff]  ;;  %v4291_v37 = vpack.c.bf16 %v2630_v27, %v2629_v15  ;;  %v7021_v51 = vsel %vm735_vm8, %v948_v58, 0.0  ;;  %v9552_v27 = vld [vmem:[#allocation51_spill] sm:$0xff] }
 0x2b5   : > { %9543 = vst [vmem:[#allocation106_spill] sm:$0xff] %v6989_v14  ;;  %v6991_v48 = vpop.permute.xlu1 %1360  ;;  %v2365_v20 = vadd.f32 %v2285_v46, %v1788_v56  ;;  %2015 = vrot.lane.b32.xlu0 %v9545_v24, %s4697_s13  ;;  %v4289_v22 = vpack.c.bf16 %v2646_v47, %v2645_v31  ;;  %9549 = vst [vmem:[#allocation104_spill] sm:$0xff] %v7021_v51  ;;  %v9551_v31 = vld [vmem:[#allocation115_spill] sm:$0xff] }
 0x2b6   : > { %9542 = vst [vmem:[#allocation61_spill] sm:$0xff] %v6987_v43  ;;  %2758 = vmatmul.mubr.f32.vlgmr.msra.gmra.mrb[16].mxu0 %v6987_v43  ;;  %4543 = vtanh.f32 %v2446_v23  ;;  %1061 = vrot.lane.b32.xlu1 %v9546_v21, %s4695_s11  ;;  %v1438_v9 = vsel %vm1091_vm3, %v6797_v42, %v6991_v48  ;;  %v9587_v42 = vld [vmem:[#allocation45_spill] sm:$0xff] }
 0x2b7   : > { %v2413_v25 = vadd.f32 %v9526_v55, %v2365_v20  ;;  %4290 = vmatprep.subr.bf16.mxu0 %v4289_v22  ;;  %v9550_v20 = vld [vmem:[#allocation123_spill] sm:$0xff]  ;;  %v9565_v55 = vld [vmem:[#allocation29_spill] sm:$0xff] }
 0x2b8   : > { %v4540_v5 = vpop.eup %4539  ;;  %v7015_v56 = vpop.permute.xlu0 %1234  ;;  %v812_v47 = vsel %vm801_vm2, %v9551_v31, %v9550_v20  ;;  %4292 = vmatpush3.bf16.msra.mxu0 %v4291_v37  ;;  %v9558_v37 = vld [vmem:[#allocation97_spill] sm:$0xff]  ;;  %v1653_v24 = vmul.f32 %v9566_v18, %v9565_v55  ;;  %v9571_v55 = vld [vmem:[#allocation142_spill] sm:$0xff] }
 0x2b9   : > { %v4542_v29 = vpop.eup %4541  ;;  %9547 = vst [vmem:[#allocation77_spill] sm:$0xff] %v7015_v56  ;;  %v7017_v46 = vpop.permute.xlu1 %1816  ;;  %v2511_v0 = vadd.f32 1.0, %v4540_v5  ;;  %v2445_v62 = vmul.f32 0.5, %v2413_v25  ;;  %2183 = vrot.lane.b32.xlu0 %v7021_v51, %s4697_s13  ;;  %v7039_v22 = vsel %vm726_vm6, %v812_v47, 0.0  ;;  %v9560_v47 = vld [vmem:[#allocation63_spill] sm:$0xff] }
 0x2ba   : > { %9548 = vst [vmem:[#allocation112_spill] sm:$0xff] %v7017_v46  ;;  %v2512_v15 = vadd.f32 1.0, %v4542_v29  ;;  %1206 = vrot.lane.b32.xlu1 %v9552_v27, %s4695_s11  ;;  %9556 = vst [vmem:[#allocation90_spill] sm:$0xff] %v7039_v22  ;;  %v1262_v27 = vsel %vm1091_vm3, %v9572_v49, %v9571_v55 }
 0x2bb   : > { %4545 = vtanh.f32 %v2445_v62  ;;  %v7042_v5 = vmul.f32 %v2511_v0, %v6937_v60  ;;  %v1301_v54 = vmul.f32 %v9582_v13, %v1262_v27 }
 0x2bc   : > { %v7031_v43 = vmul.f32 %v2512_v15, %v2448_v34  ;;  %v7033_v58 = vpop.permute.xlu0 %1376  ;;  %v807_v34 = vsel %vm801_vm2, %v9472_v35, %v9558_v37  ;;  %v9563_v35 = vld [vmem:[#allocation35_spill] sm:$0xff] }
 0x2bd   : > { %9554 = vst [vmem:[#allocation8_spill] sm:$0xff] %v7033_v58  ;;  %v7035_v25 = vpop.permute.xlu1 %1848  ;;  %9557 = vst [vmem:[#allocation117_spill] sm:$0xff] %v7042_v5  ;;  %1071 = vrot.lane.b32.xlu0 %v7039_v22, %s4695_s11  ;;  %v7062_v15 = vsel %vm727_vm7, %v807_v34, 0.0  ;;  %v1122_v34 = vsel %vm1091_vm3, %v6757_v50, %v6709_v40  ;;  %v1266_v50 = vsel %vm1091_vm3, %v9573_v19, %v9572_v49  ;;  %v9577_v49 = vld [vmem:[#allocation146_spill] sm:$0xff] }
 0x2be   : > { %9553 = vst [vmem:[#allocation13_spill] sm:$0xff] %v7031_v43  ;;  %9555 = vst [vmem:[#allocation118_spill] sm:$0xff] %v7035_v25  ;;  %2847 = vmatprep.mubr.f32.mxu1 %v7031_v43  ;;  %1396 = vrot.lane.b32.xlu1 %v6737_v63, %s4695_s11  ;;  %v9562_v43 = vld [vmem:[#allocation100_spill] sm:$0xff]  ;;  %v9574_v63 = vld [vmem:[#allocation155_spill] sm:$0xff]  ;;  %v1604_v40 = vmul.f32 %v9563_v35, %v9581_v2 }
 0x2bf   : > { %2848 = vmatmul.mubr.f32.gmra.mrb[18].mxu1 %v7042_v5  ;;  %9561 = vst [vmem:[#allocation115_spill] sm:$0xff] %v7062_v15  ;;  %v1605_v37 = vmul.f32 %v9563_v35, %v9562_v43  ;;  %v9578_v19 = vld [vmem:[#allocation22_spill] sm:$0xff] }
 0x2c0   : > { %v4544_v29 = vpop.eup %4543  ;;  %v7054_v31 = vpop.permute.xlu0 %1826  ;;  %v7111_v7 = vmul.f32 %v9578_v19, %v9577_v49 }
 0x2c1   : > { %9559 = vst [vmem:[#allocation123_spill] sm:$0xff] %v7054_v31  ;;  %v7056_v60 = vpop.permute.xlu1 %1985  ;;  %v2510_v0 = vadd.f32 1.0, %v4544_v29  ;;  %1216 = vrot.lane.b32.xlu0 %v9560_v47, %s4695_s11  ;;  %v9568_v29 = vld [vmem:[#allocation171_spill] sm:$0xff] }
 0x2c2   : > { %1862 = vrot.lane.b32.xlu1 %v7062_v15, %s4697_s13  ;;  %v1899_v8 = vsel %vm1876_vm1, %v9568_v29, %v9567_v1  ;;  %v1903_v27 = vsel %vm1876_vm1, %v7017_v46, %v9568_v29 }
 0x2c3   : > { %v7068_v5 = vmul.f32 %v2510_v0, %v2446_v23  ;;  %v9570_v0 = vld [vmem:[#allocation23_spill] sm:$0xff] }
 0x2c4   : > { %v7080_v44 = vpop.permute.xlu0 %1971  ;;  %v7085_v21 = vmul.f32 %v9566_v18, %v9570_v0  ;;  %v2043_v0 = vsel %vm1876_vm1, %v9575_v16, %v9574_v63 }
 0x2c5   : > { %9564 = vst [vmem:[#allocation97_spill] sm:$0xff] %v7068_v5  ;;  %9569 = vst [vmem:[#allocation100_spill] sm:$0xff] %v7080_v44  ;;  %2762 = vmatprep.mubr.f32.mxu0 %v7068_v5  ;;  %v2146_v43 = vpop.permute.xlu1 %2145  ;;  %v4546_v23 = vpop.eup %4545  ;;  %1856 = vrot.lane.b32.xlu0 %v7039_v22, %s4697_s13  ;;  %v7097_v5 = vadd.f32 %v1653_v24, %v1605_v37  ;;  %v9579_v24 = vld [vmem:[#allocation18_spill] sm:$0xff]  ;;  %v9580_v22 = vld [vmem:[#allocation32_spill] sm:$0xff] }
 0x2c6   : > { %2007 = vrot.lane.b32.xlu1 %v9534_v59, %s4697_s13  ;;  %v2509_v52 = vadd.f32 1.0, %v4546_v23  ;;  %v1942_v37 = vmul.f32 %v9579_v24, %v1899_v8  ;;  %v1156_v45 = vmul.f32 %v9580_v22, %v1122_v34  ;;  %v1300_v23 = vmul.f32 %v9582_v13, %v1266_v50  ;;  %v9586_v8 = vld [vmem:[#allocation42_spill] sm:$0xff]  ;;  %v2647_v50 = vld [vmem:[%s8858_s4 + $0x290] sm:$0xff] }
 0x2c7   : > { %v2086_v34 = vmul.f32 %v9586_v8, %v2043_v0  ;;  %v1157_v44 = vmul.f32 %v9580_v22, %v1118_v32  ;;  %v2219_v2 = vsel %vm1876_vm1, %v2146_v43, %v6939_v41  ;;  %v2631_v32 = vld [vmem:[%s8858_s4 + $0x210] sm:$0xff] }
 0x2c8   : > { %v7123_v59 = vpop.permute.xlu0 %2137  ;;  %v7127_v38 = vmul.f32 %v2509_v52, %v2445_v62  ;;  %v2648_v52 = vld [vmem:[%s8858_s4 + $0x298] sm:$0xff]  ;;  %v1476_v62 = vmul.f32 %v9587_v42, %v1442_v12  ;;  %v2650_v12 = vld [vmem:[%s8858_s4 + $0x2a8] sm:$0xff]  ;;  %v1332_v29 = vadd.f32 %v1300_v23, %v1156_v45  ;;  %v1477_v45 = vmul.f32 %v9587_v42, %v1438_v9  ;;  %v9647_v17 = vld [vmem:[#allocation123_spill] sm:$0xff] }
 0x2c9   : > { %9583 = vst [vmem:[#allocation29_spill] sm:$0xff] %v7123_v59  ;;  %v7125_v49 = vpop.permute.xlu1 %1033  ;;  %2001 = vrot.lane.b32.xlu0 %v9560_v47, %s4697_s13  ;;  %v4293_v0 = vpack.c.bf16 %v2648_v52, %v2647_v50  ;;  %v2632_v47 = vld [vmem:[%s8858_s4 + $0x218] sm:$0xff]  ;;  %v2118_v31 = vadd.f32 %v2086_v34, %v1942_v37  ;;  %v4297_v56 = vpack.c.bf16 %v2650_v12, %v2649_v39  ;;  %v2633_v50 = vld [vmem:[%s8858_s4 + $0x220] sm:$0xff]  ;;  %v2634_v52 = vld [vmem:[%s8858_s4 + $0x228] sm:$0xff] }
 0x2ca   : > { %9584 = vst [vmem:[#allocation89_spill] sm:$0xff] %v7125_v49  ;;  %9585 = vst [vmem:[#allocation171_spill] sm:$0xff] %v7127_v38  ;;  %1077 = vrot.lane.b32.xlu1 %v7062_v15, %s4695_s11  ;;  %2763 = vmatmul.mubr.f32.gmra.mrb[18].mxu0 %v7127_v38  ;;  %v4295_v46 = vpack.c.bf16 %v2632_v47, %v2631_v32  ;;  %v2651_v38 = vld [vmem:[%s8858_s4 + $0x2b0] sm:$0xff]  ;;  %v2047_v37 = vsel %vm1876_vm1, %v6889_v36, %v9575_v16  ;;  %v9588_v39 = vld [vmem:[#allocation25_spill] sm:$0xff] }
 0x2cb   : > { %v2262_v47 = vmul.f32 %v9588_v39, %v2219_v2  ;;  %v2223_v23 = vsel %vm1876_vm1, %v7123_v59, %v2146_v43  ;;  %4294 = vmatprep.subr.bf16.mxu0 %v4293_v0  ;;  %v2652_v12 = vld [vmem:[%s8858_s4 + $0x2b8] sm:$0xff]  ;;  %v1333_v15 = vadd.f32 %v1301_v54, %v1157_v44  ;;  %v1941_v16 = vmul.f32 %v9579_v24, %v1903_v27  ;;  %v9591_v9 = vld [vmem:[#allocation122_spill] sm:$0xff]  ;;  %v2677_v43 = vld [vmem:[%s8858_s4 + $0x380] sm:$0xff] }
 0x2cc   : > { %v7184_v34 = vpop.permute.xlu0 %2169  ;;  %4296 = vmatpush3.bf16.msra.mxu0 %v4295_v46  ;;  %v4299_v2 = vpack.c.bf16 %v2634_v52, %v2633_v50  ;;  %v2678_v0 = vld [vmem:[%s8858_s4 + $0x388] sm:$0xff]  ;;  %v2661_v59 = vld [vmem:[%s8858_s4 + $0x300] sm:$0xff]  ;;  %v1508_v44 = vadd.f32 %v1476_v62, %v1332_v29  ;;  %v9592_v54 = vld [vmem:[#allocation124_spill] sm:$0xff]  ;;  %v4301_v27 = vpack.c.bf16 %v2652_v12, %v2651_v38  ;;  %v1684_v62 = vadd.f32 %v7085_v21, %v1604_v40 }
 0x2cd   : > { %9589 = vst [vmem:[#allocation23_spill] sm:$0xff] %v7184_v34  ;;  %v7186_v32 = vpop.permute.xlu1 %1089  ;;  %2191 = vrot.lane.b32.xlu0 %v9591_v9, %s4697_s13  ;;  %4298 = vmatprep.subr.bf16.mxu0 %v4297_v56  ;;  %v2635_v46 = vld [vmem:[%s8858_s4 + $0x230] sm:$0xff]  ;;  %v2636_v50 = vld [vmem:[%s8858_s4 + $0x238] sm:$0xff]  ;;  %v4321_v52 = vpack.c.bf16 %v2678_v0, %v2677_v43  ;;  %v2662_v36 = vld [vmem:[%s8858_s4 + $0x308] sm:$0xff]  ;;  %v2085_v29 = vmul.f32 %v9586_v8, %v2047_v37 }
 0x2ce   : > { %9590 = vst [vmem:[#allocation142_spill] sm:$0xff] %v7186_v32  ;;  %1382 = vrot.lane.b32.xlu1 %v9592_v54, %s4695_s11  ;;  %v2261_v56 = vmul.f32 %v9588_v39, %v2223_v23  ;;  %v4323_v38 = vpack.c.bf16 %v2662_v36, %v2661_v59  ;;  %v2653_v12 = vld [vmem:[%s8858_s4 + $0x2c0] sm:$0xff]  ;;  %v2654_v9 = vld [vmem:[%s8858_s4 + $0x2c8] sm:$0xff]  ;;  %v2679_v43 = vld [vmem:[%s8858_s4 + $0x390] sm:$0xff]  ;;  %v1509_v59 = vadd.f32 %v1477_v45, %v1333_v15  ;;  %v1556_v39 = vsel %vm6742_vm10, %v1508_v44, 0.0 }
 0x2cf   : > { %v9593_v0 = vld [vmem:[#allocation120_spill] sm:$0xff]  ;;  %v9594_v54 = vld [vmem:[#allocation121_spill] sm:$0xff]  ;;  %v2294_v37 = vadd.f32 %v2262_v47, %v2118_v31  ;;  %4322 = vmatprep.subr.bf16.mxu1 %v4321_v52  ;;  %v2663_v49 = vld [vmem:[%s8858_s4 + $0x310] sm:$0xff]  ;;  %v4303_v15 = vpack.c.bf16 %v2636_v50, %v2635_v46  ;;  %v1765_v44 = vadd.f32 %v7111_v7, %v7097_v5 }
 0x2d0   : > { %v953_v21 = vsel %vm946_vm5, %v9594_v54, %v9593_v0  ;;  %v9595_v40 = vld [vmem:[#allocation132_spill] sm:$0xff]  ;;  %v7232_v23 = vpop.permute.xlu0 %1057  ;;  %v9598_v31 = vld [vmem:[#allocation59_spill] sm:$0xff]  ;;  %4300 = vmatpush3.bf16.msra.mxu0 %v4299_v2  ;;  %v2637_v45 = vld [vmem:[%s8858_s4 + $0x240] sm:$0xff]  ;;  %v4305_v2 = vpack.c.bf16 %v2654_v9, %v2653_v12  ;;  %4324 = vmatpush3.bf16.msra.mxu1 %v4323_v38 }
 0x2d1   : > { %v1732_v36 = vmul.f32 %v9578_v19, %v9595_v40  ;;  %9596 = vst [vmem:[#allocation144_spill] sm:$0xff] %v7232_v23  ;;  %v7234_v14 = vpop.permute.xlu1 %1186  ;;  %v2680_v32 = vld [vmem:[%s8858_s4 + $0x398] sm:$0xff]  ;;  %v2117_v40 = vadd.f32 %v2085_v29, %v1941_v16  ;;  %1224 = vrot.lane.b32.xlu0 %v9598_v31, %s4695_s11  ;;  %v9599_v52 = vld [vmem:[#allocation103_spill] sm:$0xff]  ;;  %v9601_v16 = vld [vmem:[#allocation137_spill] sm:$0xff]  ;;  %4302 = vmatprep.subr.bf16.mxu0 %v4301_v27  ;;  %v7287_v5 = vsel %vm734_vm9, %v953_v21, 0.0 }
 0x2d2   : > { %9597 = vst [vmem:[#allocation155_spill] sm:$0xff] %v7234_v14  ;;  %v2664_v54 = vld [vmem:[%s8858_s4 + $0x318] sm:$0xff]  ;;  %v4325_v47 = vpack.c.bf16 %v2680_v32, %v2679_v43  ;;  %v1606_v23 = vmul.f32 %v9563_v35, %v9599_v52  ;;  %v9600_v14 = vld [vmem:[#allocation26_spill] sm:$0xff]  ;;  %1870 = vrot.lane.b32.xlu1 %v9601_v16, %s4697_s13  ;;  %v2681_v32 = vld [vmem:[%s8858_s4 + $0x3a0] sm:$0xff] }
 0x2d3   : > { %v1654_v6 = vmul.f32 %v9566_v18, %v9600_v14  ;;  %v2638_v46 = vld [vmem:[%s8858_s4 + $0x248] sm:$0xff]  ;;  %v1764_v50 = vadd.f32 %v1732_v36, %v1684_v62  ;;  %v2293_v29 = vadd.f32 %v2261_v56, %v2117_v40  ;;  %v4327_v27 = vpack.c.bf16 %v2664_v54, %v2663_v49  ;;  %v2655_v9 = vld [vmem:[%s8858_s4 + $0x2d0] sm:$0xff]  ;;  %v2656_v12 = vld [vmem:[%s8858_s4 + $0x2d8] sm:$0xff]  ;;  %9604 = vst [vmem:[#allocation87_spill] sm:$0xff] %v7287_v5 }
 0x2d4   : > { %v2682_v14 = vld [vmem:[%s8858_s4 + $0x3a8] sm:$0xff]  ;;  %v9602_v43 = vld [vmem:[#allocation31_spill] sm:$0xff]  ;;  %v2342_v62 = vsel %vm6461_vm4, %v2294_v37, 0.0  ;;  %v7281_v36 = vpop.permute.xlu0 %1202  ;;  %4326 = vmatprep.subr.bf16.mxu1 %v4325_v47  ;;  %v2665_v56 = vld [vmem:[%s8858_s4 + $0x320] sm:$0xff]  ;;  %v1797_v37 = vadd.f32 %v1765_v44, %v1509_v59  ;;  %4304 = vmatpush3.bf16.msra.mxu0 %v4303_v15  ;;  %v4307_v40 = vpack.c.bf16 %v2638_v46, %v2637_v45  ;;  %v4309_v59 = vpack.c.bf16 %v2656_v12, %v2655_v9 }
 0x2d5   : > { %v7277_v52 = vmul.f32 %v9566_v18, %v9602_v43  ;;  %9603 = vst [vmem:[#allocation148_spill] sm:$0xff] %v7281_v36  ;;  %v7283_v7 = vpop.permute.xlu1 %1368  ;;  %v4329_v49 = vpack.c.bf16 %v2682_v14, %v2681_v32  ;;  %v2666_v38 = vld [vmem:[%s8858_s4 + $0x328] sm:$0xff]  ;;  %v1796_v54 = vadd.f32 %v1764_v50, %v1556_v39  ;;  %1392 = vrot.lane.b32.xlu0 %v7287_v5, %s4695_s11  ;;  %v2683_v21 = vld [vmem:[%s8858_s4 + $0x3b0] sm:$0xff]  ;;  %v2684_v47 = vld [vmem:[%s8858_s4 + $0x3b8] sm:$0xff] }
 0x2d6   : > { %v7303_v32 = vadd.f32 %v1654_v6, %v1606_v23  ;;  %v9605_v14 = vld [vmem:[#allocation129_spill] sm:$0xff]  ;;  %2175 = vrot.lane.b32.xlu1 %v6977_v11, %s4697_s13  ;;  %4306 = vmatprep.subr.bf16.mxu0 %v4305_v2  ;;  %v2639_v15 = vld [vmem:[%s8858_s4 + $0x250] sm:$0xff]  ;;  %v2640_v45 = vld [vmem:[%s8858_s4 + $0x258] sm:$0xff]  ;;  %v2374_v50 = vadd.f32 %v2342_v62, %v1797_v37  ;;  %v4331_v44 = vpack.c.bf16 %v2666_v38, %v2665_v56 }
 0x2d7   : > { %v949_v39 = vsel %vm946_vm5, %v9593_v0, %v9605_v14  ;;  %v9606_v6 = vld [vmem:[#allocation136_spill] sm:$0xff]  ;;  %v9607_v23 = vld [vmem:[#allocation131_spill] sm:$0xff]  ;;  %v2373_v0 = vadd.f32 %v2293_v29, %v1796_v54  ;;  %4328 = vmatpush3.bf16.msra.mxu1 %v4327_v27  ;;  %v2657_v2 = vld [vmem:[%s8858_s4 + $0x2e0] sm:$0xff]  ;;  %v4333_v54 = vpack.c.bf16 %v2684_v47, %v2683_v21 }
 0x2d8   : > { %v813_v46 = vsel %vm801_vm2, %v9607_v23, %v9606_v6  ;;  %v2658_v9 = vld [vmem:[%s8858_s4 + $0x2e8] sm:$0xff]  ;;  %v9608_v12 = vld [vmem:[#allocation125_spill] sm:$0xff]  ;;  %v7339_v56 = vpop.permute.xlu0 %1362  ;;  %4330 = vmatprep.subr.bf16.mxu1 %v4329_v49  ;;  %v2667_v37 = vld [vmem:[%s8858_s4 + $0x330] sm:$0xff]  ;;  %4308 = vmatpush3.bf16.msra.mxu0 %v4307_v40  ;;  %v7369_v40 = vsel %vm735_vm8, %v949_v39, 0.0  ;;  %v1434_v39 = vsel %vm1091_vm3, %v6991_v48, %v7283_v7 }
 0x2d9   : > { %v7329_v43 = vmul.f32 %v9563_v35, %v9608_v12  ;;  %v9609_v14 = vld [vmem:[#allocation150_spill] sm:$0xff]  ;;  %v9610_v29 = vld [vmem:[#allocation173_spill] sm:$0xff]  ;;  %v7341_v38 = vpop.permute.xlu1 %2398  ;;  %v2668_v23 = vld [vmem:[%s8858_s4 + $0x338] sm:$0xff]  ;;  %v4311_v35 = vpack.c.bf16 %v2640_v45, %v2639_v15  ;;  %v7373_v15 = vsel %vm726_vm6, %v813_v46, 0.0  ;;  %4310 = vmatprep.subr.bf16.mxu0 %v4309_v59  ;;  %v4313_v45 = vpack.c.bf16 %v2658_v9, %v2657_v2 }
 0x2da   : > { %v1258_v62 = vsel %vm1091_vm3, %v9571_v55, %v9609_v14  ;;  %v1114_v27 = vsel %vm1091_vm3, %v9576_v28, %v9610_v29  ;;  %9611 = vst [vmem:[#allocation146_spill] sm:$0xff] %v7341_v38  ;;  %v9612_v55 = vld [vmem:[#allocation66_spill] sm:$0xff]  ;;  %v2422_v12 = vadd.f32 %v7341_v38, %v2374_v50  ;;  %v2421_v28 = vadd.f32 %v7341_v38, %v2373_v0  ;;  %v2685_v49 = vld [vmem:[%s8858_s4 + $0x3c0] sm:$0xff]  ;;  %v9614_v50 = vld [vmem:[#allocation152_spill] sm:$0xff] }
 0x2db   : > { %2017 = vrot.lane.b32.xlu0 %v9612_v55, %s4697_s13  ;;  %v2686_v21 = vld [vmem:[%s8858_s4 + $0x3c8] sm:$0xff]  ;;  %v9613_v47 = vld [vmem:[#allocation113_spill] sm:$0xff]  ;;  %1063 = vrot.lane.b32.xlu1 %v9614_v50, %s4695_s11  ;;  %9615 = vst [vmem:[#allocation126_spill] sm:$0xff] %v7373_v15  ;;  %v4335_v59 = vpack.c.bf16 %v2668_v23, %v2667_v37  ;;  %v2659_v46 = vld [vmem:[%s8858_s4 + $0x2f0] sm:$0xff]  ;;  %v1302_v9 = vmul.f32 %v9582_v13, %v1258_v62 }
 0x2dc   : > { %v7363_v18 = vsel %vm801_vm2, %v9550_v20, %v9613_v47  ;;  %v2641_v0 = vld [vmem:[%s8858_s4 + $0x260] sm:$0xff]  ;;  %v2642_v20 = vld [vmem:[%s8858_s4 + $0x268] sm:$0xff]  ;;  %v7385_v47 = vmul.f32 0.5, %v2422_v12  ;;  %v7387_v55 = vmul.f32 0.5, %v2421_v28  ;;  %4332 = vmatpush3.bf16.msra.mxu1 %v4331_v44  ;;  %v2660_v2 = vld [vmem:[%s8858_s4 + $0x2f8] sm:$0xff]  ;;  %v1158_v50 = vmul.f32 %v9580_v22, %v1114_v27  ;;  %v7401_v12 = vpop.permute.xlu0 %1818  ;;  %4312 = vmatpush3.bf16.msra.mxu0 %v4311_v35 }
 0x2dd   : > { %v1254_v48 = vsel %vm1091_vm3, %v9609_v14, %v6973_v26  ;;  %9616 = vst [vmem:[#allocation120_spill] sm:$0xff] %v7401_v12  ;;  %v7403_v44 = vpop.permute.xlu1 %1834  ;;  %4334 = vmatprep.subr.bf16.mxu1 %v4333_v54  ;;  %v4337_v37 = vpack.c.bf16 %v2686_v21, %v2685_v49  ;;  %v2669_v23 = vld [vmem:[%s8858_s4 + $0x340] sm:$0xff]  ;;  %v2670_v62 = vld [vmem:[%s8858_s4 + $0x348] sm:$0xff]  ;;  %v1110_v27 = vsel %vm1091_vm3, %v9610_v29, %v6659_v10  ;;  %v2687_v28 = vld [vmem:[%s8858_s4 + $0x3d0] sm:$0xff] }
 0x2de   : > { %v2039_v14 = vsel %vm1876_vm1, %v9574_v63, %v7056_v60  ;;  %4547 = vtanh.f32 %v7385_v47  ;;  %v4315_v54 = vpack.c.bf16 %v2642_v20, %v2641_v0  ;;  %v2688_v29 = vld [vmem:[%s8858_s4 + $0x3d8] sm:$0xff]  ;;  %v1430_v63 = vsel %vm1091_vm3, %v7283_v7, %v7033_v58  ;;  %4314 = vmatprep.subr.bf16.mxu0 %v4313_v45  ;;  %v2643_v0 = vld [vmem:[%s8858_s4 + $0x270] sm:$0xff] }
 0x2df   : > { %2185 = vrot.lane.b32.xlu0 %v7369_v40, %s4697_s13  ;;  %v1478_v49 = vmul.f32 %v9587_v42, %v1434_v39  ;;  %v9617_v21 = vld [vmem:[#allocation60_spill] sm:$0xff]  ;;  %4549 = vtanh.f32 %v7387_v55  ;;  %v4317_v35 = vpack.c.bf16 %v2660_v2, %v2659_v46  ;;  %v1895_v7 = vsel %vm1876_vm1, %v9567_v1, %v6856_v4 }
 0x2e0   : > { %1208 = vrot.lane.b32.xlu1 %v9617_v21, %s4695_s11  ;;  %v2644_v20 = vld [vmem:[%s8858_s4 + $0x278] sm:$0xff]  ;;  %v1303_v39 = vmul.f32 %v9582_v13, %v1254_v48  ;;  %v2035_v45 = vsel %vm1876_vm1, %v7056_v60, %v6915_v3  ;;  %4336 = vmatpush3.bf16.msra.mxu1 %v4335_v59  ;;  %v4339_v46 = vpack.c.bf16 %v2670_v62, %v2669_v23  ;;  %v7453_v10 = vpop.permute.xlu0 %1850  ;;  %v2671_v48 = vld [vmem:[%s8858_s4 + $0x350] sm:$0xff]  ;;  %v2690_v23 = vld [vmem:[%s8858_s4 + $0x3e8] sm:$0xff] }
 0x2e1   : > { %v1334_v2 = vadd.f32 %v1302_v9, %v1158_v50  ;;  %v1159_v58 = vmul.f32 %v9580_v22, %v1110_v27  ;;  %v2087_v21 = vmul.f32 %v9586_v8, %v2039_v14  ;;  %9618 = vst [vmem:[#allocation121_spill] sm:$0xff] %v7453_v10  ;;  %v7455_v26 = vpop.permute.xlu1 %1979  ;;  %4338 = vmatprep.subr.bf16.mxu1 %v4337_v37  ;;  %v2672_v60 = vld [vmem:[%s8858_s4 + $0x358] sm:$0xff]  ;;  %v2689_v37 = vld [vmem:[%s8858_s4 + $0x3e0] sm:$0xff] }
 0x2e2   : > { %v4341_v1 = vpack.c.bf16 %v2688_v29, %v2687_v28  ;;  %v1891_v50 = vsel %vm1876_vm1, %v6856_v4, %v7035_v25  ;;  %v1479_v59 = vmul.f32 %v9587_v42, %v1430_v63  ;;  %4316 = vmatpush3.bf16.msra.mxu0 %v4315_v54  ;;  %v4319_v9 = vpack.c.bf16 %v2644_v20, %v2643_v0  ;;  %v9619_v14 = vld [vmem:[#allocation140_spill] sm:$0xff]  ;;  %v9620_v28 = vld [vmem:[#allocation151_spill] sm:$0xff]  ;;  %v9654_v42 = vld [vmem:[#allocation101_spill] sm:$0xff] }
 0x2e3   : > { %1073 = vrot.lane.b32.xlu0 %v7373_v15, %s4695_s11  ;;  %v1943_v62 = vmul.f32 %v9579_v24, %v1895_v7  ;;  %v2088_v27 = vmul.f32 %v9586_v8, %v2035_v45  ;;  %v1510_v4 = vadd.f32 %v1478_v49, %v1334_v2  ;;  %4318 = vmatprep.subr.bf16.mxu0 %v4317_v35  ;;  %v9652_v8 = vld [vmem:[#allocation155_spill] sm:$0xff]  ;;  %v9657_v22 = vld [vmem:[#allocation52_spill] sm:$0xff] }
 0x2e4   : > { %1398 = vrot.lane.b32.xlu1 %v7021_v51, %s4695_s11  ;;  %v1734_v54 = vmul.f32 %v9578_v19, %v9619_v14  ;;  %v1735_v29 = vmul.f32 %v9578_v19, %v9620_v28  ;;  %v1335_v63 = vadd.f32 %v1303_v39, %v1159_v58  ;;  %4340 = vmatpush3.bf16.msra.mxu1 %v4339_v46  ;;  %v7487_v49 = vpop.permute.xlu0 %1987  ;;  %v2673_v14 = vld [vmem:[%s8858_s4 + $0x360] sm:$0xff]  ;;  %v2674_v58 = vld [vmem:[%s8858_s4 + $0x368] sm:$0xff]  ;;  %v7506_v46 = vsel %vm727_vm7, %v7363_v18, 0.0  ;;  %v9656_v25 = vld [vmem:[#allocation75_spill] sm:$0xff] }
 0x2e5   : > { %v4343_v0 = vpack.c.bf16 %v2672_v60, %v2671_v48  ;;  %v1687_v20 = vadd.f32 %v7277_v52, %v7329_v43  ;;  %v1944_v7 = vmul.f32 %v9579_v24, %v1891_v50  ;;  %v2119_v45 = vadd.f32 %v2087_v21, %v1943_v62  ;;  %v2162_v2 = vpop.permute.xlu1 %2161  ;;  %4342 = vmatprep.subr.bf16.mxu1 %v4341_v1  ;;  %v9621_v21 = vld [vmem:[#allocation74_spill] sm:$0xff]  ;;  %v2691_v1 = vld [vmem:[%s8858_s4 + $0x3f0] sm:$0xff]  ;;  %v2692_v48 = vld [vmem:[%s8858_s4 + $0x3f8] sm:$0xff] }
 0x2e6   : > { %v4345_v35 = vpack.c.bf16 %v2690_v23, %v2689_v37  ;;  %v1511_v39 = vadd.f32 %v1479_v59, %v1335_v63  ;;  %v2211_v52 = vsel %vm1876_vm1, %v2162_v2, %v7184_v34  ;;  %v2215_v43 = vsel %vm1876_vm1, %v6939_v41, %v2162_v2  ;;  %9622 = vst [vmem:[#allocation132_spill] sm:$0xff] %v7506_v46  ;;  %v9623_v50 = vld [vmem:[#allocation25_spill] sm:$0xff] }
 0x2e7   : > { %1218 = vrot.lane.b32.xlu0 %v9621_v21, %s4695_s11  ;;  %4320 = vmatpush3.bf16.msra.mxu0 %v4319_v9  ;;  %v2120_v60 = vadd.f32 %v2088_v27, %v1944_v7  ;;  %v1558_v41 = vsel %vm6715_vm11, %v1510_v4, 0.0  ;;  %v2263_v59 = vmul.f32 %v9623_v50, %v2215_v43  ;;  %v2264_v37 = vmul.f32 %v9623_v50, %v2211_v52  ;;  %v2675_v52 = vld [vmem:[%s8858_s4 + $0x370] sm:$0xff] }
 0x2e8   : > { %1864 = vrot.lane.b32.xlu1 %v7506_v46, %s4697_s13  ;;  %v4548_v18 = vpop.eup %4547  ;;  %v1766_v9 = vadd.f32 %v1734_v54, %v7303_v32  ;;  %v1767_v23 = vadd.f32 %v1735_v29, %v1687_v20  ;;  %4344 = vmatpush3.bf16.msra.mxu1 %v4343_v0  ;;  %v4347_v62 = vpack.c.bf16 %v2674_v58, %v2673_v14  ;;  %v7521_v27 = vpop.permute.xlu0 %2147  ;;  %v2676_v32 = vld [vmem:[%s8858_s4 + $0x378] sm:$0xff] }
 0x2e9   : > { %v4550_v28 = vpop.eup %4549  ;;  %v2295_v63 = vadd.f32 %v2263_v59, %v2119_v45  ;;  %v2296_v2 = vadd.f32 %v2264_v37, %v2120_v60  ;;  %v7523_v7 = vpop.permute.xlu1 %1049  ;;  %v2518_v4 = vadd.f32 1.0, %v4548_v18  ;;  %4346 = vmatprep.subr.bf16.mxu1 %v4345_v35  ;;  %v4349_v43 = vpack.c.bf16 %v2692_v48, %v2691_v1  ;;  %v9627_v18 = vld [vmem:[#allocation133_spill] sm:$0xff] }
 0x2ea   : > { %v1798_v54 = vadd.f32 %v1766_v9, %v1558_v41  ;;  %v1799_v29 = vadd.f32 %v1767_v23, %v1511_v39  ;;  %v2517_v0 = vadd.f32 1.0, %v4550_v28  ;;  %v4351_v39 = vpack.c.bf16 %v2676_v32, %v2675_v52  ;;  %v9628_v23 = vld [vmem:[#allocation158_spill] sm:$0xff] }
 0x2eb   : > { %1858 = vrot.lane.b32.xlu0 %v7373_v15, %s4697_s13  ;;  %v2344_v45 = vsel %vm6761_vm12, %v2296_v2, 0.0  ;;  %v7538_v35 = vmul.f32 %v2518_v4, %v7385_v47  ;;  %v9630_v28 = vld [vmem:[#allocation142_spill] sm:$0xff] }
 0x2ec   : > { %2009 = vrot.lane.b32.xlu1 %v9598_v31, %s4697_s13  ;;  %v7541_v14 = vmul.f32 %v2517_v0, %v7387_v55  ;;  %v2376_v58 = vadd.f32 %v2344_v45, %v1799_v29  ;;  %v2375_v1 = vadd.f32 %v2295_v63, %v1798_v54  ;;  %4348 = vmatpush3.bf16.msra.mxu1 %v4347_v62  ;;  %v7543_v48 = vpop.permute.xlu0 %1059  ;;  %v9629_v62 = vld [vmem:[#allocation89_spill] sm:$0xff]  ;;  %v9633_v52 = vld [vmem:[#allocation134_spill] sm:$0xff] }
 0x2ed   : > { %9625 = vst [vmem:[#allocation103_spill] sm:$0xff] %v7538_v35  ;;  %v7545_v60 = vpop.permute.xlu1 %1194  ;;  %2767 = vmatprep.mubr.f32.mxu0 %v7538_v35  ;;  %4350 = vmatprep.subr.bf16.mxu1 %v4349_v43  ;;  %v1123_v63 = vsel %vm1091_vm3, %v9630_v28, %v9629_v62  ;;  %v9632_v43 = vld [vmem:[#allocation135_spill] sm:$0xff]  ;;  %v9634_v54 = vld [vmem:[#allocation70_spill] sm:$0xff]  ;;  %v9636_v0 = vld [vmem:[#allocation77_spill] sm:$0xff] }
 0x2ee   : > { %9626 = vst [vmem:[#allocation26_spill] sm:$0xff] %v7541_v14  ;;  %2768 = vmatmul.mubr.f32.gmra.mrb[20].mxu0 %v7541_v14  ;;  %v2424_v55 = vadd.f32 %v7341_v38, %v2376_v58  ;;  %v2423_v47 = vadd.f32 %v7341_v38, %v2375_v1  ;;  %v954_v32 = vsel %vm946_vm5, %v9633_v52, %v9632_v43  ;;  %v9635_v29 = vld [vmem:[#allocation106_spill] sm:$0xff]  ;;  %v9641_v14 = vld [vmem:[#allocation43_spill] sm:$0xff] }
 0x2ef   : > { %2003 = vrot.lane.b32.xlu0 %v9621_v21, %s4697_s13  ;;  %v1267_v45 = vsel %vm1091_vm3, %v9636_v0, %v9635_v29  ;;  %v9637_v1 = vld [vmem:[#allocation130_spill] sm:$0xff]  ;;  %v7591_v35 = vsel %vm734_vm9, %v954_v32, 0.0  ;;  %v9642_v0 = vld [vmem:[#allocation145_spill] sm:$0xff]  ;;  %v1904_v32 = vsel %vm1876_vm1, %v7401_v12, %v9647_v17 }
 0x2f0   : > { %1079 = vrot.lane.b32.xlu1 %v7506_v46, %s4695_s11  ;;  %4352 = vmatpush3.bf16.msra.mxu1 %v4351_v39  ;;  %v7555_v41 = vpop.permute.xlu0 %1204  ;;  %v2456_v37 = vmul.f32 0.5, %v2424_v55  ;;  %v2455_v9 = vmul.f32 0.5, %v2423_v47  ;;  %v9638_v39 = vld [vmem:[#allocation33_spill] sm:$0xff]  ;;  %9640 = vst [vmem:[#allocation129_spill] sm:$0xff] %v7591_v35  ;;  %v1308_v28 = vmul.f32 %v9641_v14, %v1267_v45  ;;  %v9645_v38 = vld [vmem:[#allocation30_spill] sm:$0xff]  ;;  %v9649_v46 = vld [vmem:[#allocation143_spill] sm:$0xff]  ;;  %v1949_v3 = vmul.f32 %v9657_v22, %v1904_v32 }
 0x2f1   : > { %v1355_v59 = vpop.permute.xlu1 %1354  ;;  %v1164_v55 = vmul.f32 %v9638_v39, %v1123_v63  ;;  %v9644_v63 = vld [vmem:[#allocation49_spill] sm:$0xff]  ;;  %v9646_v31 = vld [vmem:[#allocation50_spill] sm:$0xff] }
 0x2f2   : > { %4551 = vtanh.f32 %v2456_v37  ;;  %v1660_v21 = vmul.f32 %v9646_v31, %v9645_v38  ;;  %v1263_v38 = vsel %vm1091_vm3, %v9635_v29, %v9652_v8  ;;  %v1439_v19 = vsel %vm1091_vm3, %v1355_v59, %v7339_v56 }
 0x2f3   : > { %2193 = vrot.lane.b32.xlu0 %v9627_v18, %s4697_s13  ;;  %4553 = vtanh.f32 %v2455_v9  ;;  %v1340_v50 = vadd.f32 %v1308_v28, %v1164_v55  ;;  %v1309_v51 = vmul.f32 %v9641_v14, %v1263_v38  ;;  %v9665_v38 = vld [vmem:[#allocation156_spill] sm:$0xff] }
 0x2f4   : > { %1384 = vrot.lane.b32.xlu1 %v9628_v23, %s4695_s11  ;;  %v7565_v2 = vpop.permute.xlu0 %1370  ;;  %v9658_v23 = vld [vmem:[#allocation141_spill] sm:$0xff] }
 0x2f5   : > { %v7567_v4 = vpop.permute.xlu1 %1410 }
 0x2f6   : > { %9631 = vst [vmem:[#allocation137_spill] sm:$0xff] %v7567_v4  ;;  %v1443_v58 = vsel %vm1091_vm3, %v7567_v4, %v1355_v59  ;;  %v9643_v4 = vld [vmem:[#allocation157_spill] sm:$0xff] }
 0x2f7   : > { %1226 = vrot.lane.b32.xlu0 %v9634_v54, %s4695_s11  ;;  %v1484_v15 = vmul.f32 %v9642_v0, %v1443_v58  ;;  %v1612_v18 = vmul.f32 %v9644_v63, %v9643_v4  ;;  %v9648_v58 = vld [vmem:[#allocation139_spill] sm:$0xff]  ;;  %v9651_v4 = vld [vmem:[#allocation149_spill] sm:$0xff] }
 0x2f8   : > { %1872 = vrot.lane.b32.xlu1 %v9637_v1, %s4697_s13  ;;  %v7585_v47 = vpop.permute.xlu0 %2402  ;;  %v950_v34 = vsel %vm946_vm5, %v9632_v43, %v9648_v58  ;;  %v1613_v1 = vmul.f32 %v9644_v63, %v9649_v46  ;;  %v1119_v43 = vsel %vm1091_vm3, %v9629_v62, %v9654_v42  ;;  %v9655_v46 = vld [vmem:[#allocation100_spill] sm:$0xff] }
 0x2f9   : > { %9639 = vst [vmem:[#allocation31_spill] sm:$0xff] %v7585_v47  ;;  %v7587_v52 = vpop.permute.xlu1 %1842  ;;  %v1516_v58 = vadd.f32 %v1484_v15, %v1340_v50  ;;  %v9659_v62 = vld [vmem:[#allocation168_spill] sm:$0xff]  ;;  %v1692_v50 = vadd.f32 %v1660_v21, %v1612_v18  ;;  %v1165_v32 = vmul.f32 %v9638_v39, %v1119_v43  ;;  %v1900_v18 = vsel %vm1876_vm1, %v9647_v17, %v7403_v44 }
 0x2fa   : > { %v1661_v43 = vmul.f32 %v9646_v31, %v9667_v61  ;;  %v9670_v61 = vld [vmem:[#allocation96_spill] sm:$0xff] }
 0x2fb   : > { %1394 = vrot.lane.b32.xlu0 %v7591_v35, %s4695_s11 }
 0x2fc   : > { %2177 = vrot.lane.b32.xlu1 %v7287_v5, %s4697_s13  ;;  %v4552_v45 = vpop.eup %4551  ;;  %v9650_v5 = vld [vmem:[#allocation175_spill] sm:$0xff]  ;;  %v7619_v28 = vpop.permute.xlu0 %1997 }
 0x2fd   : > { %v1740_v24 = vmul.f32 %v9651_v4, %v9650_v5  ;;  %v7621_v55 = vpop.permute.xlu1 %1963  ;;  %v4554_v12 = vpop.eup %4553  ;;  %v2520_v29 = vadd.f32 1.0, %v4552_v45  ;;  %v2044_v45 = vsel %vm1876_vm1, %v9655_v46, %v7455_v26 }
 0x2fe   : > { %9653 = vst [vmem:[#allocation136_spill] sm:$0xff] %v7621_v55  ;;  %v2048_v5 = vsel %vm1876_vm1, %v7621_v55, %v9655_v46  ;;  %v2519_v15 = vadd.f32 1.0, %v4554_v12  ;;  %v7654_v12 = vsel %vm735_vm8, %v950_v34, 0.0 }
 0x2ff   : > { %2019 = vrot.lane.b32.xlu0 %v9656_v25, %s4697_s13  ;;  %v2093_v13 = vmul.f32 %v9658_v23, %v2048_v5  ;;  %v7645_v55 = vmul.f32 %v2520_v29, %v2456_v37  ;;  %9663 = vst [vmem:[#allocation173_spill] sm:$0xff] %v7654_v12  ;;  %v1485_v37 = vmul.f32 %v9642_v0, %v1439_v19  ;;  %v9666_v19 = vld [vmem:[#allocation72_spill] sm:$0xff] }
 0x300   : > { %1065 = vrot.lane.b32.xlu1 %v9659_v62, %s4695_s11  ;;  %v7648_v59 = vpop.permute.xlu0 %2139  ;;  %v7656_v21 = vmul.f32 %v2519_v15, %v2455_v9  ;;  %v1772_v34 = vadd.f32 %v1740_v24, %v1692_v50  ;;  %v2094_v9 = vmul.f32 %v9658_v23, %v2044_v45  ;;  %v1341_v29 = vadd.f32 %v1309_v51, %v1165_v32 }
 0x301   : > { %9660 = vst [vmem:[#allocation131_spill] sm:$0xff] %v7645_v55  ;;  %v2125_v25 = vadd.f32 %v2093_v13, %v1949_v3  ;;  %9661 = vst [vmem:[#allocation125_spill] sm:$0xff] %v7648_v59  ;;  %v7650_v5 = vpop.permute.xlu1 %1995  ;;  %v1564_v3 = vsel %vm6742_vm10, %v1516_v58, 0.0  ;;  %v2224_v13 = vsel %vm1876_vm1, %v7648_v59, %v7521_v27  ;;  %2852 = vmatprep.mubr.f32.mxu1 %v7645_v55  ;;  %v9668_v58 = vld [vmem:[#allocation94_spill] sm:$0xff] }
 0x302   : > { %9662 = vst [vmem:[#allocation150_spill] sm:$0xff] %v7650_v5  ;;  %9664 = vst [vmem:[#allocation113_spill] sm:$0xff] %v7656_v21  ;;  %v2269_v17 = vmul.f32 %v9665_v38, %v2224_v13  ;;  %2853 = vmatmul.mubr.f32.gmra.mrb[20].mxu1 %v7656_v21  ;;  %v1741_v46 = vmul.f32 %v9651_v4, %v9668_v58  ;;  %v1950_v15 = vmul.f32 %v9657_v22, %v1900_v18  ;;  %v9671_v58 = vld [vmem:[#allocation128_spill] sm:$0xff] }
 0x303   : > { %2187 = vrot.lane.b32.xlu0 %v7654_v12, %s4697_s13  ;;  %v1804_v55 = vadd.f32 %v1772_v34, %v1564_v3  ;;  %v1693_v13 = vadd.f32 %v1661_v43, %v1613_v1  ;;  %v1517_v59 = vadd.f32 %v1485_v37, %v1341_v29  ;;  %v809_v51 = vsel %vm801_vm2, %v9606_v6, %v9671_v58 }
 0x304   : > { %1210 = vrot.lane.b32.xlu1 %v9666_v19, %s4695_s11  ;;  %v2301_v24 = vadd.f32 %v2269_v17, %v2125_v25  ;;  %v7682_v50 = vpop.permute.xlu0 %2171  ;;  %v2126_v25 = vadd.f32 %v2094_v9, %v1950_v15  ;;  %v7706_v43 = vsel %vm727_vm7, %v809_v51, 0.0  ;;  %v1259_v15 = vsel %vm1091_vm3, %v9652_v8, %v7545_v60 }
 0x305   : > { %9669 = vst [vmem:[#allocation140_spill] sm:$0xff] %v7682_v50  ;;  %v7684_v45 = vpop.permute.xlu1 %2155  ;;  %v1773_v1 = vadd.f32 %v1741_v46, %v1693_v13  ;;  %9672 = vst [vmem:[#allocation151_spill] sm:$0xff] %v7706_v43  ;;  %v1115_v58 = vsel %vm1091_vm3, %v9654_v42, %v7523_v7  ;;  %v1435_v51 = vsel %vm1091_vm3, %v7339_v56, %v7565_v2  ;;  %v9675_v42 = vld [vmem:[#allocation44_spill] sm:$0xff] }
 0x306   : > { %v2220_v21 = vsel %vm1876_vm1, %v7521_v27, %v7684_v45  ;;  %v2381_v32 = vadd.f32 %v2301_v24, %v1804_v55  ;;  %v1255_v8 = vsel %vm1091_vm3, %v7545_v60, %v7281_v36  ;;  %v9678_v36 = vld [vmem:[#allocation144_spill] sm:$0xff] }
 0x307   : > { %2195 = vrot.lane.b32.xlu0 %v9670_v61, %s4697_s13  ;;  %v2270_v18 = vmul.f32 %v9665_v38, %v2220_v21  ;;  %v1805_v17 = vadd.f32 %v1773_v1, %v1517_v59  ;;  %v1311_v61 = vmul.f32 %v9641_v14, %v1255_v8 }
 0x308   : > { %1400 = vrot.lane.b32.xlu1 %v7369_v40, %s4695_s11  ;;  %v7699_v3 = vpop.permute.xlu0 %1220  ;;  %v2429_v34 = vadd.f32 %v7585_v47, %v2381_v32  ;;  %v1310_v32 = vmul.f32 %v9641_v14, %v1259_v15  ;;  %v1111_v15 = vsel %vm1091_vm3, %v7523_v7, %v9678_v36  ;;  %v2036_v7 = vsel %vm1876_vm1, %v7487_v49, %v7650_v5  ;;  %v9680_v14 = vld [vmem:[#allocation34_spill] sm:$0xff] }
 0x309   : > { %v2302_v37 = vadd.f32 %v2270_v18, %v2126_v25  ;;  %v7701_v27 = vpop.permute.xlu1 %1067  ;;  %v9674_v25 = vld [vmem:[#allocation7_spill] sm:$0xff]  ;;  %v1662_v36 = vmul.f32 %v9646_v31, %v9680_v14  ;;  %v1892_v14 = vsel %vm1876_vm1, %v7587_v52, %v7453_v10  ;;  %v9711_v10 = vld [vmem:[#allocation76_spill] sm:$0xff] }
 0x30a   : > { %v2461_v55 = vmul.f32 0.5, %v2429_v34  ;;  %v1663_v34 = vmul.f32 %v9646_v31, %v9675_v42 }
 0x30b   : > { %v2350_v6 = vsel %vm6461_vm4, %v2302_v37, 0.0 }
 0x30c   : > { %1866 = vrot.lane.b32.xlu1 %v7706_v43, %s4697_s13  ;;  %v2382_v21 = vadd.f32 %v2350_v6, %v1805_v17  ;;  %v7712_v9 = vpop.permute.xlu0 %1388  ;;  %4555 = vtanh.f32 %v2461_v55  ;;  %v9676_v17 = vld [vmem:[#allocation166_spill] sm:$0xff]  ;;  %v1166_v6 = vmul.f32 %v9638_v39, %v1115_v58 }
 0x30d   : > { %v7714_v46 = vpop.permute.xlu1 %1212  ;;  %v1614_v56 = vmul.f32 %v9644_v63, %v9676_v17  ;;  %v9679_v17 = vld [vmem:[#allocation159_spill] sm:$0xff] }
 0x30e   : > { %v2430_v29 = vadd.f32 %v7585_v47, %v2382_v21  ;;  %v1486_v21 = vmul.f32 %v9642_v0, %v1435_v51  ;;  %v1342_v51 = vadd.f32 %v1310_v32, %v1166_v6  ;;  %v2040_v32 = vsel %vm1876_vm1, %v7455_v26, %v7487_v49 }
 0x30f   : > { %v2096_v26 = vmul.f32 %v9658_v23, %v2036_v7  ;;  %v1244_v20 = vsel %vm1091_vm3, %v7555_v41, %v7714_v46 }
 0x310   : > { %2011 = vrot.lane.b32.xlu1 %v9634_v54, %s4697_s13  ;;  %v2462_v53 = vmul.f32 0.5, %v2430_v29  ;;  %v7719_v59 = vpop.permute.xlu0 %2013  ;;  %v9677_v29 = vld [vmem:[#allocation161_spill] sm:$0xff]  ;;  %v1167_v54 = vmul.f32 %v9638_v39, %v1111_v15 }
 0x311   : > { %v7721_v33 = vpop.permute.xlu1 %1378  ;;  %v1615_v60 = vmul.f32 %v9644_v63, %v9677_v29  ;;  %v1896_v29 = vsel %vm1876_vm1, %v7403_v44, %v7587_v52  ;;  %v9683_v15 = vld [vmem:[#allocation81_spill] sm:$0xff] }
 0x312   : > { %9673 = vst [vmem:[#allocation105_spill] sm:$0xff] %v7721_v33  ;;  %4557 = vtanh.f32 %v2462_v53  ;;  %v1431_v42 = vsel %vm1091_vm3, %v7565_v2, %v7721_v33  ;;  %v9681_v2 = vld [vmem:[#allocation68_spill] sm:$0xff]  ;;  %v1951_v5 = vmul.f32 %v9657_v22, %v1896_v29  ;;  %v1952_v29 = vmul.f32 %v9657_v22, %v1892_v14 }
 0x313   : > { %v1742_v33 = vmul.f32 %v9651_v4, %v9681_v2  ;;  %v1694_v2 = vadd.f32 %v1662_v36, %v1614_v56  ;;  %v9685_v36 = vld [vmem:[#allocation64_spill] sm:$0xff] }
 0x314   : > { %1081 = vrot.lane.b32.xlu1 %v7706_v43, %s4695_s11  ;;  %v7729_v24 = vpop.permute.xlu0 %2181  ;;  %v1248_v56 = vsel %vm1091_vm3, %v9685_v36, %v7555_v41 }
 0x315   : > { %v7731_v13 = vpop.permute.xlu1 %1852  ;;  %v1774_v52 = vadd.f32 %v1742_v33, %v1694_v2 }
 0x316   : > { %v4556_v18 = vpop.eup %4555 }
 0x317   : > { %v2525_v8 = vadd.f32 1.0, %v4556_v18  ;;  %v1487_v18 = vmul.f32 %v9642_v0, %v1431_v42  ;;  %v2095_v42 = vmul.f32 %v9658_v23, %v2040_v32 }
 0x318   : > { %1386 = vrot.lane.b32.xlu1 %v9674_v25, %s4695_s11  ;;  %v7748_v1 = vpop.permute.xlu0 %1069  ;;  %v1518_v25 = vadd.f32 %v1486_v21, %v1342_v51  ;;  %v1743_v21 = vmul.f32 %v9651_v4, %v9683_v15  ;;  %v1343_v51 = vadd.f32 %v1311_v61, %v1167_v54  ;;  %v9688_v15 = vld [vmem:[#allocation6_spill] sm:$0xff] }
 0x319   : > { %v7750_v37 = vpop.permute.xlu1 %1860  ;;  %v7805_v39 = vmul.f32 %v2525_v8, %v2461_v55  ;;  %v2127_v33 = vadd.f32 %v2095_v42, %v1951_v5  ;;  %v9689_v42 = vld [vmem:[#allocation5_spill] sm:$0xff] }
 0x31a   : > { %v1566_v54 = vsel %vm6715_vm11, %v1518_v25, 0.0  ;;  %v1519_v61 = vadd.f32 %v1487_v18, %v1343_v51  ;;  %v9686_v25 = vld [vmem:[#allocation163_spill] sm:$0xff]  ;;  %v1288_v36 = vmul.f32 %v9689_v42, %v1248_v56 }
 0x31b   : > { %9684 = vst [vmem:[#allocation135_spill] sm:$0xff] %v7805_v39  ;;  %v1104_v32 = vsel %vm1091_vm3, %v9686_v25, %v7543_v48  ;;  %v1806_v14 = vadd.f32 %v1774_v52, %v1566_v54  ;;  %v9692_v52 = vld [vmem:[#allocation38_spill] sm:$0xff] }
 0x31c   : > { %1874 = vrot.lane.b32.xlu1 %v9679_v17, %s4697_s13  ;;  %v4558_v58 = vpop.eup %4557  ;;  %v7787_v6 = vpop.permute.xlu0 %1214  ;;  %v9762_v17 = vld [vmem:[#allocation172_spill] sm:$0xff] }
 0x31d   : > { %v7789_v44 = vpop.permute.xlu1 %2005  ;;  %v2526_v43 = vadd.f32 1.0, %v4558_v58  ;;  %v1695_v58 = vadd.f32 %v1663_v34, %v1615_v60  ;;  %v2128_v34 = vadd.f32 %v2096_v26, %v1952_v29  ;;  %v9687_v26 = vld [vmem:[#allocation127_spill] sm:$0xff] }
 0x31e   : > { %v1592_v51 = vmul.f32 %v9688_v15, %v9687_v26  ;;  %v9695_v26 = vld [vmem:[#allocation37_spill] sm:$0xff] }
 0x31f   : > { %v7801_v49 = vmul.f32 %v2526_v43, %v2462_v53  ;;  %v1775_v30 = vadd.f32 %v1743_v21, %v1695_v58 }
 0x320   : > { %2179 = vrot.lane.b32.xlu1 %v7591_v35, %s4697_s13  ;;  %v7813_v7 = vpop.permute.xlu0 %1854 }
 0x321   : > { %9682 = vst [vmem:[#allocation89_spill] sm:$0xff] %v7801_v49  ;;  %v2164_v43 = vpop.permute.xlu1 %2163  ;;  %2772 = vmatprep.mubr.f32.mxu0 %v7801_v49  ;;  %v1807_v29 = vadd.f32 %v1775_v30, %v1519_v61  ;;  %v9703_v49 = vld [vmem:[#allocation71_spill] sm:$0xff] }
 0x322   : > { %v2212_v55 = vsel %vm1876_vm1, %v2164_v43, %v7682_v50  ;;  %v2216_v53 = vsel %vm1876_vm1, %v7684_v45, %v2164_v43  ;;  %2773 = vmatmul.mubr.f32.gmra.mrb[22].mxu0 %v7805_v39  ;;  %v9690_v43 = vld [vmem:[#allocation54_spill] sm:$0xff]  ;;  %v1594_v39 = vmul.f32 %v9688_v15, %v9703_v49  ;;  %v9704_v50 = vld [vmem:[#allocation9_spill] sm:$0xff] }
 0x323   : > { %v2271_v60 = vmul.f32 %v9665_v38, %v2216_v53  ;;  %v2272_v8 = vmul.f32 %v9665_v38, %v2212_v55  ;;  %v9691_v55 = vld [vmem:[#allocation47_spill] sm:$0xff] }
 0x324   : > { %1402 = vrot.lane.b32.xlu1 %v7654_v12, %s4695_s11  ;;  %v7833_v2 = vpop.permute.xlu0 %1999  ;;  %v1643_v53 = vmul.f32 %v9691_v55, %v9690_v43  ;;  %v1640_v54 = vmul.f32 %v9691_v55, %v9692_v52  ;;  %v1642_v56 = vmul.f32 %v9691_v55, %v9695_v26  ;;  %v9706_v12 = vld [vmem:[#allocation108_spill] sm:$0xff]  ;;  %s4620_s11 = scalar_lea.vmem %s8808_s28, 1024 }
 0x325   : > { %v2303_v18 = vadd.f32 %v2271_v60, %v2127_v33  ;;  %v2304_v45 = vadd.f32 %v2272_v8, %v2128_v34  ;;  %v7835_v5 = vpop.permute.xlu1 %1075  ;;  %v9693_v33 = vld [vmem:[#allocation28_spill] sm:$0xff]  ;;  %v9694_v8 = vld [vmem:[#allocation46_spill] sm:$0xff]  ;;  %v9707_v22 = vand.u32 255, %v9706_v12  ;;  %p4621_p11 = scmp.ne.s32.totalorder %s8808_s28, %s4620_s11 }
 0x326   : > { %v1144_v34 = vmul.f32 %v9693_v33, %v1104_v32  ;;  %v1641_v25 = vmul.f32 %v9691_v55, %v9694_v8  ;;  %v9698_v55 = vld [vmem:[#allocation92_spill] sm:$0xff]  ;;  %v9700_v8 = vld [vmem:[#allocation53_spill] sm:$0xff] }
 0x327   : > { %v2352_v58 = vsel %vm6761_vm12, %v2304_v45, 0.0  ;;  %v2383_v21 = vadd.f32 %v2303_v18, %v1806_v14  ;;  %v1672_v18 = vadd.f32 %v1640_v54, %v1592_v51  ;;  %v9696_v45 = vld [vmem:[#allocation95_spill] sm:$0xff]  ;;  %v2029_v41 = vsel %vm1876_vm1, %v9698_v55, %v7619_v28  ;;  %p4622_p12 = pnand %p4621_p11, %p4781_p5 }
 0x328   : > { %v2384_v60 = vadd.f32 %v2352_v58, %v1807_v29  ;;  %v7855_v61 = vpop.permute.xlu0 %2189  ;;  %v1593_v32 = vmul.f32 %v9688_v15, %v9696_v45  ;;  %v1320_v29 = vadd.f32 %v1288_v36, %v1144_v34  ;;  %v9697_v58 = vld [vmem:[#allocation84_spill] sm:$0xff]  ;;  %v1289_v54 = vmul.f32 %v9689_v42, %v1244_v20 }
 0x329   : > { %v1381_v30 = vpop.permute.xlu1 %1380  ;;  %v2431_v14 = vadd.f32 %v7585_v47, %v2383_v21  ;;  %v1885_v43 = vsel %vm1876_vm1, %v9697_v58, %v7731_v13  ;;  %v1100_v21 = vsel %vm1091_vm3, %v7543_v48, %v7701_v27  ;;  %v9699_v36 = vld [vmem:[#allocation88_spill] sm:$0xff]  ;;  %v2025_v34 = vsel %vm1876_vm1, %v7619_v28, %v7789_v44  ;;  %v9702_v58 = vld [vmem:[#allocation11_spill] sm:$0xff]  ;;  %p4623_p13 = pneg %p4622_p12 }
 0x32a   : > { %v1420_v51 = vsel %vm1091_vm3, %v1381_v30, %v7712_v9  ;;  %v1424_v52 = vsel %vm1091_vm3, %v9699_v36, %v1381_v30  ;;  %v2432_v45 = vadd.f32 %v7585_v47, %v2384_v60  ;;  %v9701_v48 = vld [vmem:[#allocation116_spill] sm:$0xff]  ;;  %v1929_v38 = vmul.f32 %v9704_v50, %v1885_v43  ;;  %v9705_v47 = vld [vmem:[#allocation10_spill] sm:$0xff] }
 0x32b   : > { %v1464_v26 = vmul.f32 %v9700_v8, %v1424_v52  ;;  %v1720_v55 = vmul.f32 %v9702_v58, %v9701_v48  ;;  %v7892_v36 = vmul.f32 0.5, %v2431_v14  ;;  %v1145_v0 = vmul.f32 %v9693_v33, %v1100_v21  ;;  %v9710_v21 = vld [vmem:[#allocation111_spill] sm:$0xff] }
 0x32c   : > { %v7890_v30 = vpop.permute.xlu0 %1222  ;;  %v1881_v28 = vsel %vm1876_vm1, %v7731_v13, %v7750_v37  ;;  %v1465_v60 = vmul.f32 %v9700_v8, %v1420_v51  ;;  %v1673_v48 = vadd.f32 %v1641_v25, %v1593_v32  ;;  %v2073_v49 = vmul.f32 %v9705_v47, %v2029_v41 }
 0x32d   : > { %v1869_v20 = vpop.permute.xlu1 %1868  ;;  %v1496_v52 = vadd.f32 %v1464_v26, %v1320_v29  ;;  %v2074_v43 = vmul.f32 %v9705_v47, %v2025_v34  ;;  %vm7904_vm2 = vcmp.ge.s32.totalorder %v9707_v22, 16  ;;  %v1595_v23 = vmul.f32 %v9688_v15, %v9710_v21  ;;  %v9718_v21 = vld [vmem:[#allocation85_spill] sm:$0xff] }
 0x32e   : > { %v1721_v13 = vmul.f32 %v9702_v58, %v9711_v10  ;;  %v1321_v35 = vadd.f32 %v1289_v54, %v1145_v0  ;;  %v7912_v51 = vmul.f32 0.5, %v2432_v45  ;;  %v2105_v25 = vadd.f32 %v2073_v49, %v1929_v38  ;;  %v9712_v0 = vld [vmem:[#allocation79_spill] sm:$0xff]  ;;  %v9713_v54 = vld [vmem:[#allocation12_spill] sm:$0xff] }
 0x32f   : > { %v1930_v32 = vmul.f32 %v9704_v50, %v1881_v28  ;;  %v1752_v29 = vadd.f32 %v1720_v55, %v1672_v18  ;;  %4559 = vtanh.f32 %v7892_v36  ;;  %v1544_v34 = vsel %vm7904_vm2, %v1496_v52, 0.0  ;;  %v9714_v28 = vld [vmem:[#allocation65_spill] sm:$0xff]  ;;  %v9837_v52 = vld [vmem:[#allocation31_spill] sm:$0xff] }
 0x330   : > { %v7915_v41 = vpop.permute.xlu0 %1390  ;;  %v1497_v22 = vadd.f32 %v1465_v60, %v1321_v35  ;;  %4561 = vtanh.f32 %v7912_v51  ;;  %v1675_v45 = vadd.f32 %v1643_v53, %v1595_v23  ;;  %v1753_v35 = vadd.f32 %v1721_v13, %v1673_v48  ;;  %v9719_v23 = vld [vmem:[#allocation114_spill] sm:$0xff]  ;;  %v9720_v53 = vld [vmem:[#allocation56_spill] sm:$0xff] }
 0x331   : > { %v2174_v12 = vpop.permute.xlu1 %2173  ;;  %v2106_v15 = vadd.f32 %v2074_v43, %v1930_v32  ;;  %v7929_v55 = vadd.f32 %v1642_v56, %v1594_v39  ;;  %v9715_v60 = vand.u32 255, %v9714_v28  ;;  %v1784_v49 = vadd.f32 %v1752_v29, %v1544_v34  ;;  %v9722_v34 = vld [vmem:[#allocation62_spill] sm:$0xff] }
 0x332   : > { %v2201_v10 = vsel %vm1876_vm1, %v2174_v12, %v7729_v24  ;;  %v2205_v38 = vsel %vm1876_vm1, %v9712_v0, %v2174_v12  ;;  %v1905_v43 = vsel %vm1876_vm1, %v1869_v20, %v9718_v21  ;;  %v1723_v39 = vmul.f32 %v9702_v58, %v9719_v23 }
 0x333   : > { %v2249_v18 = vmul.f32 %v9713_v54, %v2205_v38  ;;  %v2250_v26 = vmul.f32 %v9713_v54, %v2201_v10  ;;  %vm7933_vm5 = vcmp.lt.s32.totalorder %v9715_v60, 240  ;;  %v1092_v56 = vsel %vm1091_vm3, %v7835_v5, %v9720_v53 }
 0x334   : > { %v7940_v10 = vpop.permute.xlu0 %2015  ;;  %v1096_v48 = vsel %vm1091_vm3, %v7701_v27, %v7835_v5  ;;  %v1785_v13 = vadd.f32 %v1753_v35, %v1497_v22  ;;  %v2049_v38 = vsel %vm1876_vm1, %v7719_v59, %v9722_v34  ;;  %v1240_v27 = vsel %vm1091_vm3, %v7714_v46, %v7699_v3 }
 0x335   : > { %v2281_v32 = vadd.f32 %v2249_v18, %v2105_v25  ;;  %v2282_v12 = vadd.f32 %v2250_v26, %v2106_v15  ;;  %v7942_v0 = vpop.permute.xlu1 %1061  ;;  %v9721_v25 = vld [vmem:[#allocation109_spill] sm:$0xff]  ;;  %v2021_v5 = vsel %vm1876_vm1, %v7789_v44, %v7719_v59  ;;  %v1932_v22 = vmul.f32 %v9704_v50, %v1905_v43 }
 0x336   : > { %v1236_v29 = vsel %vm1091_vm3, %v7699_v3, %v9721_v25  ;;  %v1146_v35 = vmul.f32 %v9693_v33, %v1096_v48  ;;  %v1147_v28 = vmul.f32 %v9693_v33, %v1092_v56  ;;  %v1877_v60 = vsel %vm1876_vm1, %v7750_v37, %v1869_v20  ;;  %v9725_v37 = vld [vmem:[#allocation162_spill] sm:$0xff] }
 0x337   : > { %v2330_v15 = vsel %vm7933_vm5, %v2282_v12, 0.0  ;;  %v2361_v18 = vadd.f32 %v2281_v32, %v1784_v49  ;;  %v9723_v49 = vld [vmem:[#allocation14_spill] sm:$0xff]  ;;  %v1755_v46 = vadd.f32 %v1723_v39, %v1675_v45  ;;  %v9724_v12 = vld [vmem:[#allocation107_spill] sm:$0xff]  ;;  %v2076_v44 = vmul.f32 %v9705_v47, %v2049_v38 }
 0x338   : > { %v2362_v26 = vadd.f32 %v2330_v15, %v1785_v13  ;;  %v7979_v32 = vpop.permute.xlu0 %2183  ;;  %v1722_v59 = vmul.f32 %v9702_v58, %v9724_v12  ;;  %v1291_v33 = vmul.f32 %v9689_v42, %v1236_v29  ;;  %v1290_v53 = vmul.f32 %v9689_v42, %v1240_v27 }
 0x339   : > { %v2409_v21 = vadd.f32 %v9723_v49, %v2361_v18  ;;  %v7981_v3 = vpop.permute.xlu1 %1206  ;;  %v4560_v23 = vpop.eup %4559  ;;  %v2225_v20 = vsel %vm1876_vm1, %v7855_v61, %v9725_v37  ;;  %v2075_v45 = vmul.f32 %v9705_v47, %v2021_v5  ;;  %v1931_v58 = vmul.f32 %v9704_v50, %v1877_v60  ;;  %v9726_v18 = vld [vmem:[#allocation91_spill] sm:$0xff]  ;;  %v9727_v60 = vld [vmem:[#allocation86_spill] sm:$0xff] }
 0x33a   : > { %v2410_v43 = vadd.f32 %v9723_v49, %v2362_v26  ;;  %v2108_v39 = vadd.f32 %v2076_v44, %v1932_v22  ;;  %v4562_v13 = vpop.eup %4561  ;;  %v1322_v25 = vadd.f32 %v1290_v53, %v1146_v35  ;;  %v1323_v34 = vadd.f32 %v1291_v33, %v1147_v28  ;;  %v9732_v44 = vld [vmem:[#allocation102_spill] sm:$0xff] }
 0x33b   : > { %v7993_v56 = vmul.f32 0.5, %v2409_v21  ;;  %v2527_v38 = vadd.f32 1.0, %v4560_v23  ;;  %v2252_v15 = vmul.f32 %v9713_v54, %v2225_v20  ;;  %v2528_v50 = vadd.f32 1.0, %v4562_v13 }
 0x33c   : > { %v2442_v48 = vmul.f32 0.5, %v2410_v43  ;;  %v7998_v29 = vpop.permute.xlu0 %1071  ;;  %v2197_v5 = vsel %vm1876_vm1, %v7729_v24, %v7855_v61  ;;  %v2107_v35 = vadd.f32 %v2075_v45, %v1931_v58  ;;  %v9728_v21 = vand.u32 255, %v9727_v60 }
 0x33d   : > { %4563 = vtanh.f32 %v7993_v56  ;;  %v1397_v42 = vpop.permute.xlu1 %1396  ;;  %v2284_v28 = vadd.f32 %v2252_v15, %v2108_v39  ;;  %v9733_v43 = vand.u32 255, %v9732_v44  ;;  %v8029_v23 = vmul.f32 %v2527_v38, %v7892_v36 }
 0x33e   : > { %v1412_v27 = vsel %vm1091_vm3, %v1397_v42, %v9726_v18  ;;  %v1416_v47 = vsel %vm1091_vm3, %v7712_v9, %v1397_v42  ;;  %4565 = vtanh.f32 %v2442_v48  ;;  %vm8015_vm13 = vcmp.ge.s32.totalorder %v9728_v21, 16  ;;  %v9741_v21 = vld [vmem:[#allocation36_spill] sm:$0xff] }
 0x33f   : > { %v1466_v22 = vmul.f32 %v9700_v8, %v1416_v47  ;;  %v1467_v26 = vmul.f32 %v9700_v8, %v1412_v27  ;;  %v8020_v9 = vmul.f32 %v2528_v50, %v7912_v51  ;;  %vm8024_vm14 = vcmp.lt.s32.totalorder %v9733_v43, 240  ;;  %9736 = vst [vmem:[#allocation106_spill] sm:$0xff] %v8029_v23  ;;  %v9742_v43 = vld [vmem:[#allocation119_spill] sm:$0xff] }
 0x340   : > { %v8031_v33 = vpop.permute.xlu0 %1216  ;;  %v2251_v37 = vmul.f32 %v9713_v54, %v2197_v5  ;;  %v1754_v51 = vadd.f32 %v1722_v59, %v7929_v55  ;;  %v2332_v36 = vsel %vm8024_vm14, %v2284_v28, 0.0  ;;  %v9740_v28 = vld [vmem:[#allocation19_spill] sm:$0xff] }
 0x341   : > { %9731 = vst [vmem:[#allocation134_spill] sm:$0xff] %v8020_v9  ;;  %v1498_v61 = vadd.f32 %v1466_v22, %v1322_v25  ;;  %v1499_v8 = vadd.f32 %v1467_v26, %v1323_v34  ;;  %v8033_v53 = vpop.permute.xlu1 %1862  ;;  %2857 = vmatprep.mubr.f32.mxu1 %v8020_v9  ;;  %v9738_v22 = vld [vmem:[#allocation174_spill] sm:$0xff] }
 0x342   : > { %2858 = vmatmul.mubr.f32.gmra.mrb[22].mxu1 %v8029_v23  ;;  %v2283_v58 = vadd.f32 %v2251_v37, %v2107_v35  ;;  %v9739_v35 = vld [vmem:[#allocation51_spill] sm:$0xff]  ;;  %v1245_v37 = vsel %vm1091_vm3, %v7981_v3, %v7787_v6 }
 0x343   : > { %v1546_v20 = vsel %vm8015_vm13, %v1498_v61, 0.0  ;;  %v1787_v45 = vadd.f32 %v1755_v46, %v1499_v8  ;;  %v9737_v46 = vld [vmem:[#allocation83_spill] sm:$0xff]  ;;  %v1648_v60 = vmul.f32 %v9740_v28, %v9739_v35  ;;  %v9743_v61 = vld [vmem:[#allocation17_spill] sm:$0xff] }
 0x344   : > { %v1786_v39 = vadd.f32 %v1754_v51, %v1546_v20  ;;  %v8043_v13 = vpop.permute.xlu0 %1856  ;;  %v1249_v15 = vsel %vm1091_vm3, %v9737_v46, %v7981_v3  ;;  %v1600_v8 = vmul.f32 %v9743_v61, %v9742_v43  ;;  %v9753_v43 = vld [vmem:[#allocation99_spill] sm:$0xff] }
 0x345   : > { %v8045_v25 = vpop.permute.xlu1 %2007  ;;  %v2364_v54 = vadd.f32 %v2332_v36, %v1787_v45  ;;  %v1296_v44 = vmul.f32 %v9741_v21, %v1249_v15  ;;  %v9746_v36 = vld [vmem:[#allocation20_spill] sm:$0xff]  ;;  %v9751_v15 = vld [vmem:[#allocation167_spill] sm:$0xff] }
 0x346   : > { %v2363_v34 = vadd.f32 %v2283_v58, %v1786_v39  ;;  %v9745_v58 = vld [vmem:[#allocation124_spill] sm:$0xff]  ;;  %v1680_v35 = vadd.f32 %v1648_v60, %v1600_v8 }
 0x347   : > { %v4564_v55 = vpop.eup %4563  ;;  %v2412_v59 = vadd.f32 %v9723_v49, %v2364_v54  ;;  %v1728_v39 = vmul.f32 %v9746_v36, %v9745_v58  ;;  %v9747_v54 = vld [vmem:[#allocation138_spill] sm:$0xff]  ;;  %v1601_v58 = vmul.f32 %v9743_v61, %v9753_v43  ;;  %v9756_v8 = vld [vmem:[#allocation16_spill] sm:$0xff] }
 0x348   : > { %v2411_v42 = vadd.f32 %v9723_v49, %v2363_v34  ;;  %v4566_v38 = vpop.eup %4565  ;;  %v8053_v18 = vpop.permute.xlu0 %2001  ;;  %v2505_v50 = vadd.f32 1.0, %v4564_v55  ;;  %v1105_v49 = vsel %vm1091_vm3, %v9738_v22, %v7942_v0  ;;  %v2030_v34 = vsel %vm1876_vm1, %v9747_v54, %v7833_v2  ;;  %v9754_v54 = vld [vmem:[#allocation21_spill] sm:$0xff] }
 0x349   : > { %v8055_v27 = vpop.permute.xlu1 %1077  ;;  %v8057_v47 = vmul.f32 0.5, %v2412_v59  ;;  %v2506_v26 = vadd.f32 1.0, %v4566_v38  ;;  %v9749_v59 = vld [vmem:[#allocation15_spill] sm:$0xff]  ;;  %v1101_v38 = vsel %vm1091_vm3, %v7942_v0, %v7748_v1 }
 0x34a   : > { %v8059_v5 = vmul.f32 0.5, %v2411_v42  ;;  %v8087_v55 = vmul.f32 %v2505_v50, %v7993_v56  ;;  %v1152_v3 = vmul.f32 %v9749_v59, %v1105_v49  ;;  %v9750_v42 = vld [vmem:[#allocation69_spill] sm:$0xff]  ;;  %v1297_v50 = vmul.f32 %v9741_v21, %v1245_v37 }
 0x34b   : > { %v8077_v45 = vmul.f32 %v2506_v26, %v2442_v48  ;;  %v1886_v48 = vsel %vm1876_vm1, %v9750_v42, %v7813_v7  ;;  %v2026_v49 = vsel %vm1876_vm1, %v7833_v2, %v8045_v25  ;;  %v9752_v26 = vld [vmem:[#allocation24_spill] sm:$0xff]  ;;  %v1882_v2 = vsel %vm1876_vm1, %v7813_v7, %v8033_v53 }
 0x34c   : > { %4567 = vtanh.f32 %v8059_v5  ;;  %v8075_v51 = vpop.permute.xlu0 %2191  ;;  %9748 = vst [vmem:[#allocation30_spill] sm:$0xff] %v8087_v55  ;;  %v1328_v22 = vadd.f32 %v1296_v44, %v1152_v3  ;;  %v1153_v44 = vmul.f32 %v9749_v59, %v1101_v38  ;;  %v1937_v43 = vmul.f32 %v9756_v8, %v1886_v48 }
 0x34d   : > { %v1383_v20 = vpop.permute.xlu1 %1382  ;;  %9744 = vst [vmem:[#allocation157_spill] sm:$0xff] %v8077_v45  ;;  %4569 = vtanh.f32 %v8057_v47  ;;  %2927 = vmatprep.mubr.f32.mxu0 %v8077_v45  ;;  %v1760_v45 = vadd.f32 %v1728_v39, %v1680_v35  ;;  %v1729_v38 = vmul.f32 %v9746_v36, %v6977_v11  ;;  %v1603_v7 = vmul.f32 %v9743_v61, %v9601_v16 }
 0x34e   : > { %v1421_v46 = vsel %vm1091_vm3, %v1383_v20, %v7915_v41  ;;  %v1425_v56 = vsel %vm1091_vm3, %v9751_v15, %v1383_v20  ;;  %2928 = vmatmul.mubr.f32.vlgmr.msra.gmra.mrb[24].mxu0 %v8087_v55  ;;  %v2081_v20 = vmul.f32 %v9754_v54, %v2030_v34  ;;  %v2082_v34 = vmul.f32 %v9754_v54, %v2026_v49  ;;  %v9757_v55 = vld [vmem:[#allocation58_spill] sm:$0xff] }
 0x34f   : > { %v1472_v0 = vmul.f32 %v9752_v26, %v1425_v56  ;;  %v1473_v37 = vmul.f32 %v9752_v26, %v1421_v46  ;;  %v9755_v56 = vld [vmem:[#allocation55_spill] sm:$0xff]  ;;  %v1651_v9 = vmul.f32 %v9740_v28, %v9757_v55  ;;  %v1329_v23 = vadd.f32 %v1297_v50, %v1153_v44  ;;  %v9758_v55 = vld [vmem:[#allocation73_spill] sm:$0xff] }
 0x350   : > { %v8115_v42 = vpop.permute.xlu0 %1224  ;;  %v1649_v60 = vmul.f32 %v9740_v28, %v9755_v56 }
 0x351   : > { %v1871_v15 = vpop.permute.xlu1 %1870  ;;  %v1504_v3 = vadd.f32 %v1472_v0, %v1328_v22  ;;  %v2113_v22 = vadd.f32 %v2081_v20, %v1937_v43  ;;  %v1938_v0 = vmul.f32 %v9756_v8, %v1882_v2  ;;  %v1505_v49 = vadd.f32 %v1473_v37, %v1329_v23  ;;  %v9760_v23 = vld [vmem:[#allocation115_spill] sm:$0xff] }
 0x352   : > { %v1681_v46 = vadd.f32 %v1649_v60, %v1601_v58  ;;  %v9759_v58 = vld [vmem:[#allocation27_spill] sm:$0xff]  ;;  %v1602_v37 = vmul.f32 %v9743_v61, %v9760_v23  ;;  %v2022_v23 = vsel %vm1876_vm1, %v8045_v25, %v7940_v10 }
 0x353   : > { %v1552_v39 = vsel %vm7904_vm2, %v1504_v3, 0.0  ;;  %v2114_v35 = vadd.f32 %v2082_v34, %v1938_v0  ;;  %v9761_v3 = vld [vmem:[#allocation48_spill] sm:$0xff] }
 0x354   : > { %v8134_v56 = vpop.permute.xlu0 %1392  ;;  %v1761_v60 = vadd.f32 %v1729_v38, %v1681_v46  ;;  %v1650_v43 = vmul.f32 %v9740_v28, %v9761_v3  ;;  %v1792_v63 = vadd.f32 %v1760_v45, %v1552_v39  ;;  %v9763_v38 = vld [vmem:[#allocation110_spill] sm:$0xff]  ;;  %v9764_v46 = vld [vmem:[#allocation153_spill] sm:$0xff] }
 0x355   : > { %v2176_v48 = vpop.permute.xlu1 %2175  ;;  %v1237_v61 = vsel %vm1091_vm3, %v7890_v30, %v9763_v38  ;;  %v1093_v28 = vsel %vm1091_vm3, %v8055_v27, %v9764_v46  ;;  %v9765_v39 = vld [vmem:[#allocation78_spill] sm:$0xff] }
 0x356   : > { %v4568_v4 = vpop.eup %4567  ;;  %v2202_v11 = vsel %vm1876_vm1, %v2176_v48, %v7979_v32  ;;  %v2206_v16 = vsel %vm1876_vm1, %v9758_v55, %v2176_v48  ;;  %v1906_v48 = vsel %vm1876_vm1, %v1871_v15, %v9762_v17  ;;  %v1793_v45 = vadd.f32 %v1761_v60, %v1505_v49 }
 0x357   : > { %v4570_v50 = vpop.eup %4569  ;;  %v2257_v20 = vmul.f32 %v9759_v58, %v2206_v16  ;;  %v2258_v44 = vmul.f32 %v9759_v58, %v2202_v11  ;;  %v2507_v2 = vadd.f32 1.0, %v4568_v4  ;;  %v1683_v4 = vadd.f32 %v1651_v9, %v1603_v7 }
 0x358   : > { %v2508_v62 = vadd.f32 1.0, %v4570_v50  ;;  %v8153_v0 = vpop.permute.xlu0 %2017  ;;  %v2050_v17 = vsel %vm1876_vm1, %v7940_v10, %v9765_v39  ;;  %v1097_v11 = vsel %vm1091_vm3, %v7748_v1, %v8055_v27  ;;  %v1940_v50 = vmul.f32 %v9756_v8, %v1906_v48  ;;  %v9768_v1 = vld [vmem:[#allocation154_spill] sm:$0xff]  ;;  %v9769_v48 = vld [vmem:[#allocation169_spill] sm:$0xff] }
 0x359   : > { %v2289_v55 = vadd.f32 %v2257_v20, %v2113_v22  ;;  %v2290_v34 = vadd.f32 %v2258_v44, %v2114_v35  ;;  %v8155_v16 = vpop.permute.xlu1 %1063  ;;  %v8172_v7 = vmul.f32 %v2507_v2, %v8059_v5  ;;  %v9767_v20 = vld [vmem:[#allocation122_spill] sm:$0xff]  ;;  %v1155_v60 = vmul.f32 %v9749_v59, %v1093_v28 }
 0x35a   : > { %v8180_v35 = vmul.f32 %v2508_v62, %v8057_v47  ;;  %v1731_v44 = vmul.f32 %v9746_v36, %v9767_v20  ;;  %v1241_v62 = vsel %vm1091_vm3, %v7787_v6, %v7890_v30  ;;  %v2084_v47 = vmul.f32 %v9754_v54, %v2050_v17  ;;  %v9771_v17 = vld [vmem:[#allocation67_spill] sm:$0xff] }
 0x35b   : > { %v2338_v22 = vsel %vm7933_vm5, %v2290_v34, 0.0  ;;  %v2369_v9 = vadd.f32 %v2289_v55, %v1792_v63  ;;  %v1878_v63 = vsel %vm1876_vm1, %v8033_v53, %v1871_v15  ;;  %v1299_v15 = vmul.f32 %v9741_v21, %v1237_v61  ;;  %v9770_v55 = vld [vmem:[#allocation104_spill] sm:$0xff] }
 0x35c   : > { %v2370_v49 = vadd.f32 %v2338_v22, %v1793_v45  ;;  %9766 = vst [vmem:[#allocation50_spill] sm:$0xff] %v8180_v35  ;;  %v8188_v5 = vpop.permute.xlu0 %2185  ;;  %3012 = vmatprep.mubr.f32.mxu1 %v8180_v35  ;;  %v1154_v3 = vmul.f32 %v9749_v59, %v1097_v11  ;;  %v2226_v6 = vsel %vm1876_vm1, %v8075_v51, %v9769_v48 }
 0x35d   : > { %v8190_v2 = vpop.permute.xlu1 %1208  ;;  %v2417_v27 = vadd.f32 %v9768_v1, %v2369_v9  ;;  %3013 = vmatmul.mubr.f32.vlgmr.msra.gmra.mrb[24].mxu1 %v8172_v7  ;;  %v1730_v34 = vmul.f32 %v9746_v36, %v9770_v55  ;;  %v1939_v10 = vmul.f32 %v9756_v8, %v1878_v63  ;;  %v2116_v25 = vadd.f32 %v2084_v47, %v1940_v50  ;;  %v9772_v55 = vld [vmem:[#allocation57_spill] sm:$0xff] }
 0x35e   : > { %v2418_v53 = vadd.f32 %v9768_v1, %v2370_v49  ;;  %v1298_v46 = vmul.f32 %v9741_v21, %v1241_v62  ;;  %v2083_v61 = vmul.f32 %v9754_v54, %v2022_v23  ;;  %v1331_v59 = vadd.f32 %v1299_v15, %v1155_v60 }
 0x35f   : > { %v2449_v30 = vmul.f32 0.5, %v2417_v27  ;;  %v2260_v39 = vmul.f32 %v9759_v58, %v2226_v6  ;;  %v2198_v21 = vsel %vm1876_vm1, %v7979_v32, %v8075_v51  ;;  %v1682_v11 = vadd.f32 %v1650_v43, %v1602_v37 }
 0x360   : > { %v2450_v38 = vmul.f32 0.5, %v2418_v53  ;;  %v8216_v28 = vpop.permute.xlu0 %1073  ;;  %v1330_v8 = vadd.f32 %v1298_v46, %v1154_v3  ;;  %v2115_v50 = vadd.f32 %v2083_v61, %v1939_v10  ;;  %v1763_v20 = vadd.f32 %v1731_v44, %v1683_v4  ;;  %v9773_v61 = vld [vmem:[#allocation80_spill] sm:$0xff] }
 0x361   : > { %v1399_v45 = vpop.permute.xlu1 %1398  ;;  %4571 = vtanh.f32 %v2449_v30  ;;  %v2292_v49 = vadd.f32 %v2260_v39, %v2116_v25  ;;  %v1762_v62 = vadd.f32 %v1730_v34, %v1682_v11  ;;  %v1250_v34 = vsel %vm1091_vm3, %v9772_v55, %v8190_v2  ;;  %v9775_v39 = vld [vmem:[#allocation40_spill] sm:$0xff] }
 0x362   : > { %v1413_v22 = vsel %vm1091_vm3, %v1399_v45, %v9771_v17  ;;  %v1417_v36 = vsel %vm1091_vm3, %v7915_v41, %v1399_v45  ;;  %4573 = vtanh.f32 %v2450_v38  ;;  %v2259_v41 = vmul.f32 %v9759_v58, %v2198_v21 }
 0x363   : > { %v1474_v54 = vmul.f32 %v9752_v26, %v1417_v36  ;;  %v1475_v9 = vmul.f32 %v9752_v26, %v1413_v22  ;;  %v2340_v26 = vsel %vm8024_vm14, %v2292_v49, 0.0  ;;  %v1304_v17 = vmul.f32 %v9775_v39, %v1250_v34  ;;  %v9776_v36 = vld [vmem:[#allocation60_spill] sm:$0xff]  ;;  %v9781_v49 = vld [vmem:[#allocation22_spill] sm:$0xff] }
 0x364   : > { %v8234_v47 = vpop.permute.xlu0 %1218  ;;  %v2291_v23 = vadd.f32 %v2259_v41, %v2115_v50  ;;  %v9780_v50 = vld [vmem:[#allocation158_spill] sm:$0xff]  ;;  %v9783_v41 = vld [vmem:[#allocation93_spill] sm:$0xff] }
 0x365   : > { %v1506_v60 = vadd.f32 %v1474_v54, %v1330_v8  ;;  %v1507_v63 = vadd.f32 %v1475_v9, %v1331_v59  ;;  %v8231_v27 = vpop.permute.xlu1 %1864  ;;  %v1106_v59 = vsel %vm1091_vm3, %v9773_v61, %v8155_v16  ;;  %v9777_v8 = vld [vmem:[#allocation39_spill] sm:$0xff]  ;;  %v9778_v54 = vld [vmem:[#allocation152_spill] sm:$0xff]  ;;  %v9788_v34 = vld [vmem:[#allocation66_spill] sm:$0xff] }
 0x366   : > { %v1656_v21 = vmul.f32 %v9777_v8, %v9776_v36  ;;  %v9779_v9 = vld [vmem:[#allocation35_spill] sm:$0xff]  ;;  %v9790_v36 = vld [vmem:[#allocation42_spill] sm:$0xff] }
 0x367   : > { %v1554_v32 = vsel %vm8015_vm13, %v1506_v60, 0.0  ;;  %v1795_v51 = vadd.f32 %v1763_v20, %v1507_v63  ;;  %v1608_v11 = vmul.f32 %v9779_v9, %v9778_v54  ;;  %v1736_v20 = vmul.f32 %v9781_v49, %v9780_v50  ;;  %v9782_v60 = vld [vmem:[#allocation90_spill] sm:$0xff]  ;;  %v9789_v61 = vld [vmem:[#allocation63_spill] sm:$0xff] }
 0x368   : > { %v1794_v37 = vadd.f32 %v1762_v62, %v1554_v32  ;;  %v8243_v3 = vpop.permute.xlu0 %1858  ;;  %v1609_v63 = vmul.f32 %v9779_v9, %v9782_v60  ;;  %v2031_v62 = vsel %vm1876_vm1, %v9783_v41, %v8053_v18  ;;  %v9784_v32 = vld [vmem:[#allocation32_spill] sm:$0xff]  ;;  %v9791_v60 = vld [vmem:[#allocation75_spill] sm:$0xff] }
 0x369   : > { %v8240_v43 = vpop.permute.xlu1 %2009  ;;  %v2372_v4 = vadd.f32 %v2340_v26, %v1795_v51  ;;  %v1160_v51 = vmul.f32 %v9784_v32, %v1106_v59  ;;  %v9785_v26 = vld [vmem:[#allocation8_spill] sm:$0xff]  ;;  %v1657_v59 = vmul.f32 %v9777_v8, %v9789_v61  ;;  %v2089_v54 = vmul.f32 %v9790_v36, %v2031_v62 }
 0x36a   : > { %v2371_v44 = vadd.f32 %v2291_v23, %v1794_v37  ;;  %v2027_v55 = vsel %vm1876_vm1, %v8053_v18, %v8240_v43  ;;  %v8321_v41 = vmul.f32 %v9646_v31, %v9791_v60 }
 0x36b   : > { %v4572_v53 = vpop.eup %4571  ;;  %v2420_v15 = vadd.f32 %v9768_v1, %v2372_v4 }
 0x36c   : > { %v4574_v58 = vpop.eup %4573  ;;  %v2513_v48 = vadd.f32 1.0, %v4572_v53  ;;  %v2419_v6 = vadd.f32 %v9768_v1, %v2371_v44  ;;  %v8284_v23 = vpop.permute.xlu0 %2003  ;;  %v1102_v44 = vsel %vm1091_vm3, %v8155_v16, %v7998_v29  ;;  %v1688_v16 = vadd.f32 %v1656_v21, %v1608_v11  ;;  %v9792_v11 = vld [vmem:[#allocation18_spill] sm:$0xff] }
 0x36d   : > { %v8250_v10 = vpop.permute.xlu1 %1079  ;;  %v2514_v25 = vadd.f32 1.0, %v4574_v58  ;;  %v8252_v46 = vmul.f32 0.5, %v2420_v15  ;;  %v9787_v15 = vld [vmem:[#allocation45_spill] sm:$0xff]  ;;  %v8325_v21 = vmul.f32 %v9646_v31, %v9666_v19 }
 0x36e   : > { %v8261_v1 = vmul.f32 %v2513_v48, %v2449_v30  ;;  %v8264_v22 = vmul.f32 0.5, %v2419_v6  ;;  %v1336_v6 = vadd.f32 %v1304_v17, %v1160_v51  ;;  %v1883_v17 = vsel %vm1876_vm1, %v8043_v13, %v8231_v27 }
 0x36f   : > { %v8258_v45 = vmul.f32 %v2514_v25, %v2450_v38  ;;  %4575 = vtanh.f32 %v8252_v46  ;;  %v1246_v38 = vsel %vm1091_vm3, %v8190_v2, %v8031_v33  ;;  %v9786_v2 = vld [vmem:[#allocation118_spill] sm:$0xff]  ;;  %v1659_v25 = vmul.f32 %v9777_v8, %v9788_v34  ;;  %v9795_v34 = vld [vmem:[#allocation132_spill] sm:$0xff] }
 0x370   : > { %v1887_v4 = vsel %vm1876_vm1, %v9786_v2, %v8043_v13  ;;  %v1305_v48 = vmul.f32 %v9775_v39, %v1246_v38  ;;  %4577 = vtanh.f32 %v8264_v22  ;;  %v1161_v38 = vmul.f32 %v9784_v32, %v1102_v44  ;;  %v9793_v2 = vld [vmem:[#allocation87_spill] sm:$0xff] }
 0x371   : > { %9774 = vst [vmem:[#allocation123_spill] sm:$0xff] %v8258_v45  ;;  %v1385_v30 = vpop.permute.xlu1 %1384  ;;  %2932 = vmatprep.mubr.f32.mxu0 %v8258_v45  ;;  %v1945_v62 = vmul.f32 %v9792_v11, %v1887_v4  ;;  %v2090_v51 = vmul.f32 %v9790_v36, %v2027_v55  ;;  %v1737_v13 = vmul.f32 %v9781_v49, %v9793_v2  ;;  %v9798_v2 = vld [vmem:[#allocation74_spill] sm:$0xff] }
 0x372   : > { %v1426_v37 = vsel %vm1091_vm3, %v9785_v26, %v1385_v30  ;;  %2933 = vmatmul.mubr.f32.gmra.mrb[26].mxu0 %v8261_v1  ;;  %v1422_v53 = vsel %vm1091_vm3, %v1385_v30, %v8134_v56  ;;  %v1768_v26 = vadd.f32 %v1736_v20, %v1688_v16  ;;  %v1337_v44 = vadd.f32 %v1305_v48, %v1161_v38  ;;  %v9796_v48 = vld [vmem:[#allocation23_spill] sm:$0xff]  ;;  %v9797_v38 = vld [vmem:[#allocation25_spill] sm:$0xff] }
 0x373   : > { %v1480_v58 = vmul.f32 %v9787_v15, %v1426_v37  ;;  %v1481_v18 = vmul.f32 %v9787_v15, %v1422_v53  ;;  %v1689_v37 = vadd.f32 %v1657_v59, %v1609_v63  ;;  %v8331_v53 = vpop.permute.xlu0 %2193  ;;  %v1610_v61 = vmul.f32 %v9779_v9, %v9795_v34 }
 0x374   : > { %v2121_v19 = vadd.f32 %v2089_v54, %v1945_v62  ;;  %v1946_v60 = vmul.f32 %v9792_v11, %v1883_v17 }
 0x375   : > { %v1873_v50 = vpop.permute.xlu1 %1872  ;;  %v1512_v30 = vadd.f32 %v1480_v58, %v1336_v6  ;;  %v9794_v58 = vld [vmem:[#allocation130_spill] sm:$0xff]  ;;  %v1513_v55 = vadd.f32 %v1481_v18, %v1337_v44  ;;  %v1769_v62 = vadd.f32 %v1737_v13, %v1689_v37  ;;  %v8350_v18 = vmul.f32 %v9646_v31, %v9798_v2 }
 0x376   : > { %v1611_v6 = vmul.f32 %v9779_v9, %v9794_v58  ;;  %v2122_v59 = vadd.f32 %v2090_v51, %v1946_v60  ;;  %v9800_v58 = vld [vmem:[#allocation112_spill] sm:$0xff] }
 0x377   : > { %v1560_v20 = vsel %vm7904_vm2, %v1512_v30, 0.0  ;;  %v9799_v30 = vld [vmem:[#allocation59_spill] sm:$0xff]  ;;  %v1907_v34 = vsel %vm1876_vm1, %v1873_v50, %v9800_v58  ;;  %v8366_v2 = vpop.permute.xlu0 %1226 }
 0x378   : > { %v1658_v44 = vmul.f32 %v9777_v8, %v9799_v30  ;;  %v1800_v35 = vadd.f32 %v1768_v26, %v1560_v20  ;;  %v1691_v37 = vadd.f32 %v1659_v25, %v1611_v6  ;;  %v9802_v30 = vld [vmem:[#allocation147_spill] sm:$0xff] }
 0x379   : > { %v2178_v4 = vpop.permute.xlu1 %2177  ;;  %v4576_v45 = vpop.eup %4575  ;;  %v1238_v26 = vsel %vm1091_vm3, %v8115_v42, %v9802_v30 }
 0x37a   : > { %v2203_v63 = vsel %vm1876_vm1, %v2178_v4, %v8188_v5  ;;  %v2207_v16 = vsel %vm1876_vm1, %v9796_v48, %v2178_v4  ;;  %v2516_v17 = vadd.f32 1.0, %v4576_v45  ;;  %v4578_v45 = vpop.eup %4577  ;;  %v1690_v13 = vadd.f32 %v1658_v44, %v1610_v61  ;;  %v9801_v48 = vld [vmem:[#allocation165_spill] sm:$0xff]  ;;  %v9803_v61 = vld [vmem:[#allocation82_spill] sm:$0xff] }
 0x37b   : > { %v2265_v9 = vmul.f32 %v9797_v38, %v2207_v16  ;;  %v2266_v54 = vmul.f32 %v9797_v38, %v2203_v63  ;;  %v2051_v8 = vsel %vm1876_vm1, %v8153_v0, %v9801_v48  ;;  %v1801_v16 = vadd.f32 %v1769_v62, %v1513_v55 }
 0x37c   : > { %v8360_v63 = vmul.f32 %v2516_v17, %v8252_v46  ;;  %v1098_v46 = vsel %vm1091_vm3, %v7998_v29, %v8250_v10  ;;  %v1948_v55 = vmul.f32 %v9792_v11, %v1907_v34  ;;  %v1242_v29 = vsel %vm1091_vm3, %v8031_v33, %v8115_v42  ;;  %v9804_v17 = vld [vmem:[#allocation146_spill] sm:$0xff]  ;;  %v9805_v42 = vld [vmem:[#allocation133_spill] sm:$0xff] }
 0x37d   : > { %v2297_v4 = vadd.f32 %v2265_v9, %v2121_v19  ;;  %v2298_v51 = vadd.f32 %v2266_v54, %v2122_v59  ;;  %v8357_v60 = vpop.permute.xlu1 %1065  ;;  %v1094_v19 = vsel %vm1091_vm3, %v8250_v10, %v9803_v61  ;;  %v2515_v59 = vadd.f32 1.0, %v4578_v45  ;;  %v8415_v45 = vpop.permute.xlu0 %1394 }
 0x37e   : > { %3017 = vmatprep.mubr.f32.mxu1 %v8360_v63  ;;  %v2092_v9 = vmul.f32 %v9790_v36, %v2051_v8  ;;  %v2023_v10 = vsel %vm1876_vm1, %v8240_v43, %v8153_v0  ;;  %v1162_v44 = vmul.f32 %v9784_v32, %v1098_v46  ;;  %v1739_v34 = vmul.f32 %v9781_v49, %v9805_v42 }
 0x37f   : > { %v2346_v25 = vsel %vm7933_vm5, %v2298_v51, 0.0  ;;  %v2377_v6 = vadd.f32 %v2297_v4, %v1800_v35  ;;  %v1879_v35 = vsel %vm1876_vm1, %v8231_v27, %v1873_v50  ;;  %v8401_v58 = vmul.f32 %v2515_v59, %v8264_v22  ;;  %v9806_v50 = vld [vmem:[#allocation29_spill] sm:$0xff] }
 0x380   : > { %v2378_v20 = vadd.f32 %v2346_v25, %v1801_v16  ;;  %v1163_v27 = vmul.f32 %v9784_v32, %v1094_v19  ;;  %v2227_v4 = vsel %vm1876_vm1, %v8331_v53, %v9806_v50  ;;  %v1306_v0 = vmul.f32 %v9775_v39, %v1242_v29  ;;  %v9807_v25 = vld [vmem:[#allocation160_spill] sm:$0xff] }
 0x381   : > { %v8392_v54 = vpop.permute.xlu1 %1210  ;;  %v2425_v62 = vadd.f32 %v9804_v17, %v2377_v6  ;;  %v1947_v43 = vmul.f32 %v9792_v11, %v1879_v35  ;;  %v2124_v22 = vadd.f32 %v2092_v9, %v1948_v55  ;;  %3018 = vmatmul.mubr.f32.gmra.mrb[26].mxu1 %v8401_v58  ;;  %v1738_v32 = vmul.f32 %v9781_v49, %v7369_v40 }
 0x382   : > { %v2426_v33 = vadd.f32 %v9804_v17, %v2378_v20  ;;  %v1307_v8 = vmul.f32 %v9775_v39, %v1238_v26  ;;  %v2091_v16 = vmul.f32 %v9790_v36, %v2023_v10  ;;  %v1338_v46 = vadd.f32 %v1306_v0, %v1162_v44  ;;  %v9808_v44 = vld [vmem:[#allocation159_spill] sm:$0xff] }
 0x383   : > { %v8411_v51 = vmul.f32 0.5, %v2425_v62  ;;  %v2268_v11 = vmul.f32 %v9797_v38, %v2227_v4  ;;  %v2199_v39 = vsel %vm1876_vm1, %v8188_v5, %v8331_v53  ;;  %v1771_v29 = vadd.f32 %v1739_v34, %v1691_v37  ;;  %v9810_v53 = vld [vmem:[#allocation168_spill] sm:$0xff]  ;;  %v8448_v4 = vpop.permute.xlu0 %2019 }
 0x384   : > { %v8418_v48 = vmul.f32 0.5, %v2426_v33  ;;  %v1339_v40 = vadd.f32 %v1307_v8, %v1163_v27  ;;  %v2123_v55 = vadd.f32 %v2091_v16, %v1947_v43  ;;  %v1770_v9 = vadd.f32 %v1738_v32, %v1690_v13  ;;  %v9809_v33 = vld [vmem:[#allocation49_spill] sm:$0xff]  ;;  %v9812_v13 = vld [vmem:[#allocation150_spill] sm:$0xff]  ;;  %v9813_v32 = vld [vmem:[#allocation7_spill] sm:$0xff] }
 0x385   : > { %v1401_v30 = vpop.permute.xlu1 %1400  ;;  %4579 = vtanh.f32 %v8411_v51  ;;  %v4096_v19 = vpop.f32.mrb[16].mxu1  ;;  %v2300_v20 = vadd.f32 %v2268_v11, %v2124_v22  ;;  %v1619_v5 = vmul.f32 %v9809_v33, %v9808_v44  ;;  %v1616_v42 = vmul.f32 %v9809_v33, %v9810_v53  ;;  %v9814_v8 = vld [vmem:[#allocation149_spill] sm:$0xff] }
 0x386   : > { %v1414_v6 = vsel %vm1091_vm3, %v1401_v30, %v9807_v25  ;;  %v1418_v61 = vsel %vm1091_vm3, %v8134_v56, %v1401_v30  ;;  %v4097_v26 = vpop.f32.mrb[17].mxu1  ;;  %4581 = vtanh.f32 %v8418_v48  ;;  %v2267_v50 = vmul.f32 %v9797_v38, %v2199_v39  ;;  %v9815_v11 = vld [vmem:[#allocation129_spill] sm:$0xff] }
 0x387   : > { %v1482_v49 = vmul.f32 %v9787_v15, %v1418_v61  ;;  %v1483_v36 = vmul.f32 %v9787_v15, %v1414_v6  ;;  %v4098_v59 = vadd.f32 %v4097_v26, %v4096_v19  ;;  %v9811_v15 = vld [vmem:[#allocation126_spill] sm:$0xff]  ;;  %v2032_v34 = vsel %vm1876_vm1, %v9812_v13, %v8284_v23  ;;  %v9816_v6 = vld [vmem:[#allocation121_spill] sm:$0xff] }
 0x388   : > { %v1617_v27 = vmul.f32 %v9809_v33, %v9811_v15  ;;  %v1744_v16 = vmul.f32 %v9814_v8, %v9813_v32  ;;  %v2299_v30 = vadd.f32 %v2267_v50, %v2123_v55  ;;  %v2348_v38 = vsel %vm8024_vm14, %v2300_v20, 0.0  ;;  %v9818_v55 = vld [vmem:[#allocation141_spill] sm:$0xff]  ;;  %v8492_v50 = vpop.permute.xlu0 %2187 }
 0x389   : > { %v1514_v56 = vadd.f32 %v1482_v49, %v1338_v46  ;;  %v1515_v35 = vadd.f32 %v1483_v36, %v1339_v40  ;;  %v8439_v62 = vpop.permute.xlu1 %1866  ;;  %v4052_v10 = vpop.f32.mrb[16].mxu0  ;;  %v1745_v25 = vmul.f32 %v9814_v8, %v9815_v11  ;;  %v1888_v61 = vsel %vm1876_vm1, %v9816_v6, %v8243_v3  ;;  %v9817_v36 = vld [vmem:[#allocation70_spill] sm:$0xff] }
 0x38a   : > { %v4053_v37 = vpop.f32.mrb[17].mxu0  ;;  %v1696_v49 = vadd.f32 %v8325_v21, %v1616_v42  ;;  %v8473_v26 = vmul.f32 %v9646_v31, %v9817_v36  ;;  %v2097_v20 = vmul.f32 %v9818_v55, %v2032_v34  ;;  %v9820_v21 = vld [vmem:[#allocation96_spill] sm:$0xff]  ;;  %v1247_v6 = vsel %vm1091_vm3, %v8392_v54, %v8234_v47  ;;  %v9827_v36 = vld [vmem:[#allocation33_spill] sm:$0xff] }
 0x38b   : > { %v1562_v0 = vsel %vm8015_vm13, %v1514_v56, 0.0  ;;  %v1803_v43 = vadd.f32 %v1771_v29, %v1515_v35  ;;  %v4054_v22 = vadd.f32 %v4053_v37, %v4052_v10  ;;  %v8477_v56 = vadd.f32 %v8321_v41, %v1619_v5  ;;  %v9821_v42 = vld [vmem:[#allocation52_spill] sm:$0xff] }
 0x38c   : > { %v1802_v46 = vadd.f32 %v1770_v9, %v1562_v0  ;;  %v1697_v35 = vadd.f32 %v8350_v18, %v1617_v27  ;;  %v8487_v53 = vmul.f32 %v9814_v8, %v9820_v21  ;;  %v8489_v31 = vadd.f32 %v1744_v16, %v1696_v49  ;;  %v9822_v18 = vld [vmem:[#allocation173_spill] sm:$0xff]  ;;  %v9823_v27 = vld [vmem:[#allocation148_spill] sm:$0xff] }
 0x38d   : > { %v8466_v19 = vadd.f32 %v4098_v59, %v4054_v22  ;;  %v8468_v40 = vpop.permute.xlu1 %2011  ;;  %v2380_v39 = vadd.f32 %v2348_v38, %v1803_v43  ;;  %v9819_v59 = vld [vmem:[#allocation151_spill] sm:$0xff]  ;;  %v1953_v15 = vmul.f32 %v9821_v42, %v1888_v61  ;;  %v1251_v37 = vsel %vm1091_vm3, %v9823_v27, %v8392_v54  ;;  %v9824_v22 = vld [vmem:[#allocation144_spill] sm:$0xff]  ;;  %v2196_v54 = vpop.permute.xlu0 %2195 }
 0x38e   : > { %v2379_v29 = vadd.f32 %v2299_v30, %v1802_v46  ;;  %v8482_v10 = vmul.f32 %v9809_v33, %v9819_v59  ;;  %v8495_v5 = vadd.f32 %v1745_v25, %v1697_v35  ;;  %v8499_v33 = vmul.f32 %v9814_v8, %v9822_v18  ;;  %v9825_v30 = vld [vmem:[#allocation77_spill] sm:$0xff]  ;;  %v9826_v61 = vld [vmem:[#allocation43_spill] sm:$0xff] }
 0x38f   : > { %v4580_v9 = vpop.eup %4579  ;;  %v2428_v44 = vadd.f32 %v9804_v17, %v2380_v39  ;;  %v8507_v43 = vadd.f32 %v2097_v20, %v1953_v15  ;;  %v1239_v38 = vsel %vm1091_vm3, %v8366_v2, %v9825_v30  ;;  %v1243_v46 = vsel %vm1091_vm3, %v8234_v47, %v8366_v2  ;;  %v9828_v59 = vld [vmem:[#allocation105_spill] sm:$0xff] }
 0x390   : > { %v2427_v41 = vadd.f32 %v9804_v17, %v2379_v29  ;;  %v4582_v0 = vpop.eup %4581  ;;  %v1107_v17 = vsel %vm1091_vm3, %v9824_v22, %v8357_v60  ;;  %v2521_v16 = vadd.f32 1.0, %v4580_v9  ;;  %v1312_v39 = vmul.f32 %v9826_v61, %v1251_v37 }
 0x391   : > { %v1082_v13 = vpop.permute.xlu1 %1081  ;;  %v8505_v34 = vmul.f32 0.5, %v2428_v44  ;;  %v2522_v25 = vadd.f32 1.0, %v4582_v0  ;;  %v1103_v2 = vsel %vm1091_vm3, %v8357_v60, %v8216_v28  ;;  %v1168_v20 = vmul.f32 %v9827_v36, %v1107_v17  ;;  %v9831_v0 = vld [vmem:[#allocation142_spill] sm:$0xff]  ;;  %v9832_v17 = vld [vmem:[#allocation125_spill] sm:$0xff] }
 0x392   : > { %v4099_v32 = vpop.f32.mrb[18].mxu1  ;;  %v8513_v8 = vmul.f32 0.5, %v2427_v41  ;;  %v2028_v29 = vsel %vm1876_vm1, %v8284_v23, %v8468_v40  ;;  %v1099_v35 = vsel %vm1091_vm3, %v8216_v28, %v1082_v13  ;;  %v8554_v21 = vmul.f32 %v2521_v16, %v8411_v51  ;;  %v9830_v41 = vld [vmem:[#allocation145_spill] sm:$0xff] }
 0x393   : > { %v4100_v11 = vpop.f32.mrb[19].mxu1  ;;  %4583 = vtanh.f32 %v8505_v34  ;;  %v8542_v47 = vmul.f32 %v2522_v25, %v8418_v48  ;;  %v1314_v23 = vmul.f32 %v9826_v61, %v1243_v46  ;;  %v9829_v48 = vld [vmem:[#allocation136_spill] sm:$0xff]  ;;  %v1313_v28 = vmul.f32 %v9826_v61, %v1247_v6 }
 0x394   : > { %v8529_v49 = vadd.f32 %v4100_v11, %v4099_v32  ;;  %4585 = vtanh.f32 %v8513_v8  ;;  %v2052_v15 = vsel %vm1876_vm1, %v8448_v4, %v9829_v48  ;;  %v1169_v27 = vmul.f32 %v9827_v36, %v1103_v2  ;;  %v9833_v6 = vld [vmem:[#allocation120_spill] sm:$0xff] }
 0x395   : > { %v1387_v9 = vpop.permute.xlu1 %1386  ;;  %2937 = vmatprep.mubr.f32.mxu0 %v8542_v47  ;;  %v1344_v37 = vadd.f32 %v1312_v39, %v1168_v20  ;;  %v1884_v51 = vsel %vm1876_vm1, %v8243_v3, %v8439_v62  ;;  %v1095_v22 = vsel %vm1091_vm3, %v1082_v13, %v9831_v0  ;;  %v2228_v32 = vsel %vm1876_vm1, %v2196_v54, %v9832_v17 }
 0x396   : > { %v1423_v60 = vsel %vm1091_vm3, %v1387_v9, %v8415_v45  ;;  %v1427_v44 = vsel %vm1091_vm3, %v9828_v59, %v1387_v9  ;;  %2938 = vmatmul.mubr.f32.gmra.mrb[28].mxu0 %v8554_v21  ;;  %v2098_v16 = vmul.f32 %v9818_v55, %v2028_v29  ;;  %v1170_v30 = vmul.f32 %v9827_v36, %v1099_v35 }
 0x397   : > { %v1488_v18 = vmul.f32 %v9830_v41, %v1427_v44  ;;  %v1489_v46 = vmul.f32 %v9830_v41, %v1423_v60  ;;  %v1315_v25 = vmul.f32 %v9826_v61, %v1239_v38  ;;  %v2024_v3 = vsel %vm1876_vm1, %v8468_v40, %v8448_v4  ;;  %v9834_v61 = vld [vmem:[#allocation156_spill] sm:$0xff] }
 0x398   : > { %v2100_v2 = vmul.f32 %v9818_v55, %v2052_v15  ;;  %v1345_v20 = vadd.f32 %v1313_v28, %v1169_v27  ;;  %v1954_v29 = vmul.f32 %v9821_v42, %v1884_v51  ;;  %v1171_v9 = vmul.f32 %v9827_v36, %v1095_v22  ;;  %v9835_v27 = vld [vmem:[#allocation140_spill] sm:$0xff] }
 0x399   : > { %v1875_v11 = vpop.permute.xlu1 %1874  ;;  %v1520_v13 = vadd.f32 %v1488_v18, %v1344_v37  ;;  %v2200_v38 = vsel %vm1876_vm1, %v8492_v50, %v2196_v54  ;;  %v2276_v35 = vmul.f32 %v9834_v61, %v2228_v32  ;;  %v2099_v59 = vmul.f32 %v9818_v55, %v2024_v3 }
 0x39a   : > { %v1908_v39 = vsel %vm1876_vm1, %v1875_v11, %v9833_v6  ;;  %v1880_v4 = vsel %vm1876_vm1, %v8439_v62, %v1875_v11  ;;  %v2130_v44 = vadd.f32 %v2098_v16, %v1954_v29  ;;  %v1346_v48 = vadd.f32 %v1314_v23, %v1170_v30 }
 0x39b   : > { %v1956_v40 = vmul.f32 %v9821_v42, %v1908_v39  ;;  %v1521_v15 = vadd.f32 %v1489_v46, %v1345_v20  ;;  %v1568_v18 = vsel %vm7904_vm2, %v1520_v13, 0.0  ;;  %v1347_v0 = vadd.f32 %v1315_v25, %v1171_v9  ;;  %v9836_v13 = vld [vmem:[#allocation137_spill] sm:$0xff] }
 0x39c   : > { %v1955_v55 = vmul.f32 %v9821_v42, %v1880_v4  ;;  %v1808_v30 = vadd.f32 %v8489_v31, %v1568_v18 }
 0x39d   : > { %v4584_v60 = vpop.eup %4583  ;;  %v2180_v28 = vpop.permute.xlu1 %2179  ;;  %v2132_v14 = vadd.f32 %v2100_v2, %v1956_v40  ;;  %v1809_v46 = vadd.f32 %v8495_v5, %v1521_v15  ;;  %v1698_v2 = vadd.f32 %v8473_v26, %v8482_v10  ;;  %v2275_v40 = vmul.f32 %v9834_v61, %v2200_v38 }
 0x39e   : > { %v4586_v36 = vpop.eup %4585  ;;  %v2204_v54 = vsel %vm1876_vm1, %v2180_v28, %v8492_v50  ;;  %v2208_v62 = vsel %vm1876_vm1, %v9835_v27, %v2180_v28  ;;  %v4055_v37 = vpop.f32.mrb[18].mxu0  ;;  %v2524_v51 = vadd.f32 1.0, %v4584_v60  ;;  %v2131_v20 = vadd.f32 %v2099_v59, %v1955_v55 }
 0x39f   : > { %v2273_v23 = vmul.f32 %v9834_v61, %v2208_v62  ;;  %v2274_v22 = vmul.f32 %v9834_v61, %v2204_v54  ;;  %v4056_v17 = vpop.f32.mrb[19].mxu0  ;;  %v2523_v50 = vadd.f32 1.0, %v4586_v36  ;;  %v2308_v29 = vadd.f32 %v2276_v35, %v2132_v14 }
 0x3a0   : > { %v4057_v32 = vadd.f32 %v4056_v17, %v4055_v37  ;;  %v8611_v16 = vmul.f32 %v2524_v51, %v8505_v34  ;;  %v1778_v60 = vadd.f32 %v8499_v33, %v1698_v2  ;;  %v2307_v59 = vadd.f32 %v2275_v40, %v2131_v20  ;;  %v4609_v20 = vld [vmem:[%s8857_s3 + $0x8] sm:$0xff] }
 0x3a1   : > { %v2305_v11 = vadd.f32 %v2273_v23, %v8507_v43  ;;  %v2306_v25 = vadd.f32 %v2274_v22, %v2130_v44  ;;  %v1403_v3 = vpop.permute.xlu1 %1402  ;;  %v8627_v31 = vmul.f32 %v2523_v50, %v8513_v8  ;;  %v2356_v44 = vsel %vm8024_vm14, %v2308_v29, 0.0 }
 0x3a2   : > { %v8617_v42 = vadd.f32 %v8529_v49, %v4057_v32  ;;  %v1415_v6 = vsel %vm1091_vm3, %v1403_v3, %v9836_v13  ;;  %v1419_v34 = vsel %vm1091_vm3, %v8415_v45, %v1403_v3  ;;  %3022 = vmatprep.mubr.f32.mxu1 %v8611_v16  ;;  %v1779_v45 = vadd.f32 %v8487_v53, %v8477_v56 }
 0x3a3   : > { %v2354_v5 = vsel %vm7933_vm5, %v2306_v25, 0.0  ;;  %v2385_v43 = vadd.f32 %v2305_v11, %v1808_v30  ;;  %v1490_v49 = vmul.f32 %v9830_v41, %v1419_v34  ;;  %v1491_v39 = vmul.f32 %v9830_v41, %v1415_v6  ;;  %3023 = vmatmul.mubr.f32.gmra.mrb[28].mxu1 %v8627_v31 }
 0x3a4   : > { %v2386_v57 = vadd.f32 %v2354_v5, %v1809_v46  ;;  %v4700_v25 = vmov 0.0|0.0   ;;  %v4703_v2 = vmov 4   ;;  %vm3039_vm1 = vcmask 261120  }
 0x3a5   : > { %v1522_v8 = vadd.f32 %v1490_v49, %v1346_v48  ;;  %v1523_v9 = vadd.f32 %v1491_v39, %v1347_v0  ;;  %v2433_v4 = vadd.f32 %v9837_v52, %v2385_v43  ;;  %v8649_v48 = vld [vmem:[%s8857_s3] sm:$0xff]  ;;  %4353 = vmatprep.subr.bf16.mxu0 %v4700_v25  ;;  %v4702_v39 = vmov 0.0   ;;  %4456 = vset.pattern.permute.xlu0 %v4703_v2 }
 0x3a6   : > { %v2434_v41 = vadd.f32 %v9837_v52, %v2386_v57  ;;  %3037 = vrot.lane.b32.xlu1 %v8649_v48, %s4699_s12  ;;  %3034 = vperm.xlu0 %4456, %v8649_v48   ;;  %v4610_v57 = vld [vmem:[%s8857_s3 + $0x10] sm:$0xff]  ;;  %vm3140_vm3 = vcmask 31744  }
 0x3a7   : > { %v1570_v26 = vsel %vm8015_vm13, %v1522_v8, 0.0  ;;  %v1811_v10 = vadd.f32 %v1779_v45, %v1523_v9  ;;  %v2465_v35 = vmul.f32 0.5, %v2433_v4  ;;  %v4611_v9 = vld [vmem:[%s8857_s3 + $0x18] sm:$0xff] }
 0x3a8   : > { %v1810_v56 = vadd.f32 %v1778_v60, %v1570_v26  ;;  %v2466_v53 = vmul.f32 0.5, %v2434_v41 }
 0x3a9   : > { %4587 = vtanh.f32 %v2465_v35  ;;  %v2388_v33 = vadd.f32 %v2356_v44, %v1811_v10 }
 0x3aa   : > { %4589 = vtanh.f32 %v2466_v53  ;;  %v2387_v12 = vadd.f32 %v2307_v59, %v1810_v56  ;;  %3132 = vrot.lane.b32.xlu1 %v8649_v48, %s4704_s14  ;;  %3136 = vrot.lane.b32.xlu0 %v4610_v57, %s4704_s14 }
 0x3ab   : > { %v2436_v38 = vadd.f32 %v9837_v52, %v2388_v33 }
 0x3ac   : > { %v2435_v61 = vadd.f32 %v9837_v52, %v2387_v12 }
 0x3ad   : > { %v2468_v24 = vmul.f32 0.5, %v2436_v38 }
 0x3ae   : > { %v2467_v15 = vmul.f32 0.5, %v2435_v61  ;;  %3134 = vrot.lane.b32.xlu1 %v4609_v20, %s4704_s14 }
 0x3af   : > { %4591 = vtanh.f32 %v2468_v24 }
 0x3b0   : > { %4593 = vtanh.f32 %v2467_v15 }
 0x3b2   : > { %3138 = vrot.lane.b32.xlu1 %v4611_v9, %s4704_s14 }
 0x3b3   : > { %v4588_v28 = vpop.eup %4587 }
 0x3b4   : > { %v4590_v36 = vpop.eup %4589  ;;  %v2529_v18 = vadd.f32 1.0, %v4588_v28 }
 0x3b5   : > { %v2530_v54 = vadd.f32 1.0, %v4590_v36 }
 0x3b6   : > { %v8656_v62 = vmul.f32 %v2529_v18, %v2465_v35 }
 0x3b7   : > { %v8654_v27 = vmul.f32 %v2530_v54, %v2466_v53 }
 0x3b9   : > { %v4592_v37 = vpop.eup %4591  ;;  %2942 = vmatprep.mubr.f32.mxu0 %v8654_v27 }
 0x3ba   : > { %v4594_v51 = vpop.eup %4593  ;;  %2943 = vmatmul.mubr.f32.gmra.mrb[30].mxu0 %v8656_v62  ;;  %v2532_v0 = vadd.f32 1.0, %v4592_v37 }
 0x3bb   : > { %v2531_v55 = vadd.f32 1.0, %v4594_v51  ;;  %4214 = vmatprep.mubr.msk.f32.mxu0 %vm4701_vm15, %v4702_v39 }
 0x3bc   : > { %v8660_v23 = vmul.f32 %v2532_v0, %v2468_v24 }
 0x3bd   : > { %v8662_v22 = vmul.f32 %v2531_v55, %v2467_v15 }
 0x3be   : > { %3027 = vmatprep.mubr.f32.mxu1 %v8660_v23 }
 0x3bf   : > { %3028 = vmatmul.mubr.f32.gmra.mrb[30].mxu1 %v8662_v22 }
 0x3c1   : > { %v4058_v17 = vpop.f32.mrb[20].mxu0 }
 0x3c2   : > { %v4059_v14 = vpop.f32.mrb[21].mxu0 }
 0x3c3   : > { %v4060_v32 = vadd.f32 %v4059_v14, %v4058_v17 }
 0x3d5   : > { %v4102_v50 = vpop.f32.mrb[20].mxu1 }
 0x3d6   : > { %v4103_v30 = vpop.f32.mrb[21].mxu1 }
 0x3d7   : > { %v4104_v46 = vadd.f32 %v4103_v30, %v4102_v50 }
 0x3d9   : > { %v2855_v11 = vadd.f32 %v4104_v46, %v4060_v32  ;;  %v4705_v46 = vmov 2  }
 0x3da   : > { %4457 = vset.pattern.permute.xlu0 %v4705_v46  ;;  %4458 = vset.pattern.permute.xlu1 %v4705_v46 }
 0x3db   : > { %3117 = vperm.xlu0 %4457, %v8649_v48   ;;  %3121 = vperm.xlu1 %4458, %v4609_v20  }
 0x3df   : > { %3125 = vperm.xlu1 %4458, %v4610_v57   ;;  %3129 = vperm.xlu0 %4457, %v4611_v9   ;;  %v3254_v57 = vld [vmem:[%s8859_s5 + $0x8] sm:$0xff]  ;;  %v3255_v9 = vld [vmem:[%s8859_s5 + $0x10] sm:$0xff] }
 0x3f5   : > { %v4061_v3 = vpop.f32.mrb[22].mxu0 }
 0x3f6   : > { %v4062_v13 = vpop.f32.mrb[23].mxu0 }
 0x3f7   : > { %v4063_v6 = vadd.f32 %v4062_v13, %v4061_v3 }
 0x415   : > { %v4105_v34 = vpop.f32.mrb[22].mxu1 }
 0x416   : > { %v4106_v5 = vpop.f32.mrb[23].mxu1 }
 0x417   : > { %v4107_v43 = vadd.f32 %v4106_v5, %v4105_v34 }
 0x418   : > { %v3038_v50 = vpop.permute.xlu1 %3037 }
 0x419   : > { %v2860_v49 = vadd.f32 %v4107_v43, %v4063_v6 }
 0x41c   : > { %v3133_v30 = vpop.permute.xlu1 %3132 }
 0x41d   : > { %4219 = vmatprep.mubr.msk.f32.mxu1 %vm3140_vm3, %v3133_v30  ;;  %v4706_v30 = vmov 3  }
 0x41e   : > { %4459 = vset.pattern.permute.xlu1 %v4706_v30  ;;  %4460 = vset.pattern.permute.xlu0 %v4706_v30  ;;  %v9854_v30 = vld [vmem:[#allocation134_spill] sm:$0xff] }
 0x41f   : > { %3699 = vperm.xlu1 %4459, %v8649_v48  }
 0x420   : > { %v3135_v43 = vpop.permute.xlu1 %3134 }
 0x421   : > { %v4140_v29 = vpop.f32.mrb[24].mxu0 }
 0x422   : > { %v4141_v45 = vpop.f32.mrb[25].mxu0 }
 0x423   : > { %v4142_v8 = vadd.f32 %v4141_v45, %v4140_v29  ;;  %v3253_v29 = vld [vmem:[%s8859_s5] sm:$0xff] }
 0x424   : > { %v3139_v20 = vpop.permute.xlu1 %3138  ;;  %v3261_v45 = vcombine.high %v3253_v29, %v3253_v29 }
 0x425   : > { %v2930_v52 = vadd.f32 %v4142_v8, %v8466_v19  ;;  %v3262_v8 = vcombine.high %v3254_v57, %v3254_v57 }
 0x430   : > { %v4184_v4 = vpop.f32.mrb[24].mxu1 }
 0x431   : > { %v4185_v40 = vpop.f32.mrb[25].mxu1 }
 0x432   : > { %v4186_v60 = vadd.f32 %v4185_v40, %v4184_v4  ;;  %v3263_v4 = vcombine.high %v3255_v9, %v3255_v9 }
 0x434   : > { %v3015_v41 = vadd.f32 %v4186_v60, %v2930_v52  ;;  %v3256_v52 = vld [vmem:[%s8859_s5 + $0x18] sm:$0xff] }
 0x435   : > { %v3264_v40 = vcombine.high %v3256_v52, %v3256_v52 }
 0x445   : > { %v4143_v26 = vpop.f32.mrb[26].mxu0 }
 0x446   : > { %v4144_v10 = vpop.f32.mrb[27].mxu0 }
 0x447   : > { %v4145_v35 = vadd.f32 %v4144_v10, %v4143_v26 }
 0x449   : > { %v2935_v59 = vadd.f32 %v4145_v35, %v8617_v42 }
 0x454   : > { %v4187_v44 = vpop.f32.mrb[26].mxu1 }
 0x455   : > { %v4188_v56 = vpop.f32.mrb[27].mxu1 }
 0x456   : > { %v4189_v53 = vadd.f32 %v4188_v56, %v4187_v44 }
 0x458   : > { %v3020_v33 = vadd.f32 %v4189_v53, %v2935_v59 }
 0x45a   : > { %v4354_v12 = vpack.c.bf16 %v3020_v33, %v3015_v41  ;;  %v3122_v60 = vpop.permute.xlu1 %3121 }
 0x45c   : > { %4355 = vmatpush3.bf16.msra.mxu0 %v4354_v12 }
 0x45d   : > { %4356 = vmatprep.subr.bf16.mxu0 %v4700_v25 }
 0x45e   : > { %v3126_v56 = vpop.permute.xlu1 %3125 }
 0x469   : > { %v4146_v38 = vpop.f32.mrb[28].mxu0 }
 0x46a   : > { %v4147_v61 = vpop.f32.mrb[29].mxu0 }
 0x46b   : > { %v4148_v24 = vadd.f32 %v4147_v61, %v4146_v38 }
 0x46d   : > { %v2940_v19 = vadd.f32 %v4148_v24, %v2855_v11  ;;  %v3035_v11 = vpop.permute.xlu0 %3034 }
 0x471   : > { %v3137_v2 = vpop.permute.xlu0 %3136 }
 0x475   : > { %v3118_v41 = vpop.permute.xlu0 %3117 }
 0x476   : > { %v4190_v15 = vpop.f32.mrb[28].mxu1 }
 0x477   : > { %v4191_v28 = vpop.f32.mrb[29].mxu1 }
 0x478   : > { %v4192_v36 = vadd.f32 %v4191_v28, %v4190_v15 }
 0x479   : > { %v3130_v38 = vpop.permute.xlu0 %3129 }
 0x47a   : > { %v3025_v18 = vadd.f32 %v4192_v36, %v2940_v19 }
 0x48d   : > { %v4149_v54 = vpop.f32.mrb[30].mxu0 }
 0x48e   : > { %v4150_v37 = vpop.f32.mrb[31].mxu0 }
 0x48f   : > { %v4151_v51 = vadd.f32 %v4150_v37, %v4149_v54 }
 0x491   : > { %v2945_v0 = vadd.f32 %v4151_v51, %v2860_v49 }
 0x492   : > { %v4193_v42 = vpop.f32.mrb[30].mxu1 }
 0x493   : > { %v4194_v55 = vpop.f32.mrb[31].mxu1 }
 0x494   : > { %v4195_v17 = vadd.f32 %v4194_v55, %v4193_v42 }
 0x496   : > { %v3030_v14 = vadd.f32 %v4195_v17, %v2945_v0 }
 0x498   : > { %v4357_v32 = vpack.c.bf16 %v3030_v14, %v3025_v18 }
 0x49a   : > { %4358 = vmatpush3.bf16.msra.mxu0 %v4357_v32 }
 0x49b   : > { %3986 = vmatprep.subr.msk.mxu0 %vm315_vm0, %v3261_v45 }
 0x49d   : > { %4215 = vmatmul.mubr.msk.f32.vlgmr.msra.gmra.mrb[32].mxu0 %vm3039_vm1, %v3038_v50  ;;  %v9838_v50 = vmov 0  }
 0x49e   : > { %3357 = vmatprep.mubr.f32.mxu0 %v4702_v39  ;;  %3987 = vmatpush1.msk.msra.mxu0 %vm315_vm0, %v3253_v29 }
 0x49f   : > { %3998 = vmatprep.subr.msk.mxu0 %vm315_vm0, %v3263_v4  ;;  %v9845_v4 = vld [vmem:[#allocation97_spill] sm:$0xff] }
 0x570   : > { %v3108_v25 = vpop.f32.mrb[32].mxu0 }
 0x571   : > { %v3109_v3 = vadd.f32 %v3108_v25, %v3035_v11  ;;  %v4216_v13 = vpop.f32.mrb[33].mxu0 }
 0x573   : > { %v3112_v6 = vmul.f32 0.5, %v3109_v3 }
 0x575   : > { %4595 = vtanh.f32 %v3112_v6 }
 0x57f   : > { %v4596_v34 = vpop.eup %4595 }
 0x580   : > { %v3114_v5 = vadd.f32 1.0, %v4596_v34 }
 0x582   : > { %v3115_v49 = vmul.f32 %v3114_v5, %v3112_v6  ;;  %v9840_v5 = vld [vmem:[#allocation164_spill] sm:$0xff] }
 0x584   : > { %4217 = vmatprep.subr.msk.mxu1 %vm315_vm0, %v3115_v49 }
 0x585   : > { %4218 = vmatpush3.msk.msra.mxu1 %vm315_vm0, %v3115_v49  ;;  %v9841_v49 = vld [vmem:[#allocation171_spill] sm:$0xff] }
 0x586   : > { %4220 = vmatmul.mubr.msk.f32.vlgmr.msra.gmra.mrb[32].mxu1 %vm3140_vm3, %v3135_v43  ;;  %3992 = vmatprep.subr.msk.mxu1 %vm315_vm0, %v3262_v8  ;;  %v9843_v8 = vld [vmem:[#allocation98_spill] sm:$0xff] }
 0x587   : > { %4222 = vmatprep.mubr.msk.f32.mxu1 %vm3140_vm3, %v3137_v2  ;;  %3993 = vmatpush1.msk.msra.mxu1 %vm315_vm0, %v3254_v57 }
 0x588   : > { %4004 = vmatprep.subr.msk.mxu1 %vm315_vm0, %v3264_v40 }
 0x58a   : > { %4223 = vmatmul.mubr.msk.f32.gmra.mrb[34].mxu1 %vm3140_vm3, %v3139_v20  ;;  %v9842_v20 = vld [vmem:[#allocation117_spill] sm:$0xff] }
 0x58b   : > { %3446 = vmatprep.mubr.f32.mxu1 %v4702_v39 }
 0x659   : > { %v4221_v26 = vpop.f32.mrb[32].mxu1 }
 0x65a   : > { %v3218_v10 = vpop.f32.mrb[33].mxu1  ;;  %v3224_v35 = vadd.f32 %v4221_v26, %v3122_v60  ;;  %v9846_v60 = vld [vmem:[#allocation13_spill] sm:$0xff] }
 0x65b   : > { %v3219_v59 = vadd.f32 %v3218_v10, %v3118_v41 }
 0x65c   : > { %v3238_v44 = vmul.f32 0.5, %v3224_v35 }
 0x65d   : > { %v3237_v53 = vmul.f32 0.5, %v3219_v59  ;;  %v4224_v33 = vpop.f32.mrb[34].mxu1 }
 0x65e   : > { %4597 = vtanh.f32 %v3238_v44  ;;  %v3228_v12 = vpop.f32.mrb[35].mxu1  ;;  %v3234_v24 = vadd.f32 %v4224_v33, %v3130_v38 }
 0x65f   : > { %4599 = vtanh.f32 %v3237_v53  ;;  %v3229_v61 = vadd.f32 %v3228_v12, %v3126_v56 }
 0x660   : > { %v3240_v15 = vmul.f32 0.5, %v3234_v24 }
 0x661   : > { %v3239_v19 = vmul.f32 0.5, %v3229_v61  ;;  %v9847_v61 = vld [vmem:[#allocation26_spill] sm:$0xff] }
 0x663   : > { %4601 = vtanh.f32 %v3239_v19  ;;  %v9848_v19 = vld [vmem:[#allocation113_spill] sm:$0xff] }
 0x664   : > { %4603 = vtanh.f32 %v3240_v15 }
 0x668   : > { %v4598_v28 = vpop.eup %4597 }
 0x669   : > { %v4600_v36 = vpop.eup %4599  ;;  %v3246_v37 = vmul.f32 0.5, %v4598_v28  ;;  %v9849_v28 = vld [vmem:[#allocation135_spill] sm:$0xff] }
 0x66a   : > { %v3245_v18 = vmul.f32 0.5, %v4600_v36 }
 0x66b   : > { %v3250_v0 = vadd.f32 0.5, %v3246_v37 }
 0x66c   : > { %v3249_v54 = vadd.f32 0.5, %v3245_v18  ;;  %v9850_v18 = vld [vmem:[#allocation106_spill] sm:$0xff] }
 0x66d   : > { %v4602_v51 = vpop.eup %4601 }
 0x66e   : > { %3988 = vmatmul.mubr.msk.f32.vlgmr.msra.gmra.mrb[34].mxu0 %vm3140_vm3, %v3249_v54  ;;  %3994 = vmatmul.mubr.msk.f32.vlgmr.msra.gmra.mrb[36].mxu1 %vm3140_vm3, %v3249_v54  ;;  %v3247_v42 = vmul.f32 0.5, %v4602_v51  ;;  %v4604_v55 = vpop.eup %4603 }
 0x66f   : > { %3363 = vmatprep.mubr.f32.mxu0 %v4702_v39  ;;  %3452 = vmatprep.mubr.f32.mxu1 %v4702_v39  ;;  %v3248_v14 = vmul.f32 0.5, %v4604_v55  ;;  %v9852_v55 = vld [vmem:[#allocation131_spill] sm:$0xff] }
 0x670   : > { %3999 = vmatpush1.msk.msra.mxu0 %vm315_vm0, %v3255_v9  ;;  %4005 = vmatpush1.msk.msra.mxu1 %vm315_vm0, %v3256_v52  ;;  %v3251_v17 = vadd.f32 0.5, %v3247_v42  ;;  %v9844_v52 = vld [vmem:[#allocation170_spill] sm:$0xff] }
 0x671   : > { %v3252_v32 = vadd.f32 0.5, %v3248_v14  ;;  %v9853_v14 = vld [vmem:[#allocation89_spill] sm:$0xff] }
 0x672   : > { %3989 = vmatmul.mubr.msk.f32.gmra.mrb[36].mxu0 %vm3140_vm3, %v3250_v0  ;;  %3995 = vmatmul.mubr.msk.f32.gmra.mrb[38].mxu1 %vm3140_vm3, %v3250_v0 }
 0x673   : > { %3369 = vmatprep.mubr.f32.mxu0 %v4702_v39  ;;  %3458 = vmatprep.mubr.f32.mxu1 %v4702_v39 }
 0x676   : > { %3990 = vmatmul.mubr.msk.f32.gmra.mrb[38].mxu0 %vm3140_vm3, %v3251_v17  ;;  %3996 = vmatmul.mubr.msk.f32.gmra.mrb[40].mxu1 %vm3140_vm3, %v3251_v17 }
 0x677   : > { %3375 = vmatprep.mubr.f32.mxu0 %v4702_v39  ;;  %3464 = vmatprep.mubr.f32.mxu1 %v4702_v39 }
 0x67a   : > { %3991 = vmatmul.mubr.msk.f32.gmra.mrb[40].mxu0 %vm3140_vm3, %v3252_v32  ;;  %3997 = vmatmul.mubr.msk.f32.gmra.mrb[42].mxu1 %vm3140_vm3, %v3252_v32 }
 0x67b   : > { %3535 = vmatprep.mubr.f32.mxu0 %v4702_v39  ;;  %3624 = vmatprep.mubr.f32.mxu1 %v4702_v39 }
 0x67e   : > { %4000 = vmatmul.mubr.msk.f32.vlgmr.msra.gmra.mrb[42].mxu0 %vm3140_vm3, %v3249_v54  ;;  %4006 = vmatmul.mubr.msk.f32.vlgmr.msra.gmra.mrb[44].mxu1 %vm3140_vm3, %v3249_v54 }
 0x67f   : > { %3541 = vmatprep.mubr.f32.mxu0 %v4702_v39  ;;  %3630 = vmatprep.mubr.f32.mxu1 %v4702_v39 }
 0x682   : > { %4001 = vmatmul.mubr.msk.f32.gmra.mrb[44].mxu0 %vm3140_vm3, %v3250_v0  ;;  %4007 = vmatmul.mubr.msk.f32.gmra.mrb[46].mxu1 %vm3140_vm3, %v3250_v0  ;;  %v9851_v0 = vld [vmem:[#allocation103_spill] sm:$0xff] }
 0x683   : > { %3547 = vmatprep.mubr.f32.mxu0 %v4702_v39  ;;  %3636 = vmatprep.mubr.f32.mxu1 %v4702_v39 }
 0x686   : > { %4002 = vmatmul.mubr.msk.f32.gmra.mrb[46].mxu0 %vm3140_vm3, %v3251_v17  ;;  %4008 = vmatmul.mubr.msk.f32.gmra.mrb[48].mxu1 %vm3140_vm3, %v3251_v17 }
 0x687   : > { %3553 = vmatprep.mubr.f32.mxu0 %v4702_v39  ;;  %3642 = vmatprep.mubr.f32.mxu1 %v4702_v39  ;;  %v9839_v39 = vld [vmem:[#allocation61_spill] sm:$0xff] }
 0x68a   : > { %4003 = vmatmul.mubr.msk.f32.gmra.mrb[48].mxu0 %vm3140_vm3, %v3252_v32  ;;  %4009 = vmatmul.mubr.msk.f32.gmra.mrb[50].mxu1 %vm3140_vm3, %v3252_v32 }
 0x68b   : > { %3737 = vmatprep.mubr.bf16.mxu0 %v9838_v50  ;;  %3778 = vmatprep.mubr.bf16.mxu1 %v9838_v50 }
 0x741   : > { %v3359_v46 = vpop.f32.mrb[34].mxu0  ;;  %v3448_v11 = vpop.f32.mrb[36].mxu1 }
 0x742   : > { %v3361_v25 = vpop.f32.mrb[35].mxu0  ;;  %v3450_v3 = vpop.f32.mrb[37].mxu1  ;;  %v3649_v34 = vmul.f32 %v3359_v46, %v9839_v39  ;;  %v3651_v43 = vmul.f32 %v3448_v11, %v9840_v5 }
 0x743   : > { %v3650_v9 = vmul.f32 %v3361_v25, %v9843_v8  ;;  %v3652_v48 = vmul.f32 %v3450_v3, %v9844_v52 }
 0x745   : > { %v3365_v13 = vpop.f32.mrb[36].mxu0  ;;  %v3454_v6 = vpop.f32.mrb[38].mxu1 }
 0x746   : > { %v3657_v2 = vmul.f32 %v3365_v13, %v9841_v49  ;;  %v3659_v29 = vmul.f32 %v3454_v6, %v9842_v20  ;;  %v3367_v57 = vpop.f32.mrb[37].mxu0  ;;  %v3456_v45 = vpop.f32.mrb[39].mxu1  ;;  %v9855_v49 = vld [vmem:[#allocation30_spill] sm:$0xff] }
 0x747   : > { %v3658_v40 = vmul.f32 %v3367_v57, %v9845_v4  ;;  %v3660_v41 = vmul.f32 %v3456_v45, %v9846_v60  ;;  %v9856_v45 = vld [vmem:[#allocation157_spill] sm:$0xff] }
 0x748   : > { %v3682_v26 = vpack.c.bf16 %v3657_v2, %v3649_v34  ;;  %v3684_v10 = vpack.c.bf16 %v3659_v29, %v3651_v43  ;;  %v3681_v43 = vld [vmem:[%s8856_s2] sm:$0xf] }
 0x749   : > { %v3683_v35 = vpack.c.bf16 %v3658_v40, %v3650_v9  ;;  %v3685_v59 = vpack.c.bf16 %v3660_v41, %v3652_v48  ;;  %v3371_v44 = vpop.f32.mrb[38].mxu0  ;;  %v3460_v56 = vpop.f32.mrb[40].mxu1  ;;  %v9857_v40 = vld [vmem:[#allocation50_spill] sm:$0xff]  ;;  %v9858_v41 = vld [vmem:[#allocation123_spill] sm:$0xff] }
 0x74a   : > { %v3373_v53 = vpop.f32.mrb[39].mxu0  ;;  %v3462_v33 = vpop.f32.mrb[41].mxu1  ;;  %v3665_v24 = vmul.f32 %v3371_v44, %v9847_v61  ;;  %v3667_v15 = vmul.f32 %v3460_v56, %v9848_v19 }
 0x74b   : > { %3705 = vmatprep.subr.bf16.mxu0 %v3683_v35  ;;  %3746 = vmatprep.subr.bf16.mxu1 %v3685_v59  ;;  %v3666_v42 = vmul.f32 %v3373_v53, %v9851_v0  ;;  %v3668_v17 = vmul.f32 %v3462_v33, %v9852_v55 }
 0x74c   : > { %3706 = vmatpush1.bf16.msra.mxu0 %v3682_v26  ;;  %3747 = vmatpush1.bf16.msra.mxu1 %v3684_v10 }
 0x74d   : > { %v3377_v12 = vpop.f32.mrb[40].mxu0  ;;  %v3466_v38 = vpop.f32.mrb[42].mxu1 }
 0x74e   : > { %v3673_v36 = vmul.f32 %v3377_v12, %v9849_v28  ;;  %v3675_v54 = vmul.f32 %v3466_v38, %v9850_v18  ;;  %v3379_v37 = vpop.f32.mrb[41].mxu0  ;;  %v3468_v51 = vpop.f32.mrb[43].mxu1 }
 0x74f   : > { %v3674_v32 = vmul.f32 %v3379_v37, %v9853_v14  ;;  %v3676_v46 = vmul.f32 %v3468_v51, %v9854_v30  ;;  %v4612_v14 = vld [vmem:[%s4821_s26] sm:$0xff]  ;;  %v4613_v30 = vld [vmem:[%s4821_s26 + $0x10] sm:$0xff] }
 0x750   : > { %v3690_v11 = vpack.c.bf16 %v3673_v36, %v3665_v24  ;;  %v3692_v25 = vpack.c.bf16 %v3675_v54, %v3667_v15 }
 0x751   : > { %v3691_v3 = vpack.c.bf16 %v3674_v32, %v3666_v42  ;;  %v3693_v13 = vpack.c.bf16 %v3676_v46, %v3668_v17  ;;  %v3537_v6 = vpop.f32.mrb[42].mxu0  ;;  %v3626_v39 = vpop.f32.mrb[44].mxu1 }
 0x752   : > { %v3539_v34 = vpop.f32.mrb[43].mxu0  ;;  %v3628_v5 = vpop.f32.mrb[45].mxu1  ;;  %v3653_v2 = vmul.f32 %v3537_v6, %v9855_v49  ;;  %v3655_v57 = vmul.f32 %v3626_v39, %v8172_v7  ;;  %v4615_v6 = vld [vmem:[%s4821_s26 + $0x18] sm:$0xff] }
 0x753   : > { %3707 = vmatprep.subr.bf16.mxu0 %v3691_v3  ;;  %3748 = vmatprep.subr.bf16.mxu1 %v3693_v13  ;;  %v3654_v8 = vmul.f32 %v3539_v34, %v9856_v45  ;;  %v3656_v60 = vmul.f32 %v3628_v5, %v9857_v40  ;;  %v4614_v3 = vld [vmem:[%s4821_s26 + $0x8] sm:$0xff] }
 0x754   : > { %3708 = vmatpush1.bf16.msra.mxu0 %v3690_v11  ;;  %3749 = vmatpush1.bf16.msra.mxu1 %v3692_v25 }
 0x755   : > { %v3543_v20 = vpop.f32.mrb[44].mxu0  ;;  %v3632_v29 = vpop.f32.mrb[46].mxu1 }
 0x756   : > { %v3661_v9 = vmul.f32 %v3543_v20, %v8261_v1  ;;  %v3663_v52 = vmul.f32 %v3632_v29, %v8401_v58  ;;  %v3545_v48 = vpop.f32.mrb[45].mxu0  ;;  %v3634_v4 = vpop.f32.mrb[47].mxu1 }
 0x757   : > { %v3662_v26 = vmul.f32 %v3545_v48, %v9858_v41  ;;  %v3664_v10 = vmul.f32 %v3634_v4, %v8360_v63  ;;  %4010 = vmatmul.mubr.msk.bf16.vlgmr.msra.gmra.mrb[52].mxu0 %vm3039_vm1, %v3681_v43  ;;  %4011 = vmatmul.mubr.msk.bf16.vlgmr.msra.gmra.mrb[52].mxu1 %vm3039_vm1, %v3681_v43  ;;  %v4617_v48 = vld [vmem:[%s4821_s26 + $0x30] sm:$0xff]  ;;  %v4618_v41 = vld [vmem:[%s4821_s26 + $0x28] sm:$0xff] }
 0x758   : > { %v3686_v35 = vpack.c.bf16 %v3661_v9, %v3653_v2  ;;  %v3688_v7 = vpack.c.bf16 %v3663_v52, %v3655_v57  ;;  %3819 = vmatprep.mubr.bf16.mxu0 %v9838_v50  ;;  %3860 = vmatprep.mubr.bf16.mxu1 %v9838_v50  ;;  %v4616_v9 = vld [vmem:[%s4821_s26 + $0x20] sm:$0xff] }
 0x759   : > { %v3687_v1 = vpack.c.bf16 %v3662_v26, %v3654_v8  ;;  %v3689_v58 = vpack.c.bf16 %v3664_v10, %v3656_v60  ;;  %v3549_v59 = vpop.f32.mrb[46].mxu0  ;;  %v3638_v44 = vpop.f32.mrb[48].mxu1  ;;  %v4619_v10 = vld [vmem:[%s4821_s26 + $0x38] sm:$0xff]  ;;  %s4707_s26 = smov [#allocation2]  }
 0x75a   : > { %v3551_v56 = vpop.f32.mrb[47].mxu0  ;;  %v3640_v53 = vpop.f32.mrb[49].mxu1  ;;  %v3669_v12 = vmul.f32 %v3549_v59, %v8554_v21  ;;  %v3671_v38 = vmul.f32 %v3638_v44, %v8627_v31  ;;  %s4624_s13 = sshll.u32 %s4707_s26, 4  ;;  %s4625_s13 = int_to_ptr.vmem [resolvable:$false] %s4624_s13 }
 0x75b   : > { %3787 = vmatprep.subr.bf16.mxu0 %v3687_v1  ;;  %3828 = vmatprep.subr.bf16.mxu1 %v3689_v58  ;;  %v3670_v15 = vmul.f32 %v3551_v56, %v8542_v47  ;;  %v3672_v28 = vmul.f32 %v3640_v53, %v8611_v16  ;;  %v3700_v47 = vpop.permute.xlu1 %3699  ;;  %s4626_s12 = scalar_lea.vmem %s4625_s13, 2048  ;;  %p4627_p0 = scmp.lt.s32.totalorder %s8808_s28, %s4625_s13 }
 0x75c   : > { %3788 = vmatpush1.bf16.msra.mxu0 %v3686_v35  ;;  %3829 = vmatpush1.bf16.msra.mxu1 %v3688_v7  ;;  %p4628_p1 = scmp.lt.s32.totalorder %s4626_s12, %s4620_s11 }
 0x75d   : > { %v3555_v63 = vpop.f32.mrb[48].mxu0  ;;  %v3644_v33 = vpop.f32.mrb[50].mxu1 }
 0x75e   : > { %v3677_v61 = vmul.f32 %v3555_v63, %v8656_v62  ;;  %v3679_v50 = vmul.f32 %v3644_v33, %v8662_v22  ;;  %v3557_v24 = vpop.f32.mrb[49].mxu0  ;;  %v3646_v19 = vpop.f32.mrb[51].mxu1  ;;  %p4629_p2 = por %p4628_p1, %p4627_p0 }
 0x75f   : > { %v3678_v36 = vmul.f32 %v3557_v24, %v8654_v27  ;;  %v3680_v18 = vmul.f32 %v3646_v19, %v8660_v23 }
 0x760   : > { %v3694_v54 = vpack.c.bf16 %v3677_v61, %v3669_v12  ;;  %v3696_v21 = vpack.c.bf16 %v3679_v50, %v3671_v38  ;;  %p4630_p3 = pnand %p4629_p2, %p4623_p13 }
 0x761   : > { %v3695_v37 = vpack.c.bf16 %v3678_v36, %v3670_v15  ;;  %v3697_v31 = vpack.c.bf16 %v3680_v18, %v3672_v28 }
 0x763   : > { %3789 = vmatprep.subr.bf16.mxu0 %v3695_v37  ;;  %3830 = vmatprep.subr.bf16.mxu1 %v3697_v31 }
 0x764   : > { %3790 = vmatpush1.bf16.msra.mxu0 %v3694_v54  ;;  %3831 = vmatpush1.bf16.msra.mxu1 %v3696_v21 }
 0x767   : > { %4012 = vmatmul.mubr.msk.bf16.vlgmr.msra.gmra.mrb[56].mxu0 %vm3039_vm1, %v3681_v43  ;;  %4013 = vmatmul.mubr.msk.bf16.vlgmr.msra.gmra.mrb[56].mxu1 %vm3039_vm1, %v3681_v43 }
 0x82a   : > { %v3739_v16 = vpop.f32.mrb[52].mxu0  ;;  %v3780_v27 = vpop.f32.mrb[52].mxu1 }
 0x82b   : > { %v3741_v62 = vpop.f32.mrb[53].mxu0  ;;  %v3782_v23 = vpop.f32.mrb[53].mxu1  ;;  %v3740_v22 = vadd.f32 %v3739_v16, %v3700_v47  ;;  %v3781_v51 = vadd.f32 %v3780_v27, %v3700_v47 }
 0x82c   : > { %v3743_v0 = vpop.f32.mrb[54].mxu0  ;;  %v3784_v42 = vpop.f32.mrb[54].mxu1  ;;  %v3742_v55 = vadd.f32 %v3741_v62, %v3700_v47  ;;  %v3783_v17 = vadd.f32 %v3782_v23, %v3700_v47 }
 0x82d   : > { %v3869_v32 = vadd.f32 %v4612_v14, %v3740_v22  ;;  %v3871_v46 = vadd.f32 %v4613_v30, %v3781_v51  ;;  %v3744_v11 = vpop.f32.mrb[55].mxu0  ;;  %v3785_v25 = vpop.f32.mrb[55].mxu1 }
 0x82e   : > { %v3870_v13 = vadd.f32 %v4614_v3, %v3742_v55  ;;  %v3872_v39 = vadd.f32 %v4615_v6, %v3783_v17 }
 0x82f   : > { %3877 = vst [vmem:[%s8791_s19] sm:$0xff] %v3869_v32  ;;  %3879 = vst [vmem:[%s8791_s19 + $0x10] sm:$0xff] %v3871_v46 }
 0x830   : > { %3878 = vst [vmem:[%s8791_s19 + $0x8] sm:$0xff] %v3870_v13  ;;  %3880 = vst [vmem:[%s8791_s19 + $0x18] sm:$0xff] %v3872_v39 }
 0x83a   : > { %v3821_v34 = vpop.f32.mrb[56].mxu0  ;;  %v3862_v5 = vpop.f32.mrb[56].mxu1 }
 0x83b   : > { %v3822_v43 = vadd.f32 %v3821_v34, %v3700_v47  ;;  %v3863_v49 = vadd.f32 %v3862_v5, %v3700_v47  ;;  %v3823_v2 = vpop.f32.mrb[57].mxu0  ;;  %v3864_v20 = vpop.f32.mrb[57].mxu1 }
 0x83c   : > { %v3824_v29 = vadd.f32 %v3823_v2, %v3700_v47  ;;  %v3865_v57 = vadd.f32 %v3864_v20, %v3700_v47  ;;  %v3825_v45 = vpop.f32.mrb[58].mxu0  ;;  %v3866_v8 = vpop.f32.mrb[58].mxu1 }
 0x83d   : > { %v3873_v52 = vadd.f32 %v4616_v9, %v3822_v43  ;;  %v3875_v4 = vadd.f32 %v4617_v48, %v3863_v49  ;;  %v3826_v40 = vpop.f32.mrb[59].mxu0  ;;  %v3867_v60 = vpop.f32.mrb[59].mxu1 }
 0x83e   : > { %v3874_v26 = vadd.f32 %v4618_v41, %v3824_v29  ;;  %v3876_v35 = vadd.f32 %v4619_v10, %v3865_v57 }
 0x83f   : > { %3881 = vst [vmem:[%s8791_s19 + $0x20] sm:$0xff] %v3873_v52  ;;  %3883 = vst [vmem:[%s8791_s19 + $0x30] sm:$0xff] %v3875_v4 }
 0x840   : > { %3882 = vst [vmem:[%s8791_s19 + $0x28] sm:$0xff] %v3874_v26  ;;  %3884 = vst [vmem:[%s8791_s19 + $0x38] sm:$0xff] %v3876_v35 }
 0x841   : > { %4633 = shalt.err (!%p4630_p3)
}
 0x842   : > { %s4634_s14 = scalar_lea.hbm %s8806_s9, 1024  ;;  %s4638_s17 = scalar_lea.hbm %s8860_s6, 2048 }
 0x843   : > { %p4635_p4 = scmp.ne.s32.totalorder %s8806_s9, %s4634_s14  ;;  %p4639_p9 = scmp.lt.u32.totalorder %s8806_s9, %s8860_s6 }
 0x844   : > { %p4640_p10 = scmp.lt.u32.totalorder %s4638_s17, %s4634_s14  ;;  %p4642_p12 = scmp.lt.u32.totalorder %s4634_s14, %s8806_s9 }
 0x845   : > { %p4636_p7 = pnand %p4635_p4, %p4781_p5 }
 0x846   : > { %p4641_p11 = por %p4640_p10, %p4639_p9 }
 0x847   : > { %p4637_p8 = pneg %p4636_p7 }
 0x848   : > { %p4643_p13 = por %p4642_p12, %p4641_p11 }
 0x84a   : > { %p4644_p0 = pnand %p4643_p13, %p4637_p8 }
 0x84c   : > { %4647 = shalt.err (!%p4644_p0)
}
 0x84d   : > { %4359 = dma.vmem_to_hbm [thread:$0]  (%p4781_p5), %s8808_s28, 1024, %s8806_s9, %s3886_s10  }
 0x84e PF: > { %p4365_p1 = scmp.ge.s32.totalorder %s4682_s24, 2  ;;  %s3912_s20 = sand.u32 1, %s4670_s21  }
 0x84f   : > { %s3913_s25 = scalar_lea.sflag [#allocation3], %s3912_s20 }
 0x850   : > { %p4362_p2 = pnand %p4365_p1, %p4785_p6 }
 0x852   : > { %4665 = dma.done.wait (!%p4362_p2), %s3913_s25, 1024  }
 0x853   : > { %4667 = vsyncadd (!%p4362_p2), %s3913_s25, 4294966272  ;;  %p16_p3 = scmp.ge.s32.totalorder %s4768_s27, 4   ;;  %s9859_s21 = smov %s4674_s22 }
 0x854   : > { %s9860_s22 = smov %s4678_s23  ;;  %s9861_s23 = smov %s4779_s30 }
 0x855   : > { %s9862_s24 = smov %s4768_s27  ;;  %18 = sbr.rel (!%p16_p3) target bundleno = 3 (0x3), region = 79 }
 0x85c   :  { %3918 = vsyncpa [#allocation3], 1 }
 0x85d   :  { %3920 = vsyncpa [#allocation3 + $0x1], 1 }

</bundles_post_ra>
